<compile_context>
chip_gen: v5e
topology: v5e:2x2
jax: 0.10.0
libtpu: 0.0.40
codegen_flags: <defaults>
</compile_context>

<pallas_src>
import functools
import math

import jax
import jax.numpy as jnp
from jax.experimental import pallas as pl
from jax.experimental.pallas import tpu as pltpu

# ----------------------- small synthetic CLIP config -----------------------
BATCH = 2                          # frames in the "video"
IN_CH = 3
IMG = 16
PATCH = 8
GRID_HW = IMG // PATCH             # 2
NUM_PATCHES = GRID_HW * GRID_HW    # 4
SEQ = NUM_PATCHES + 1              # 5  (CLS + patches)
HIDDEN = 128                       # lane-dense toy stand-in for 1024
HEADS = 4
HEAD_DIM = HIDDEN // HEADS         # 32
MLP = 4 * HIDDEN                   # 512
LAYERS = 3                         # >= 2 so hidden_states[-2] is meaningful
FEAT = HIDDEN                      # feat_dim (1024 in the real model)
N_OFF = 4
N_ACT = 8
LOGIT_PAD = 128                    # lane-dense packed logits width
CPP = IN_CH * PATCH * PATCH        # 192
EPS = 1e-5

assert LAYERS >= 2, "hidden_states[-2] needs at least 2 encoder layers"


# ------------------------------ kernel helpers ------------------------------
def _ln(x, g, b, eps=EPS):
    mu = jnp.mean(x, axis=-1, keepdims=True)
    var = jnp.mean((x - mu) ** 2, axis=-1, keepdims=True)
    return (x - mu) * jax.lax.rsqrt(var + eps) * g + b


def _nbytes(a):
    return math.prod(a.shape) * jnp.dtype(a.dtype).itemsize


# ------------------------------ fused Pallas kernel ------------------------------
def fused_clip_kernel(patches_ref, patch_w_ref, embed_add_ref, pre_ln_ref,
                      w_qkv_ref, b_qkv_ref, w_o_ref, ln_vecs_ref,
                      w_fc1_ref, b_fc1_ref, w_fc2_ref,
                      post_ln_ref, head_vecs_ref, head_mats_ref,
                      w2_pad_ref, b2_pad_ref,
                      penult_ref, logits_ref, x_sc,
                      *, batch, heads, head_dim, layers):
    f32 = jnp.float32
    bf16 = jnp.bfloat16
    hidden = heads * head_dim
    lid = pl.program_id(0)

    # ---- step 0 only: patch-embed matmul + (CLS/pos) add + pre_layrnorm into the
    #      persistent activation scratch.  CLS rows of `patches` are zero host-side,
    #      so adding embed_add (= pos embed, class embed folded into row 0) is exact. ----
    @pl.when(lid == 0)
    def _():
        patch_w = patch_w_ref[...]                                    # [CPP, D] bf16
        emb = embed_add_ref[...]                                      # [SEQ, D] f32
        pre_g, pre_b = pre_ln_ref[0:1, :], pre_ln_ref[1:2, :]
        for b in range(batch):
            xb = jnp.dot(patches_ref[b], patch_w, preferred_element_type=f32)
            x_sc[b] = _ln(xb + emb, pre_g, pre_b)

    # ---- one pre-norm encoder layer; this layer's weights were streamed in by the
    #      BlockSpec index_map (l, 0, ...) and are double-buffered by the pipeline ----
    vec = ln_vecs_ref[0]                                              # [6, D] f32
    ln1_g, ln1_b = vec[0:1, :], vec[1:2, :]
    bo = vec[2:3, :]
    ln2_g, ln2_b = vec[3:4, :], vec[4:5, :]
    b_fc2 = vec[5:6, :]
    b_qkv = b_qkv_ref[0]                                              # [1, 3D] f32
    b_fc1 = b_fc1_ref[0]                                              # [1, MLP] f32

    for b in range(batch):                                            # per-frame attention
        xb = x_sc[b]                                                  # [SEQ, D] f32 residual

        # -- self attention: fused QKV matmul (q-scale folded into w_qkv/b_qkv) --
        h = _ln(xb, ln1_g, ln1_b)
        qkv = jnp.dot(h.astype(bf16), w_qkv_ref[0],
                      preferred_element_type=f32) + b_qkv             # [SEQ, 3D]
        q = qkv[:, 0 * hidden:1 * hidden]
        k = qkv[:, 1 * hidden:2 * hidden]
        v = qkv[:, 2 * hidden:3 * hidden]
        head_outs = []
        for hh in range(heads):
            sl = slice(hh * head_dim, (hh + 1) * head_dim)
            s = jnp.einsum('qd,kd->qk', q[:, sl].astype(bf16), k[:, sl].astype(bf16),
                           preferred_element_type=f32)                # [SEQ, SEQ]
            s = s - jnp.max(s, axis=-1, keepdims=True)
            p = jnp.exp(s)
            p = p * pl.reciprocal(jnp.sum(p, axis=-1, keepdims=True), approx=True)
            head_outs.append(jnp.dot(p.astype(bf16), v[:, sl].astype(bf16),
                                     preferred_element_type=f32))     # [SEQ, HD]
        attn = jnp.concatenate(head_outs, axis=-1)                    # [SEQ, D] = concat heads
        attn = jnp.dot(attn.astype(bf16), w_o_ref[0],
                       preferred_element_type=f32) + bo               # single out-proj dot
        xb = xb + attn

        # -- MLP with quick_gelu --
        h2 = _ln(xb, ln2_g, ln2_b)
        h2 = jnp.dot(h2.astype(bf16), w_fc1_ref[0], preferred_element_type=f32) + b_fc1
        h2 = h2 * jax.nn.sigmoid(1.702 * h2)                          # quick_gelu
        h2 = jnp.dot(h2.astype(bf16), w_fc2_ref[0], preferred_element_type=f32) + b_fc2
        x_sc[b] = xb + h2

    # ---- hidden_states[-2]: activations after encoder layer index layers-2 ----
    @pl.when(lid == layers - 2)
    def _():
        penult_ref[...] = x_sc[...]

    # ---- last step: pooler (post-LN on CLS tokens, mean over frames) + the 3 heads ----
    @pl.when(lid == layers - 1)
    def _():
        post_g, post_b = post_ln_ref[0:1, :], post_ln_ref[1:2, :]
        xs = x_sc[...]                                                # [B, SEQ, D]
        cls = xs[:, 0:1, :]                                           # [B, 1, D]
        pooled = jnp.mean(_ln(cls, post_g, post_b), axis=0)           # LN-then-mean -> [1, D]

        hv = head_vecs_ref[...]                                       # [10, D] f32
        # self.inter
        h = _ln(pooled, hv[0:1, :], hv[1:2, :])
        h = jnp.dot(h.astype(bf16), head_mats_ref[0], preferred_element_type=f32) + hv[2:3, :]
        h = jnp.dot(h.astype(bf16), head_mats_ref[1], preferred_element_type=f32) + hv[3:4, :]
        # self.fc_offence (first linear)
        off = _ln(h, hv[4:5, :], hv[5:6, :])
        off = jnp.dot(off.astype(bf16), head_mats_ref[2], preferred_element_type=f32) + hv[6:7, :]
        # self.fc_action (first linear)
        act = _ln(h, hv[7:8, :], hv[8:9, :])
        act = jnp.dot(act.astype(bf16), head_mats_ref[3], preferred_element_type=f32) + hv[9:10, :]
        # lane-dense packed logits: cols [0:N_OFF) offence, [N_OFF:N_OFF+N_ACT) action
        logits_ref[...] = (jnp.dot(off.astype(bf16), w2_pad_ref[0], preferred_element_type=f32)
                           + jnp.dot(act.astype(bf16), w2_pad_ref[1], preferred_element_type=f32)
                           + b2_pad_ref[...])


# ------------------------------ pallas_call wrapper ------------------------------
def _const_spec(a):
    nd = a.ndim
    return pl.BlockSpec(a.shape, lambda l, _nd=nd: (0,) * _nd)


def _layer_spec(a):
    nd = a.ndim
    blk = (1,) + tuple(a.shape[1:])
    return pl.BlockSpec(blk, lambda l, _nd=nd: (l,) + (0,) * (_nd - 1))


def pallas_clip_fused(patches, packed, batch):
    inputs = [
        (patches,             _const_spec(patches)),          # fetched once (index constant)
        (packed['patch_w'],   _const_spec(packed['patch_w'])),
        (packed['embed_add'], _const_spec(packed['embed_add'])),
        (packed['pre_ln'],    _const_spec(packed['pre_ln'])),
        (packed['w_qkv'],     _layer_spec(packed['w_qkv'])),   # streamed per layer
        (packed['b_qkv'],     _layer_spec(packed['b_qkv'])),
        (packed['w_o'],       _layer_spec(packed['w_o'])),
        (packed['ln_vecs'],   _layer_spec(packed['ln_vecs'])),
        (packed['w_fc1'],     _layer_spec(packed['w_fc1'])),
        (packed['b_fc1'],     _layer_spec(packed['b_fc1'])),
        (packed['w_fc2'],     _layer_spec(packed['w_fc2'])),
        (packed['post_ln'],   _const_spec(packed['post_ln'])),
        (packed['head_vecs'], _const_spec(packed['head_vecs'])),
        (packed['head_mats'], _const_spec(packed['head_mats'])),
        (packed['w2_pad'],    _const_spec(packed['w2_pad'])),
        (packed['b2_pad'],    _const_spec(packed['b2_pad'])),
    ]
    args = [a for a, _ in inputs]
    in_specs = [s for _, s in inputs]

    out_shape = (jax.ShapeDtypeStruct((batch, SEQ, HIDDEN), jnp.float32),
                 jax.ShapeDtypeStruct((1, LOGIT_PAD), jnp.float32))
    out_specs = (pl.BlockSpec((batch, SEQ, HIDDEN), lambda l: (0, 0, 0)),
                 pl.BlockSpec((1, LOGIT_PAD), lambda l: (0, 0)))
    scratch_bytes = 4 * batch * SEQ * HIDDEN
    out_bytes = 4 * (batch * SEQ * HIDDEN + LOGIT_PAD)

    # Explicit VMEM budget: resident constants + 2x-buffered per-layer tiles + outputs + scratch.
    resident = sum(_nbytes(a) for a in args[:4]) + sum(_nbytes(a) for a in args[11:])
    per_layer = sum(_nbytes(a) // LAYERS for a in args[4:11])
    vmem_bytes = int(2 * (resident + 2 * per_layer + out_bytes + scratch_bytes)) + (1 << 20)
    vmem_bytes = min(max(vmem_bytes, 16 * 1024 * 1024), 100 * 1024 * 1024)

    flops = (2 * batch * SEQ * CPP * HIDDEN
             + LAYERS * batch * (2 * SEQ * HIDDEN * 3 * HIDDEN          # fused QKV
                                 + 4 * HEADS * SEQ * SEQ * HEAD_DIM     # scores + PV
                                 + 2 * SEQ * HIDDEN * HIDDEN            # out proj
                                 + 4 * SEQ * HIDDEN * MLP)              # MLP
             + 8 * HIDDEN * HIDDEN + 4 * HIDDEN * LOGIT_PAD)
    transcendentals = LAYERS * batch * (HEADS * SEQ * SEQ + SEQ * MLP) + 4 * HIDDEN
    bytes_accessed = sum(_nbytes(a) for a in args) + out_bytes
    cost = pl.CostEstimate(flops=flops, transcendentals=transcendentals,
                           bytes_accessed=bytes_accessed)

    kernel = functools.partial(fused_clip_kernel, batch=batch, heads=HEADS,
                               head_dim=HEAD_DIM, layers=LAYERS)
    return pl.pallas_call(
        kernel,
        grid=(LAYERS,),                       # layers = sequential grid axis
        in_specs=in_specs,
        out_specs=out_specs,
        out_shape=out_shape,
        scratch_shapes=[pltpu.VMEM((batch, SEQ, HIDDEN), jnp.float32)],  # persistent slab
        compiler_params=pltpu.CompilerParams(
            dimension_semantics=("arbitrary",),     # activation scratch carried across layers
            vmem_limit_bytes=vmem_bytes),
        cost_estimate=cost,
    )(*args)


# ------------------------------ forward pass ------------------------------
def clip_network_forward(packed, video):
    B, C, H, W = video.shape
    gh, gw = H // PATCH, W // PATCH

    # host-side glue: unfold the stride=kernel patch conv into a matmul operand and
    # insert a zero row per frame where the CLS token sits (the conv has no bias).
    patches = video.reshape(B, C, gh, PATCH, gw, PATCH)
    patches = patches.transpose(0, 2, 4, 1, 3, 5).reshape(B, gh * gw, CPP)
    patches = jnp.concatenate([jnp.zeros((B, 1, CPP), patches.dtype), patches], axis=1)
    patches = patches.astype(jnp.bfloat16)                            # [B, SEQ, CPP]

    penult, logits = pallas_clip_fused(patches, packed, B)

    # select_hidden_state_layer = -2, drop CLS token
    video_features = penult[:, 1:, :]
    # TODO(synk): .detach().cpu() / gc.collect() / empty_cache() are host memory
    # management with no Pallas equivalent.
    out_off = logits[0, :N_OFF]
    out_act = logits[0, N_OFF:N_OFF + N_ACT]
    return out_off, out_act, video_features


# ------------------------------ parameter init ------------------------------
def init_params(key):
    keys = iter(jax.random.split(key, 256))

    def normal(shape, scale=0.02):
        return scale * jax.random.normal(next(keys), shape, dtype=jnp.float32)

    p = {}
    p['patch_w'] = normal((CPP, HIDDEN))                  # conv bias=False in CLIP
    p['class_embed'] = normal((1, HIDDEN))
    p['pos_embed'] = normal((SEQ, HIDDEN))
    p['pre_ln_g'] = jnp.ones((1, HIDDEN), jnp.float32)
    p['pre_ln_b'] = normal((1, HIDDEN))

    layers = []
    for _ in range(LAYERS):
        layers.append(dict(
            ln1_g=jnp.ones((1, HIDDEN), jnp.float32), ln1_b=normal((1, HIDDEN)),
            wq=normal((HIDDEN, HIDDEN)), bq=normal((1, HIDDEN)),
            wk=normal((HIDDEN, HIDDEN)), bk=normal((1, HIDDEN)),
            wv=normal((HIDDEN, HIDDEN)), bv=normal((1, HIDDEN)),
            wo=normal((HIDDEN, HIDDEN)), bo=normal((1, HIDDEN)),
            ln2_g=jnp.ones((1, HIDDEN), jnp.float32), ln2_b=normal((1, HIDDEN)),
            w_fc1=normal((HIDDEN, MLP)), b_fc1=normal((1, MLP)),
            w_fc2=normal((MLP, HIDDEN)), b_fc2=normal((1, HIDDEN)),
        ))
    p['layers'] = layers

    p['post_ln_g'] = jnp.ones((1, HIDDEN), jnp.float32)
    p['post_ln_b'] = normal((1, HIDDEN))

    p['inter'] = dict(g=jnp.ones((1, HIDDEN), jnp.float32), b=normal((1, HIDDEN)),
                      w1=normal((HIDDEN, FEAT)), b1=normal((1, FEAT)),
                      w2=normal((FEAT, FEAT)), b2=normal((1, FEAT)))
    p['off'] = dict(g=jnp.ones((1, FEAT), jnp.float32), b=normal((1, FEAT)),
                    w1=normal((FEAT, FEAT)), b1=normal((1, FEAT)),
                    w2=normal((FEAT, N_OFF)), b2=normal((1, N_OFF)))
    p['act'] = dict(g=jnp.ones((1, FEAT), jnp.float32), b=normal((1, FEAT)),
                    w1=normal((FEAT, FEAT)), b1=normal((1, FEAT)),
                    w2=normal((FEAT, N_ACT)), b2=normal((1, N_ACT)))
    return p


# -------------------- pack params into stacked kernel operands --------------------
def pack_params(p):
    bf16 = jnp.bfloat16
    scale = 1.0 / math.sqrt(HEAD_DIM)        # CLIP scales q after bias -> fold into Wq/bq
    layers = p['layers']

    def cat(*vs):
        return jnp.concatenate(vs, axis=0)

    ow2p = jnp.zeros((FEAT, LOGIT_PAD), jnp.float32).at[:, :N_OFF].set(p['off']['w2'])
    aw2p = jnp.zeros((FEAT, LOGIT_PAD), jnp.float32).at[
        :, N_OFF:N_OFF + N_ACT].set(p['act']['w2'])
    b2p = (jnp.zeros((1, LOGIT_PAD), jnp.float32)
           .at[:, :N_OFF].set(p['off']['b2'])
           .at[:, N_OFF:N_OFF + N_ACT].set(p['act']['b2']))

    return dict(
        patch_w=p['patch_w'].astype(bf16),
        # position embedding per token + class embedding folded into the CLS row
        embed_add=p['pos_embed'].at[0].add(p['class_embed'][0]),            # [SEQ, D]
        pre_ln=cat(p['pre_ln_g'], p['pre_ln_b']),
        # fused QKV weights (bf16), streamed one layer per grid step
        w_qkv=jnp.stack([jnp.concatenate([lp['wq'] * scale, lp['wk'], lp['wv']], axis=1)
                         for lp in layers]).astype(bf16),                   # [L, D, 3D]
        b_qkv=jnp.stack([jnp.concatenate([lp['bq'] * scale, lp['bk'], lp['bv']], axis=1)
                         for lp in layers]),                                # [L, 1, 3D]
        w_o=jnp.stack([lp['wo'] for lp in layers]).astype(bf16),            # [L, D, D]
        ln_vecs=jnp.stack([cat(lp['ln1_g'], lp['ln1_b'], lp['bo'],
                               lp['ln2_g'], lp['ln2_b'], lp['b_fc2'])
                           for lp in layers]),                              # [L, 6, D]
        w_fc1=jnp.stack([lp['w_fc1'] for lp in layers]).astype(bf16),       # [L, D, MLP]
        b_fc1=jnp.stack([lp['b_fc1'] for lp in layers]),                    # [L, 1, MLP]
        w_fc2=jnp.stack([lp['w_fc2'] for lp in layers]).astype(bf16),       # [L, MLP, D]
        post_ln=cat(p['post_ln_g'], p['post_ln_b']),
        head_vecs=cat(p['inter']['g'], p['inter']['b'], p['inter']['b1'],
                      p['inter']['b2'], p['off']['g'], p['off']['b'],
                      p['off']['b1'], p['act']['g'], p['act']['b'],
                      p['act']['b1']),                                      # [10, D]
        head_mats=jnp.stack([p['inter']['w1'], p['inter']['w2'],
                             p['off']['w1'], p['act']['w1']]).astype(bf16), # [4, D, D]
        w2_pad=jnp.stack([ow2p, aw2p]).astype(bf16),                        # [2, D, 128]
        b2_pad=b2p,                                                         # [1, 128]
    )


if __name__ == "__main__":
    root = jax.random.PRNGKey(0)
    pkey, vkey = jax.random.split(root)
    params = init_params(pkey)
    packed = pack_params(params)
    video = jax.random.normal(vkey, (BATCH, IN_CH, IMG, IMG), dtype=jnp.float32)

    fwd = jax.jit(clip_network_forward)
    out_off, out_act, video_features = jax.block_until_ready(fwd(packed, video))

    assert out_off.shape == (N_OFF,)
    assert out_act.shape == (N_ACT,)
    assert video_features.shape == (BATCH, SEQ - 1, HIDDEN)
    assert bool(jnp.all(jnp.isfinite(out_off))) and bool(jnp.all(jnp.isfinite(out_act)))
    assert bool(jnp.all(jnp.isfinite(video_features)))
    print("KERNEL_OK")
</pallas_src>

<mosaic_0001>
module attributes {stable_mosaic.version = 11 : i64} {
  func.func @fused_clip_kernel(%arg0: i32, %arg1: memref<2x5x192xbf16, #tpu.memory_space<vmem>>, %arg2: memref<192x128xbf16, #tpu.memory_space<vmem>>, %arg3: memref<5x128xf32, #tpu.memory_space<vmem>>, %arg4: memref<2x128xf32, #tpu.memory_space<vmem>>, %arg5: memref<1x128x384xbf16, #tpu.memory_space<vmem>>, %arg6: memref<1x1x384xf32, #tpu.memory_space<vmem>>, %arg7: memref<1x128x128xbf16, #tpu.memory_space<vmem>>, %arg8: memref<1x6x128xf32, #tpu.memory_space<vmem>>, %arg9: memref<1x128x512xbf16, #tpu.memory_space<vmem>>, %arg10: memref<1x1x512xf32, #tpu.memory_space<vmem>>, %arg11: memref<1x512x128xbf16, #tpu.memory_space<vmem>>, %arg12: memref<2x128xf32, #tpu.memory_space<vmem>>, %arg13: memref<10x128xf32, #tpu.memory_space<vmem>>, %arg14: memref<4x128x128xbf16, #tpu.memory_space<vmem>>, %arg15: memref<2x128x128xbf16, #tpu.memory_space<vmem>>, %arg16: memref<1x128xf32, #tpu.memory_space<vmem>>, %arg17: memref<2x5x128xf32, #tpu.memory_space<vmem>>, %arg18: memref<1x128xf32, #tpu.memory_space<vmem>>, %arg19: memref<2x5x128xf32, #tpu.memory_space<vmem>>) attributes {dimension_semantics = [#tpu.dimension_semantics<arbitrary>], iteration_bounds = array<i64: 3>, scalar_prefetch = 0 : i64, scratch_operands = 1 : i64, tpu.core_type = #tpu.core_type<tc>, window_params = [{pipeline_mode = #tpu.pipeline_mode<synchronous>, transform_indices = @transform_0, window_bounds = array<i64: 2, 5, 192>}, {pipeline_mode = #tpu.pipeline_mode<synchronous>, transform_indices = @transform_1, window_bounds = array<i64: 192, 128>}, {pipeline_mode = #tpu.pipeline_mode<synchronous>, transform_indices = @transform_2, window_bounds = array<i64: 5, 128>}, {pipeline_mode = #tpu.pipeline_mode<synchronous>, transform_indices = @transform_3, window_bounds = array<i64: 2, 128>}, {transform_indices = @transform_4, window_bounds = array<i64: 1, 128, 384>}, {transform_indices = @transform_5, window_bounds = array<i64: 1, 1, 384>}, {transform_indices = @transform_6, window_bounds = array<i64: 1, 128, 128>}, {transform_indices = @transform_7, window_bounds = array<i64: 1, 6, 128>}, {transform_indices = @transform_8, window_bounds = array<i64: 1, 128, 512>}, {transform_indices = @transform_9, window_bounds = array<i64: 1, 1, 512>}, {transform_indices = @transform_10, window_bounds = array<i64: 1, 512, 128>}, {pipeline_mode = #tpu.pipeline_mode<synchronous>, transform_indices = @transform_11, window_bounds = array<i64: 2, 128>}, {pipeline_mode = #tpu.pipeline_mode<synchronous>, transform_indices = @transform_12, window_bounds = array<i64: 10, 128>}, {pipeline_mode = #tpu.pipeline_mode<synchronous>, transform_indices = @transform_13, window_bounds = array<i64: 4, 128, 128>}, {pipeline_mode = #tpu.pipeline_mode<synchronous>, transform_indices = @transform_14, window_bounds = array<i64: 2, 128, 128>}, {pipeline_mode = #tpu.pipeline_mode<synchronous>, transform_indices = @transform_15, window_bounds = array<i64: 1, 128>}, {pipeline_mode = #tpu.pipeline_mode<synchronous>, transform_indices = @transform_16, window_bounds = array<i64: 2, 5, 128>}, {pipeline_mode = #tpu.pipeline_mode<synchronous>, transform_indices = @transform_17, window_bounds = array<i64: 1, 128>}]} {
    %c0_i32 = arith.constant 0 : i32
    %0 = arith.cmpi eq, %arg0, %c0_i32 : i32
    %1 = arith.extui %0 : i1 to i32
    %c0_i32_0 = arith.constant 0 : i32
    %2 = arith.cmpi ne, %1, %c0_i32_0 : i32
    scf.if %2 {
      %c0_109 = arith.constant 0 : index
      %c0_110 = arith.constant 0 : index
      %347 = vector.load %arg2[%c0_109, %c0_110] : memref<192x128xbf16, #tpu.memory_space<vmem>>, vector<192x128xbf16>
      %c0_111 = arith.constant 0 : index
      %c0_112 = arith.constant 0 : index
      %348 = vector.load %arg3[%c0_111, %c0_112] : memref<5x128xf32, #tpu.memory_space<vmem>>, vector<5x128xf32>
      %c0_113 = arith.constant 0 : index
      %c0_114 = arith.constant 0 : index
      %349 = vector.load %arg4[%c0_113, %c0_114] : memref<2x128xf32, #tpu.memory_space<vmem>>, vector<1x128xf32>
      %c1_115 = arith.constant 1 : index
      %c0_116 = arith.constant 0 : index
      %350 = vector.load %arg4[%c1_115, %c0_116] : memref<2x128xf32, #tpu.memory_space<vmem>>, vector<1x128xf32>
      %c0_117 = arith.constant 0 : index
      %c0_118 = arith.constant 0 : index
      %c0_119 = arith.constant 0 : index
      %351 = vector.load %arg1[%c0_117, %c0_118, %c0_119] : memref<2x5x192xbf16, #tpu.memory_space<vmem>>, vector<1x5x192xbf16>
      %352 = vector.shape_cast %351 : vector<1x5x192xbf16> to vector<5x192xbf16>
      %cst_120 = arith.constant dense<0.000000e+00> : vector<5x128xf32>
      %353 = tpu.matmul %352, %347, %cst_120 {dimension_numbers = #tpu.dot_dimension_numbers<[1], [0], [0], [1], [0, 0, 1, 1], [], []>} : vector<5x192xbf16>, vector<192x128xbf16>, vector<5x128xf32> -> vector<5x128xf32>
      %354 = arith.addf %353, %348 : vector<5x128xf32>
      %cst_121 = arith.constant dense<0.000000e+00> : vector<5xf32>
      %355 = vector.multi_reduction <add>, %354, %cst_121 [1] : vector<5x128xf32> to vector<5xf32>
      %356 = vector.shape_cast %355 : vector<5xf32> to vector<5x1xf32>
      %cst_122 = arith.constant 1.280000e+02 : f32
      %357 = vector.broadcast %cst_122 : f32 to vector<5x1xf32>
      %358 = arith.divf %356, %357 : vector<5x1xf32>
      %359 = vector.broadcast %358 : vector<5x1xf32> to vector<5x128xf32>
      %360 = arith.subf %354, %359 : vector<5x128xf32>
      %361 = arith.mulf %360, %360 : vector<5x128xf32>
      %cst_123 = arith.constant dense<0.000000e+00> : vector<5xf32>
      %362 = vector.multi_reduction <add>, %361, %cst_123 [1] : vector<5x128xf32> to vector<5xf32>
      %363 = vector.shape_cast %362 : vector<5xf32> to vector<5x1xf32>
      %cst_124 = arith.constant 1.280000e+02 : f32
      %364 = vector.broadcast %cst_124 : f32 to vector<5x1xf32>
      %365 = arith.divf %363, %364 : vector<5x1xf32>
      %366 = vector.broadcast %358 : vector<5x1xf32> to vector<5x128xf32>
      %367 = arith.subf %354, %366 : vector<5x128xf32>
      %cst_125 = arith.constant 9.99999974E-6 : f32
      %368 = vector.broadcast %cst_125 : f32 to vector<5x1xf32>
      %369 = arith.addf %365, %368 : vector<5x1xf32>
      %370 = math.rsqrt %369 : vector<5x1xf32>
      %371 = vector.broadcast %370 : vector<5x1xf32> to vector<5x128xf32>
      %372 = arith.mulf %367, %371 : vector<5x128xf32>
      %373 = vector.broadcast %349 : vector<1x128xf32> to vector<5x128xf32>
      %374 = arith.mulf %372, %373 : vector<5x128xf32>
      %375 = vector.broadcast %350 : vector<1x128xf32> to vector<5x128xf32>
      %376 = arith.addf %374, %375 : vector<5x128xf32>
      %c0_126 = arith.constant 0 : index
      %c0_127 = arith.constant 0 : index
      %c0_128 = arith.constant 0 : index
      %377 = vector.load %arg19[%c0_126, %c0_127, %c0_128] : memref<2x5x128xf32, #tpu.memory_space<vmem>>, vector<1x5x128xf32>
      %378 = vector.shape_cast %377 : vector<1x5x128xf32> to vector<5x128xf32>
      %379 = vector.shape_cast %376 : vector<5x128xf32> to vector<1x5x128xf32>
      tpu.vector_store %arg19[%c0_126, %c0_127, %c0_128], %379 {strides = array<i32>} : memref<2x5x128xf32, #tpu.memory_space<vmem>>, vector<1x5x128xf32>,
      %c1_129 = arith.constant 1 : index
      %c0_130 = arith.constant 0 : index
      %c0_131 = arith.constant 0 : index
      %380 = vector.load %arg1[%c1_129, %c0_130, %c0_131] : memref<2x5x192xbf16, #tpu.memory_space<vmem>>, vector<1x5x192xbf16>
      %381 = vector.shape_cast %380 : vector<1x5x192xbf16> to vector<5x192xbf16>
      %cst_132 = arith.constant dense<0.000000e+00> : vector<5x128xf32>
      %382 = tpu.matmul %381, %347, %cst_132 {dimension_numbers = #tpu.dot_dimension_numbers<[1], [0], [0], [1], [0, 0, 1, 1], [], []>} : vector<5x192xbf16>, vector<192x128xbf16>, vector<5x128xf32> -> vector<5x128xf32>
      %383 = arith.addf %382, %348 : vector<5x128xf32>
      %cst_133 = arith.constant dense<0.000000e+00> : vector<5xf32>
      %384 = vector.multi_reduction <add>, %383, %cst_133 [1] : vector<5x128xf32> to vector<5xf32>
      %385 = vector.shape_cast %384 : vector<5xf32> to vector<5x1xf32>
      %cst_134 = arith.constant 1.280000e+02 : f32
      %386 = vector.broadcast %cst_134 : f32 to vector<5x1xf32>
      %387 = arith.divf %385, %386 : vector<5x1xf32>
      %388 = vector.broadcast %387 : vector<5x1xf32> to vector<5x128xf32>
      %389 = arith.subf %383, %388 : vector<5x128xf32>
      %390 = arith.mulf %389, %389 : vector<5x128xf32>
      %cst_135 = arith.constant dense<0.000000e+00> : vector<5xf32>
      %391 = vector.multi_reduction <add>, %390, %cst_135 [1] : vector<5x128xf32> to vector<5xf32>
      %392 = vector.shape_cast %391 : vector<5xf32> to vector<5x1xf32>
      %cst_136 = arith.constant 1.280000e+02 : f32
      %393 = vector.broadcast %cst_136 : f32 to vector<5x1xf32>
      %394 = arith.divf %392, %393 : vector<5x1xf32>
      %395 = vector.broadcast %387 : vector<5x1xf32> to vector<5x128xf32>
      %396 = arith.subf %383, %395 : vector<5x128xf32>
      %cst_137 = arith.constant 9.99999974E-6 : f32
      %397 = vector.broadcast %cst_137 : f32 to vector<5x1xf32>
      %398 = arith.addf %394, %397 : vector<5x1xf32>
      %399 = math.rsqrt %398 : vector<5x1xf32>
      %400 = vector.broadcast %399 : vector<5x1xf32> to vector<5x128xf32>
      %401 = arith.mulf %396, %400 : vector<5x128xf32>
      %402 = vector.broadcast %349 : vector<1x128xf32> to vector<5x128xf32>
      %403 = arith.mulf %401, %402 : vector<5x128xf32>
      %404 = vector.broadcast %350 : vector<1x128xf32> to vector<5x128xf32>
      %405 = arith.addf %403, %404 : vector<5x128xf32>
      %c1_138 = arith.constant 1 : index
      %c0_139 = arith.constant 0 : index
      %c0_140 = arith.constant 0 : index
      %406 = vector.load %arg19[%c1_138, %c0_139, %c0_140] : memref<2x5x128xf32, #tpu.memory_space<vmem>>, vector<1x5x128xf32>
      %407 = vector.shape_cast %406 : vector<1x5x128xf32> to vector<5x128xf32>
      %408 = vector.shape_cast %405 : vector<5x128xf32> to vector<1x5x128xf32>
      tpu.vector_store %arg19[%c1_138, %c0_139, %c0_140], %408 {strides = array<i32>} : memref<2x5x128xf32, #tpu.memory_space<vmem>>, vector<1x5x128xf32>,
    } else {
    }
    %c0 = arith.constant 0 : index
    %c0_1 = arith.constant 0 : index
    %c0_2 = arith.constant 0 : index
    %3 = vector.load %arg8[%c0, %c0_1, %c0_2] : memref<1x6x128xf32, #tpu.memory_space<vmem>>, vector<1x6x128xf32>
    %4 = vector.shape_cast %3 : vector<1x6x128xf32> to vector<6x128xf32>
    %5 = vector.extract_strided_slice %4 {offsets = [0, 0], sizes = [1, 128], strides = [1, 1]} : vector<6x128xf32> to vector<1x128xf32>
    %6 = vector.extract_strided_slice %4 {offsets = [1, 0], sizes = [1, 128], strides = [1, 1]} : vector<6x128xf32> to vector<1x128xf32>
    %7 = vector.extract_strided_slice %4 {offsets = [2, 0], sizes = [1, 128], strides = [1, 1]} : vector<6x128xf32> to vector<1x128xf32>
    %8 = vector.extract_strided_slice %4 {offsets = [3, 0], sizes = [1, 128], strides = [1, 1]} : vector<6x128xf32> to vector<1x128xf32>
    %9 = vector.extract_strided_slice %4 {offsets = [4, 0], sizes = [1, 128], strides = [1, 1]} : vector<6x128xf32> to vector<1x128xf32>
    %10 = vector.extract_strided_slice %4 {offsets = [5, 0], sizes = [1, 128], strides = [1, 1]} : vector<6x128xf32> to vector<1x128xf32>
    %c0_3 = arith.constant 0 : index
    %c0_4 = arith.constant 0 : index
    %c0_5 = arith.constant 0 : index
    %11 = vector.load %arg6[%c0_3, %c0_4, %c0_5] : memref<1x1x384xf32, #tpu.memory_space<vmem>>, vector<1x1x384xf32>
    %12 = vector.shape_cast %11 : vector<1x1x384xf32> to vector<1x384xf32>
    %c0_6 = arith.constant 0 : index
    %c0_7 = arith.constant 0 : index
    %c0_8 = arith.constant 0 : index
    %13 = vector.load %arg10[%c0_6, %c0_7, %c0_8] : memref<1x1x512xf32, #tpu.memory_space<vmem>>, vector<1x1x512xf32>
    %14 = vector.shape_cast %13 : vector<1x1x512xf32> to vector<1x512xf32>
    %c0_9 = arith.constant 0 : index
    %c0_10 = arith.constant 0 : index
    %c0_11 = arith.constant 0 : index
    %15 = vector.load %arg19[%c0_9, %c0_10, %c0_11] : memref<2x5x128xf32, #tpu.memory_space<vmem>>, vector<1x5x128xf32>
    %16 = vector.shape_cast %15 : vector<1x5x128xf32> to vector<5x128xf32>
    %cst = arith.constant dense<0.000000e+00> : vector<5xf32>
    %17 = vector.multi_reduction <add>, %16, %cst [1] : vector<5x128xf32> to vector<5xf32>
    %18 = vector.shape_cast %17 : vector<5xf32> to vector<5x1xf32>
    %cst_12 = arith.constant 1.280000e+02 : f32
    %19 = vector.broadcast %cst_12 : f32 to vector<5x1xf32>
    %20 = arith.divf %18, %19 : vector<5x1xf32>
    %21 = vector.broadcast %20 : vector<5x1xf32> to vector<5x128xf32>
    %22 = arith.subf %16, %21 : vector<5x128xf32>
    %23 = arith.mulf %22, %22 : vector<5x128xf32>
    %cst_13 = arith.constant dense<0.000000e+00> : vector<5xf32>
    %24 = vector.multi_reduction <add>, %23, %cst_13 [1] : vector<5x128xf32> to vector<5xf32>
    %25 = vector.shape_cast %24 : vector<5xf32> to vector<5x1xf32>
    %cst_14 = arith.constant 1.280000e+02 : f32
    %26 = vector.broadcast %cst_14 : f32 to vector<5x1xf32>
    %27 = arith.divf %25, %26 : vector<5x1xf32>
    %28 = vector.broadcast %20 : vector<5x1xf32> to vector<5x128xf32>
    %29 = arith.subf %16, %28 : vector<5x128xf32>
    %cst_15 = arith.constant 9.99999974E-6 : f32
    %30 = vector.broadcast %cst_15 : f32 to vector<5x1xf32>
    %31 = arith.addf %27, %30 : vector<5x1xf32>
    %32 = math.rsqrt %31 : vector<5x1xf32>
    %33 = vector.broadcast %32 : vector<5x1xf32> to vector<5x128xf32>
    %34 = arith.mulf %29, %33 : vector<5x128xf32>
    %35 = vector.broadcast %5 : vector<1x128xf32> to vector<5x128xf32>
    %36 = arith.mulf %34, %35 : vector<5x128xf32>
    %37 = vector.broadcast %6 : vector<1x128xf32> to vector<5x128xf32>
    %38 = arith.addf %36, %37 : vector<5x128xf32>
    %39 = arith.truncf %38 : vector<5x128xf32> to vector<5x128xbf16>
    %c0_16 = arith.constant 0 : index
    %c0_17 = arith.constant 0 : index
    %c0_18 = arith.constant 0 : index
    %40 = vector.load %arg5[%c0_16, %c0_17, %c0_18] : memref<1x128x384xbf16, #tpu.memory_space<vmem>>, vector<1x128x384xbf16>
    %41 = vector.shape_cast %40 : vector<1x128x384xbf16> to vector<128x384xbf16>
    %cst_19 = arith.constant dense<0.000000e+00> : vector<5x384xf32>
    %42 = tpu.matmul %39, %41, %cst_19 {dimension_numbers = #tpu.dot_dimension_numbers<[1], [0], [0], [1], [0, 0, 1, 1], [], []>} : vector<5x128xbf16>, vector<128x384xbf16>, vector<5x384xf32> -> vector<5x384xf32>
    %43 = vector.broadcast %12 : vector<1x384xf32> to vector<5x384xf32>
    %44 = arith.addf %42, %43 : vector<5x384xf32>
    %45 = vector.extract_strided_slice %44 {offsets = [0, 0], sizes = [5, 128], strides = [1, 1]} : vector<5x384xf32> to vector<5x128xf32>
    %46 = vector.extract_strided_slice %44 {offsets = [0, 128], sizes = [5, 128], strides = [1, 1]} : vector<5x384xf32> to vector<5x128xf32>
    %47 = vector.extract_strided_slice %44 {offsets = [0, 256], sizes = [5, 128], strides = [1, 1]} : vector<5x384xf32> to vector<5x128xf32>
    %48 = vector.extract_strided_slice %45 {offsets = [0, 0], sizes = [5, 32], strides = [1, 1]} : vector<5x128xf32> to vector<5x32xf32>
    %49 = arith.truncf %48 : vector<5x32xf32> to vector<5x32xbf16>
    %50 = vector.extract_strided_slice %46 {offsets = [0, 0], sizes = [5, 32], strides = [1, 1]} : vector<5x128xf32> to vector<5x32xf32>
    %51 = arith.truncf %50 : vector<5x32xf32> to vector<5x32xbf16>
    "tpu.trace_start"() <{level = 10 : i32, message = "qd,kd->qk"}> : () -> ()
    %cst_20 = arith.constant dense<0.000000e+00> : vector<5x5xf32>
    %52 = tpu.matmul %49, %51, %cst_20 {dimension_numbers = #tpu.dot_dimension_numbers<[1], [1], [0], [0], [0, 0, 1, 0], [], []>} : vector<5x32xbf16>, vector<5x32xbf16>, vector<5x5xf32> -> vector<5x5xf32>
    "tpu.trace_stop"() : () -> ()
    %cst_21 = arith.constant dense<0xFF800000> : vector<5xf32>
    %53 = vector.multi_reduction <maximumf>, %52, %cst_21 [1] : vector<5x5xf32> to vector<5xf32>
    %54 = vector.shape_cast %53 : vector<5xf32> to vector<5x1xf32>
    %55 = vector.broadcast %54 : vector<5x1xf32> to vector<5x5xf32>
    %56 = arith.subf %52, %55 : vector<5x5xf32>
    %57 = math.exp %56 : vector<5x5xf32>
    %cst_22 = arith.constant dense<0.000000e+00> : vector<5xf32>
    %58 = vector.multi_reduction <add>, %57, %cst_22 [1] : vector<5x5xf32> to vector<5xf32>
    %59 = vector.shape_cast %58 : vector<5xf32> to vector<5x1xf32>
    %60 = tpu.reciprocal %59 {approx = true} : vector<5x1xf32> -> vector<5x1xf32>
    %61 = vector.broadcast %60 : vector<5x1xf32> to vector<5x5xf32>
    %62 = arith.mulf %57, %61 : vector<5x5xf32>
    %63 = arith.truncf %62 : vector<5x5xf32> to vector<5x5xbf16>
    %64 = vector.extract_strided_slice %47 {offsets = [0, 0], sizes = [5, 32], strides = [1, 1]} : vector<5x128xf32> to vector<5x32xf32>
    %65 = arith.truncf %64 : vector<5x32xf32> to vector<5x32xbf16>
    %cst_23 = arith.constant dense<0.000000e+00> : vector<5x32xf32>
    %66 = tpu.matmul %63, %65, %cst_23 {dimension_numbers = #tpu.dot_dimension_numbers<[1], [0], [0], [1], [0, 0, 1, 1], [], []>} : vector<5x5xbf16>, vector<5x32xbf16>, vector<5x32xf32> -> vector<5x32xf32>
    %67 = vector.extract_strided_slice %45 {offsets = [0, 32], sizes = [5, 32], strides = [1, 1]} : vector<5x128xf32> to vector<5x32xf32>
    %68 = arith.truncf %67 : vector<5x32xf32> to vector<5x32xbf16>
    %69 = vector.extract_strided_slice %46 {offsets = [0, 32], sizes = [5, 32], strides = [1, 1]} : vector<5x128xf32> to vector<5x32xf32>
    %70 = arith.truncf %69 : vector<5x32xf32> to vector<5x32xbf16>
    "tpu.trace_start"() <{level = 10 : i32, message = "qd,kd->qk"}> : () -> ()
    %cst_24 = arith.constant dense<0.000000e+00> : vector<5x5xf32>
    %71 = tpu.matmul %68, %70, %cst_24 {dimension_numbers = #tpu.dot_dimension_numbers<[1], [1], [0], [0], [0, 0, 1, 0], [], []>} : vector<5x32xbf16>, vector<5x32xbf16>, vector<5x5xf32> -> vector<5x5xf32>
    "tpu.trace_stop"() : () -> ()
    %cst_25 = arith.constant dense<0xFF800000> : vector<5xf32>
    %72 = vector.multi_reduction <maximumf>, %71, %cst_25 [1] : vector<5x5xf32> to vector<5xf32>
    %73 = vector.shape_cast %72 : vector<5xf32> to vector<5x1xf32>
    %74 = vector.broadcast %73 : vector<5x1xf32> to vector<5x5xf32>
    %75 = arith.subf %71, %74 : vector<5x5xf32>
    %76 = math.exp %75 : vector<5x5xf32>
    %cst_26 = arith.constant dense<0.000000e+00> : vector<5xf32>
    %77 = vector.multi_reduction <add>, %76, %cst_26 [1] : vector<5x5xf32> to vector<5xf32>
    %78 = vector.shape_cast %77 : vector<5xf32> to vector<5x1xf32>
    %79 = tpu.reciprocal %78 {approx = true} : vector<5x1xf32> -> vector<5x1xf32>
    %80 = vector.broadcast %79 : vector<5x1xf32> to vector<5x5xf32>
    %81 = arith.mulf %76, %80 : vector<5x5xf32>
    %82 = arith.truncf %81 : vector<5x5xf32> to vector<5x5xbf16>
    %83 = vector.extract_strided_slice %47 {offsets = [0, 32], sizes = [5, 32], strides = [1, 1]} : vector<5x128xf32> to vector<5x32xf32>
    %84 = arith.truncf %83 : vector<5x32xf32> to vector<5x32xbf16>
    %cst_27 = arith.constant dense<0.000000e+00> : vector<5x32xf32>
    %85 = tpu.matmul %82, %84, %cst_27 {dimension_numbers = #tpu.dot_dimension_numbers<[1], [0], [0], [1], [0, 0, 1, 1], [], []>} : vector<5x5xbf16>, vector<5x32xbf16>, vector<5x32xf32> -> vector<5x32xf32>
    %86 = vector.extract_strided_slice %45 {offsets = [0, 64], sizes = [5, 32], strides = [1, 1]} : vector<5x128xf32> to vector<5x32xf32>
    %87 = arith.truncf %86 : vector<5x32xf32> to vector<5x32xbf16>
    %88 = vector.extract_strided_slice %46 {offsets = [0, 64], sizes = [5, 32], strides = [1, 1]} : vector<5x128xf32> to vector<5x32xf32>
    %89 = arith.truncf %88 : vector<5x32xf32> to vector<5x32xbf16>
    "tpu.trace_start"() <{level = 10 : i32, message = "qd,kd->qk"}> : () -> ()
    %cst_28 = arith.constant dense<0.000000e+00> : vector<5x5xf32>
    %90 = tpu.matmul %87, %89, %cst_28 {dimension_numbers = #tpu.dot_dimension_numbers<[1], [1], [0], [0], [0, 0, 1, 0], [], []>} : vector<5x32xbf16>, vector<5x32xbf16>, vector<5x5xf32> -> vector<5x5xf32>
    "tpu.trace_stop"() : () -> ()
    %cst_29 = arith.constant dense<0xFF800000> : vector<5xf32>
    %91 = vector.multi_reduction <maximumf>, %90, %cst_29 [1] : vector<5x5xf32> to vector<5xf32>
    %92 = vector.shape_cast %91 : vector<5xf32> to vector<5x1xf32>
    %93 = vector.broadcast %92 : vector<5x1xf32> to vector<5x5xf32>
    %94 = arith.subf %90, %93 : vector<5x5xf32>
    %95 = math.exp %94 : vector<5x5xf32>
    %cst_30 = arith.constant dense<0.000000e+00> : vector<5xf32>
    %96 = vector.multi_reduction <add>, %95, %cst_30 [1] : vector<5x5xf32> to vector<5xf32>
    %97 = vector.shape_cast %96 : vector<5xf32> to vector<5x1xf32>
    %98 = tpu.reciprocal %97 {approx = true} : vector<5x1xf32> -> vector<5x1xf32>
    %99 = vector.broadcast %98 : vector<5x1xf32> to vector<5x5xf32>
    %100 = arith.mulf %95, %99 : vector<5x5xf32>
    %101 = arith.truncf %100 : vector<5x5xf32> to vector<5x5xbf16>
    %102 = vector.extract_strided_slice %47 {offsets = [0, 64], sizes = [5, 32], strides = [1, 1]} : vector<5x128xf32> to vector<5x32xf32>
    %103 = arith.truncf %102 : vector<5x32xf32> to vector<5x32xbf16>
    %cst_31 = arith.constant dense<0.000000e+00> : vector<5x32xf32>
    %104 = tpu.matmul %101, %103, %cst_31 {dimension_numbers = #tpu.dot_dimension_numbers<[1], [0], [0], [1], [0, 0, 1, 1], [], []>} : vector<5x5xbf16>, vector<5x32xbf16>, vector<5x32xf32> -> vector<5x32xf32>
    %105 = vector.extract_strided_slice %45 {offsets = [0, 96], sizes = [5, 32], strides = [1, 1]} : vector<5x128xf32> to vector<5x32xf32>
    %106 = arith.truncf %105 : vector<5x32xf32> to vector<5x32xbf16>
    %107 = vector.extract_strided_slice %46 {offsets = [0, 96], sizes = [5, 32], strides = [1, 1]} : vector<5x128xf32> to vector<5x32xf32>
    %108 = arith.truncf %107 : vector<5x32xf32> to vector<5x32xbf16>
    "tpu.trace_start"() <{level = 10 : i32, message = "qd,kd->qk"}> : () -> ()
    %cst_32 = arith.constant dense<0.000000e+00> : vector<5x5xf32>
    %109 = tpu.matmul %106, %108, %cst_32 {dimension_numbers = #tpu.dot_dimension_numbers<[1], [1], [0], [0], [0, 0, 1, 0], [], []>} : vector<5x32xbf16>, vector<5x32xbf16>, vector<5x5xf32> -> vector<5x5xf32>
    "tpu.trace_stop"() : () -> ()
    %cst_33 = arith.constant dense<0xFF800000> : vector<5xf32>
    %110 = vector.multi_reduction <maximumf>, %109, %cst_33 [1] : vector<5x5xf32> to vector<5xf32>
    %111 = vector.shape_cast %110 : vector<5xf32> to vector<5x1xf32>
    %112 = vector.broadcast %111 : vector<5x1xf32> to vector<5x5xf32>
    %113 = arith.subf %109, %112 : vector<5x5xf32>
    %114 = math.exp %113 : vector<5x5xf32>
    %cst_34 = arith.constant dense<0.000000e+00> : vector<5xf32>
    %115 = vector.multi_reduction <add>, %114, %cst_34 [1] : vector<5x5xf32> to vector<5xf32>
    %116 = vector.shape_cast %115 : vector<5xf32> to vector<5x1xf32>
    %117 = tpu.reciprocal %116 {approx = true} : vector<5x1xf32> -> vector<5x1xf32>
    %118 = vector.broadcast %117 : vector<5x1xf32> to vector<5x5xf32>
    %119 = arith.mulf %114, %118 : vector<5x5xf32>
    %120 = arith.truncf %119 : vector<5x5xf32> to vector<5x5xbf16>
    %121 = vector.extract_strided_slice %47 {offsets = [0, 96], sizes = [5, 32], strides = [1, 1]} : vector<5x128xf32> to vector<5x32xf32>
    %122 = arith.truncf %121 : vector<5x32xf32> to vector<5x32xbf16>
    %cst_35 = arith.constant dense<0.000000e+00> : vector<5x32xf32>
    %123 = tpu.matmul %120, %122, %cst_35 {dimension_numbers = #tpu.dot_dimension_numbers<[1], [0], [0], [1], [0, 0, 1, 1], [], []>} : vector<5x5xbf16>, vector<5x32xbf16>, vector<5x32xf32> -> vector<5x32xf32>
    %124 = tpu.concatenate %66, %85, %104, %123 in 1 : vector<5x32xf32>, vector<5x32xf32>, vector<5x32xf32>, vector<5x32xf32> -> vector<5x128xf32>
    %125 = arith.truncf %124 : vector<5x128xf32> to vector<5x128xbf16>
    %c0_36 = arith.constant 0 : index
    %c0_37 = arith.constant 0 : index
    %c0_38 = arith.constant 0 : index
    %126 = vector.load %arg7[%c0_36, %c0_37, %c0_38] : memref<1x128x128xbf16, #tpu.memory_space<vmem>>, vector<1x128x128xbf16>
    %127 = vector.shape_cast %126 : vector<1x128x128xbf16> to vector<128x128xbf16>
    %cst_39 = arith.constant dense<0.000000e+00> : vector<5x128xf32>
    %128 = tpu.matmul %125, %127, %cst_39 {dimension_numbers = #tpu.dot_dimension_numbers<[1], [0], [0], [1], [0, 0, 1, 1], [], []>} : vector<5x128xbf16>, vector<128x128xbf16>, vector<5x128xf32> -> vector<5x128xf32>
    %129 = vector.broadcast %7 : vector<1x128xf32> to vector<5x128xf32>
    %130 = arith.addf %128, %129 : vector<5x128xf32>
    %131 = arith.addf %16, %130 : vector<5x128xf32>
    %cst_40 = arith.constant dense<0.000000e+00> : vector<5xf32>
    %132 = vector.multi_reduction <add>, %131, %cst_40 [1] : vector<5x128xf32> to vector<5xf32>
    %133 = vector.shape_cast %132 : vector<5xf32> to vector<5x1xf32>
    %cst_41 = arith.constant 1.280000e+02 : f32
    %134 = vector.broadcast %cst_41 : f32 to vector<5x1xf32>
    %135 = arith.divf %133, %134 : vector<5x1xf32>
    %136 = vector.broadcast %135 : vector<5x1xf32> to vector<5x128xf32>
    %137 = arith.subf %131, %136 : vector<5x128xf32>
    %138 = arith.mulf %137, %137 : vector<5x128xf32>
    %cst_42 = arith.constant dense<0.000000e+00> : vector<5xf32>
    %139 = vector.multi_reduction <add>, %138, %cst_42 [1] : vector<5x128xf32> to vector<5xf32>
    %140 = vector.shape_cast %139 : vector<5xf32> to vector<5x1xf32>
    %cst_43 = arith.constant 1.280000e+02 : f32
    %141 = vector.broadcast %cst_43 : f32 to vector<5x1xf32>
    %142 = arith.divf %140, %141 : vector<5x1xf32>
    %143 = vector.broadcast %135 : vector<5x1xf32> to vector<5x128xf32>
    %144 = arith.subf %131, %143 : vector<5x128xf32>
    %cst_44 = arith.constant 9.99999974E-6 : f32
    %145 = vector.broadcast %cst_44 : f32 to vector<5x1xf32>
    %146 = arith.addf %142, %145 : vector<5x1xf32>
    %147 = math.rsqrt %146 : vector<5x1xf32>
    %148 = vector.broadcast %147 : vector<5x1xf32> to vector<5x128xf32>
    %149 = arith.mulf %144, %148 : vector<5x128xf32>
    %150 = vector.broadcast %8 : vector<1x128xf32> to vector<5x128xf32>
    %151 = arith.mulf %149, %150 : vector<5x128xf32>
    %152 = vector.broadcast %9 : vector<1x128xf32> to vector<5x128xf32>
    %153 = arith.addf %151, %152 : vector<5x128xf32>
    %154 = arith.truncf %153 : vector<5x128xf32> to vector<5x128xbf16>
    %c0_45 = arith.constant 0 : index
    %c0_46 = arith.constant 0 : index
    %c0_47 = arith.constant 0 : index
    %155 = vector.load %arg9[%c0_45, %c0_46, %c0_47] : memref<1x128x512xbf16, #tpu.memory_space<vmem>>, vector<1x128x512xbf16>
    %156 = vector.shape_cast %155 : vector<1x128x512xbf16> to vector<128x512xbf16>
    %cst_48 = arith.constant dense<0.000000e+00> : vector<5x512xf32>
    %157 = tpu.matmul %154, %156, %cst_48 {dimension_numbers = #tpu.dot_dimension_numbers<[1], [0], [0], [1], [0, 0, 1, 1], [], []>} : vector<5x128xbf16>, vector<128x512xbf16>, vector<5x512xf32> -> vector<5x512xf32>
    %158 = vector.broadcast %14 : vector<1x512xf32> to vector<5x512xf32>
    %159 = arith.addf %157, %158 : vector<5x512xf32>
    %cst_49 = arith.constant 1.702000e+00 : f32
    %160 = vector.broadcast %cst_49 : f32 to vector<5x512xf32>
    %161 = arith.mulf %160, %159 : vector<5x512xf32>
    %162 = arith.negf %161 : vector<5x512xf32>
    %163 = math.exp %162 : vector<5x512xf32>
    %cst_50 = arith.constant 1.000000e+00 : f32
    %164 = vector.broadcast %cst_50 : f32 to vector<5x512xf32>
    %165 = arith.addf %164, %163 : vector<5x512xf32>
    %166 = arith.divf %164, %165 : vector<5x512xf32>
    %167 = arith.mulf %159, %166 : vector<5x512xf32>
    %168 = arith.truncf %167 : vector<5x512xf32> to vector<5x512xbf16>
    %c0_51 = arith.constant 0 : index
    %c0_52 = arith.constant 0 : index
    %c0_53 = arith.constant 0 : index
    %169 = vector.load %arg11[%c0_51, %c0_52, %c0_53] : memref<1x512x128xbf16, #tpu.memory_space<vmem>>, vector<1x512x128xbf16>
    %170 = vector.shape_cast %169 : vector<1x512x128xbf16> to vector<512x128xbf16>
    %cst_54 = arith.constant dense<0.000000e+00> : vector<5x128xf32>
    %171 = tpu.matmul %168, %170, %cst_54 {dimension_numbers = #tpu.dot_dimension_numbers<[1], [0], [0], [1], [0, 0, 1, 1], [], []>} : vector<5x512xbf16>, vector<512x128xbf16>, vector<5x128xf32> -> vector<5x128xf32>
    %172 = vector.broadcast %10 : vector<1x128xf32> to vector<5x128xf32>
    %173 = arith.addf %171, %172 : vector<5x128xf32>
    %174 = arith.addf %131, %173 : vector<5x128xf32>
    %c0_55 = arith.constant 0 : index
    %c0_56 = arith.constant 0 : index
    %c0_57 = arith.constant 0 : index
    %175 = vector.load %arg19[%c0_55, %c0_56, %c0_57] : memref<2x5x128xf32, #tpu.memory_space<vmem>>, vector<1x5x128xf32>
    %176 = vector.shape_cast %175 : vector<1x5x128xf32> to vector<5x128xf32>
    %177 = vector.shape_cast %174 : vector<5x128xf32> to vector<1x5x128xf32>
    tpu.vector_store %arg19[%c0_55, %c0_56, %c0_57], %177 {strides = array<i32>} : memref<2x5x128xf32, #tpu.memory_space<vmem>>, vector<1x5x128xf32>,
    %c1 = arith.constant 1 : index
    %c0_58 = arith.constant 0 : index
    %c0_59 = arith.constant 0 : index
    %178 = vector.load %arg19[%c1, %c0_58, %c0_59] : memref<2x5x128xf32, #tpu.memory_space<vmem>>, vector<1x5x128xf32>
    %179 = vector.shape_cast %178 : vector<1x5x128xf32> to vector<5x128xf32>
    %cst_60 = arith.constant dense<0.000000e+00> : vector<5xf32>
    %180 = vector.multi_reduction <add>, %179, %cst_60 [1] : vector<5x128xf32> to vector<5xf32>
    %181 = vector.shape_cast %180 : vector<5xf32> to vector<5x1xf32>
    %cst_61 = arith.constant 1.280000e+02 : f32
    %182 = vector.broadcast %cst_61 : f32 to vector<5x1xf32>
    %183 = arith.divf %181, %182 : vector<5x1xf32>
    %184 = vector.broadcast %183 : vector<5x1xf32> to vector<5x128xf32>
    %185 = arith.subf %179, %184 : vector<5x128xf32>
    %186 = arith.mulf %185, %185 : vector<5x128xf32>
    %cst_62 = arith.constant dense<0.000000e+00> : vector<5xf32>
    %187 = vector.multi_reduction <add>, %186, %cst_62 [1] : vector<5x128xf32> to vector<5xf32>
    %188 = vector.shape_cast %187 : vector<5xf32> to vector<5x1xf32>
    %cst_63 = arith.constant 1.280000e+02 : f32
    %189 = vector.broadcast %cst_63 : f32 to vector<5x1xf32>
    %190 = arith.divf %188, %189 : vector<5x1xf32>
    %191 = vector.broadcast %183 : vector<5x1xf32> to vector<5x128xf32>
    %192 = arith.subf %179, %191 : vector<5x128xf32>
    %cst_64 = arith.constant 9.99999974E-6 : f32
    %193 = vector.broadcast %cst_64 : f32 to vector<5x1xf32>
    %194 = arith.addf %190, %193 : vector<5x1xf32>
    %195 = math.rsqrt %194 : vector<5x1xf32>
    %196 = vector.broadcast %195 : vector<5x1xf32> to vector<5x128xf32>
    %197 = arith.mulf %192, %196 : vector<5x128xf32>
    %198 = vector.broadcast %5 : vector<1x128xf32> to vector<5x128xf32>
    %199 = arith.mulf %197, %198 : vector<5x128xf32>
    %200 = vector.broadcast %6 : vector<1x128xf32> to vector<5x128xf32>
    %201 = arith.addf %199, %200 : vector<5x128xf32>
    %202 = arith.truncf %201 : vector<5x128xf32> to vector<5x128xbf16>
    %c0_65 = arith.constant 0 : index
    %c0_66 = arith.constant 0 : index
    %c0_67 = arith.constant 0 : index
    %203 = vector.load %arg5[%c0_65, %c0_66, %c0_67] : memref<1x128x384xbf16, #tpu.memory_space<vmem>>, vector<1x128x384xbf16>
    %204 = vector.shape_cast %203 : vector<1x128x384xbf16> to vector<128x384xbf16>
    %cst_68 = arith.constant dense<0.000000e+00> : vector<5x384xf32>
    %205 = tpu.matmul %202, %204, %cst_68 {dimension_numbers = #tpu.dot_dimension_numbers<[1], [0], [0], [1], [0, 0, 1, 1], [], []>} : vector<5x128xbf16>, vector<128x384xbf16>, vector<5x384xf32> -> vector<5x384xf32>
    %206 = vector.broadcast %12 : vector<1x384xf32> to vector<5x384xf32>
    %207 = arith.addf %205, %206 : vector<5x384xf32>
    %208 = vector.extract_strided_slice %207 {offsets = [0, 0], sizes = [5, 128], strides = [1, 1]} : vector<5x384xf32> to vector<5x128xf32>
    %209 = vector.extract_strided_slice %207 {offsets = [0, 128], sizes = [5, 128], strides = [1, 1]} : vector<5x384xf32> to vector<5x128xf32>
    %210 = vector.extract_strided_slice %207 {offsets = [0, 256], sizes = [5, 128], strides = [1, 1]} : vector<5x384xf32> to vector<5x128xf32>
    %211 = vector.extract_strided_slice %208 {offsets = [0, 0], sizes = [5, 32], strides = [1, 1]} : vector<5x128xf32> to vector<5x32xf32>
    %212 = arith.truncf %211 : vector<5x32xf32> to vector<5x32xbf16>
    %213 = vector.extract_strided_slice %209 {offsets = [0, 0], sizes = [5, 32], strides = [1, 1]} : vector<5x128xf32> to vector<5x32xf32>
    %214 = arith.truncf %213 : vector<5x32xf32> to vector<5x32xbf16>
    "tpu.trace_start"() <{level = 10 : i32, message = "qd,kd->qk"}> : () -> ()
    %cst_69 = arith.constant dense<0.000000e+00> : vector<5x5xf32>
    %215 = tpu.matmul %212, %214, %cst_69 {dimension_numbers = #tpu.dot_dimension_numbers<[1], [1], [0], [0], [0, 0, 1, 0], [], []>} : vector<5x32xbf16>, vector<5x32xbf16>, vector<5x5xf32> -> vector<5x5xf32>
    "tpu.trace_stop"() : () -> ()
    %cst_70 = arith.constant dense<0xFF800000> : vector<5xf32>
    %216 = vector.multi_reduction <maximumf>, %215, %cst_70 [1] : vector<5x5xf32> to vector<5xf32>
    %217 = vector.shape_cast %216 : vector<5xf32> to vector<5x1xf32>
    %218 = vector.broadcast %217 : vector<5x1xf32> to vector<5x5xf32>
    %219 = arith.subf %215, %218 : vector<5x5xf32>
    %220 = math.exp %219 : vector<5x5xf32>
    %cst_71 = arith.constant dense<0.000000e+00> : vector<5xf32>
    %221 = vector.multi_reduction <add>, %220, %cst_71 [1] : vector<5x5xf32> to vector<5xf32>
    %222 = vector.shape_cast %221 : vector<5xf32> to vector<5x1xf32>
    %223 = tpu.reciprocal %222 {approx = true} : vector<5x1xf32> -> vector<5x1xf32>
    %224 = vector.broadcast %223 : vector<5x1xf32> to vector<5x5xf32>
    %225 = arith.mulf %220, %224 : vector<5x5xf32>
    %226 = arith.truncf %225 : vector<5x5xf32> to vector<5x5xbf16>
    %227 = vector.extract_strided_slice %210 {offsets = [0, 0], sizes = [5, 32], strides = [1, 1]} : vector<5x128xf32> to vector<5x32xf32>
    %228 = arith.truncf %227 : vector<5x32xf32> to vector<5x32xbf16>
    %cst_72 = arith.constant dense<0.000000e+00> : vector<5x32xf32>
    %229 = tpu.matmul %226, %228, %cst_72 {dimension_numbers = #tpu.dot_dimension_numbers<[1], [0], [0], [1], [0, 0, 1, 1], [], []>} : vector<5x5xbf16>, vector<5x32xbf16>, vector<5x32xf32> -> vector<5x32xf32>
    %230 = vector.extract_strided_slice %208 {offsets = [0, 32], sizes = [5, 32], strides = [1, 1]} : vector<5x128xf32> to vector<5x32xf32>
    %231 = arith.truncf %230 : vector<5x32xf32> to vector<5x32xbf16>
    %232 = vector.extract_strided_slice %209 {offsets = [0, 32], sizes = [5, 32], strides = [1, 1]} : vector<5x128xf32> to vector<5x32xf32>
    %233 = arith.truncf %232 : vector<5x32xf32> to vector<5x32xbf16>
    "tpu.trace_start"() <{level = 10 : i32, message = "qd,kd->qk"}> : () -> ()
    %cst_73 = arith.constant dense<0.000000e+00> : vector<5x5xf32>
    %234 = tpu.matmul %231, %233, %cst_73 {dimension_numbers = #tpu.dot_dimension_numbers<[1], [1], [0], [0], [0, 0, 1, 0], [], []>} : vector<5x32xbf16>, vector<5x32xbf16>, vector<5x5xf32> -> vector<5x5xf32>
    "tpu.trace_stop"() : () -> ()
    %cst_74 = arith.constant dense<0xFF800000> : vector<5xf32>
    %235 = vector.multi_reduction <maximumf>, %234, %cst_74 [1] : vector<5x5xf32> to vector<5xf32>
    %236 = vector.shape_cast %235 : vector<5xf32> to vector<5x1xf32>
    %237 = vector.broadcast %236 : vector<5x1xf32> to vector<5x5xf32>
    %238 = arith.subf %234, %237 : vector<5x5xf32>
    %239 = math.exp %238 : vector<5x5xf32>
    %cst_75 = arith.constant dense<0.000000e+00> : vector<5xf32>
    %240 = vector.multi_reduction <add>, %239, %cst_75 [1] : vector<5x5xf32> to vector<5xf32>
    %241 = vector.shape_cast %240 : vector<5xf32> to vector<5x1xf32>
    %242 = tpu.reciprocal %241 {approx = true} : vector<5x1xf32> -> vector<5x1xf32>
    %243 = vector.broadcast %242 : vector<5x1xf32> to vector<5x5xf32>
    %244 = arith.mulf %239, %243 : vector<5x5xf32>
    %245 = arith.truncf %244 : vector<5x5xf32> to vector<5x5xbf16>
    %246 = vector.extract_strided_slice %210 {offsets = [0, 32], sizes = [5, 32], strides = [1, 1]} : vector<5x128xf32> to vector<5x32xf32>
    %247 = arith.truncf %246 : vector<5x32xf32> to vector<5x32xbf16>
    %cst_76 = arith.constant dense<0.000000e+00> : vector<5x32xf32>
    %248 = tpu.matmul %245, %247, %cst_76 {dimension_numbers = #tpu.dot_dimension_numbers<[1], [0], [0], [1], [0, 0, 1, 1], [], []>} : vector<5x5xbf16>, vector<5x32xbf16>, vector<5x32xf32> -> vector<5x32xf32>
    %249 = vector.extract_strided_slice %208 {offsets = [0, 64], sizes = [5, 32], strides = [1, 1]} : vector<5x128xf32> to vector<5x32xf32>
    %250 = arith.truncf %249 : vector<5x32xf32> to vector<5x32xbf16>
    %251 = vector.extract_strided_slice %209 {offsets = [0, 64], sizes = [5, 32], strides = [1, 1]} : vector<5x128xf32> to vector<5x32xf32>
    %252 = arith.truncf %251 : vector<5x32xf32> to vector<5x32xbf16>
    "tpu.trace_start"() <{level = 10 : i32, message = "qd,kd->qk"}> : () -> ()
    %cst_77 = arith.constant dense<0.000000e+00> : vector<5x5xf32>
    %253 = tpu.matmul %250, %252, %cst_77 {dimension_numbers = #tpu.dot_dimension_numbers<[1], [1], [0], [0], [0, 0, 1, 0], [], []>} : vector<5x32xbf16>, vector<5x32xbf16>, vector<5x5xf32> -> vector<5x5xf32>
    "tpu.trace_stop"() : () -> ()
    %cst_78 = arith.constant dense<0xFF800000> : vector<5xf32>
    %254 = vector.multi_reduction <maximumf>, %253, %cst_78 [1] : vector<5x5xf32> to vector<5xf32>
    %255 = vector.shape_cast %254 : vector<5xf32> to vector<5x1xf32>
    %256 = vector.broadcast %255 : vector<5x1xf32> to vector<5x5xf32>
    %257 = arith.subf %253, %256 : vector<5x5xf32>
    %258 = math.exp %257 : vector<5x5xf32>
    %cst_79 = arith.constant dense<0.000000e+00> : vector<5xf32>
    %259 = vector.multi_reduction <add>, %258, %cst_79 [1] : vector<5x5xf32> to vector<5xf32>
    %260 = vector.shape_cast %259 : vector<5xf32> to vector<5x1xf32>
    %261 = tpu.reciprocal %260 {approx = true} : vector<5x1xf32> -> vector<5x1xf32>
    %262 = vector.broadcast %261 : vector<5x1xf32> to vector<5x5xf32>
    %263 = arith.mulf %258, %262 : vector<5x5xf32>
    %264 = arith.truncf %263 : vector<5x5xf32> to vector<5x5xbf16>
    %265 = vector.extract_strided_slice %210 {offsets = [0, 64], sizes = [5, 32], strides = [1, 1]} : vector<5x128xf32> to vector<5x32xf32>
    %266 = arith.truncf %265 : vector<5x32xf32> to vector<5x32xbf16>
    %cst_80 = arith.constant dense<0.000000e+00> : vector<5x32xf32>
    %267 = tpu.matmul %264, %266, %cst_80 {dimension_numbers = #tpu.dot_dimension_numbers<[1], [0], [0], [1], [0, 0, 1, 1], [], []>} : vector<5x5xbf16>, vector<5x32xbf16>, vector<5x32xf32> -> vector<5x32xf32>
    %268 = vector.extract_strided_slice %208 {offsets = [0, 96], sizes = [5, 32], strides = [1, 1]} : vector<5x128xf32> to vector<5x32xf32>
    %269 = arith.truncf %268 : vector<5x32xf32> to vector<5x32xbf16>
    %270 = vector.extract_strided_slice %209 {offsets = [0, 96], sizes = [5, 32], strides = [1, 1]} : vector<5x128xf32> to vector<5x32xf32>
    %271 = arith.truncf %270 : vector<5x32xf32> to vector<5x32xbf16>
    "tpu.trace_start"() <{level = 10 : i32, message = "qd,kd->qk"}> : () -> ()
    %cst_81 = arith.constant dense<0.000000e+00> : vector<5x5xf32>
    %272 = tpu.matmul %269, %271, %cst_81 {dimension_numbers = #tpu.dot_dimension_numbers<[1], [1], [0], [0], [0, 0, 1, 0], [], []>} : vector<5x32xbf16>, vector<5x32xbf16>, vector<5x5xf32> -> vector<5x5xf32>
    "tpu.trace_stop"() : () -> ()
    %cst_82 = arith.constant dense<0xFF800000> : vector<5xf32>
    %273 = vector.multi_reduction <maximumf>, %272, %cst_82 [1] : vector<5x5xf32> to vector<5xf32>
    %274 = vector.shape_cast %273 : vector<5xf32> to vector<5x1xf32>
    %275 = vector.broadcast %274 : vector<5x1xf32> to vector<5x5xf32>
    %276 = arith.subf %272, %275 : vector<5x5xf32>
    %277 = math.exp %276 : vector<5x5xf32>
    %cst_83 = arith.constant dense<0.000000e+00> : vector<5xf32>
    %278 = vector.multi_reduction <add>, %277, %cst_83 [1] : vector<5x5xf32> to vector<5xf32>
    %279 = vector.shape_cast %278 : vector<5xf32> to vector<5x1xf32>
    %280 = tpu.reciprocal %279 {approx = true} : vector<5x1xf32> -> vector<5x1xf32>
    %281 = vector.broadcast %280 : vector<5x1xf32> to vector<5x5xf32>
    %282 = arith.mulf %277, %281 : vector<5x5xf32>
    %283 = arith.truncf %282 : vector<5x5xf32> to vector<5x5xbf16>
    %284 = vector.extract_strided_slice %210 {offsets = [0, 96], sizes = [5, 32], strides = [1, 1]} : vector<5x128xf32> to vector<5x32xf32>
    %285 = arith.truncf %284 : vector<5x32xf32> to vector<5x32xbf16>
    %cst_84 = arith.constant dense<0.000000e+00> : vector<5x32xf32>
    %286 = tpu.matmul %283, %285, %cst_84 {dimension_numbers = #tpu.dot_dimension_numbers<[1], [0], [0], [1], [0, 0, 1, 1], [], []>} : vector<5x5xbf16>, vector<5x32xbf16>, vector<5x32xf32> -> vector<5x32xf32>
    %287 = tpu.concatenate %229, %248, %267, %286 in 1 : vector<5x32xf32>, vector<5x32xf32>, vector<5x32xf32>, vector<5x32xf32> -> vector<5x128xf32>
    %288 = arith.truncf %287 : vector<5x128xf32> to vector<5x128xbf16>
    %c0_85 = arith.constant 0 : index
    %c0_86 = arith.constant 0 : index
    %c0_87 = arith.constant 0 : index
    %289 = vector.load %arg7[%c0_85, %c0_86, %c0_87] : memref<1x128x128xbf16, #tpu.memory_space<vmem>>, vector<1x128x128xbf16>
    %290 = vector.shape_cast %289 : vector<1x128x128xbf16> to vector<128x128xbf16>
    %cst_88 = arith.constant dense<0.000000e+00> : vector<5x128xf32>
    %291 = tpu.matmul %288, %290, %cst_88 {dimension_numbers = #tpu.dot_dimension_numbers<[1], [0], [0], [1], [0, 0, 1, 1], [], []>} : vector<5x128xbf16>, vector<128x128xbf16>, vector<5x128xf32> -> vector<5x128xf32>
    %292 = vector.broadcast %7 : vector<1x128xf32> to vector<5x128xf32>
    %293 = arith.addf %291, %292 : vector<5x128xf32>
    %294 = arith.addf %179, %293 : vector<5x128xf32>
    %cst_89 = arith.constant dense<0.000000e+00> : vector<5xf32>
    %295 = vector.multi_reduction <add>, %294, %cst_89 [1] : vector<5x128xf32> to vector<5xf32>
    %296 = vector.shape_cast %295 : vector<5xf32> to vector<5x1xf32>
    %cst_90 = arith.constant 1.280000e+02 : f32
    %297 = vector.broadcast %cst_90 : f32 to vector<5x1xf32>
    %298 = arith.divf %296, %297 : vector<5x1xf32>
    %299 = vector.broadcast %298 : vector<5x1xf32> to vector<5x128xf32>
    %300 = arith.subf %294, %299 : vector<5x128xf32>
    %301 = arith.mulf %300, %300 : vector<5x128xf32>
    %cst_91 = arith.constant dense<0.000000e+00> : vector<5xf32>
    %302 = vector.multi_reduction <add>, %301, %cst_91 [1] : vector<5x128xf32> to vector<5xf32>
    %303 = vector.shape_cast %302 : vector<5xf32> to vector<5x1xf32>
    %cst_92 = arith.constant 1.280000e+02 : f32
    %304 = vector.broadcast %cst_92 : f32 to vector<5x1xf32>
    %305 = arith.divf %303, %304 : vector<5x1xf32>
    %306 = vector.broadcast %298 : vector<5x1xf32> to vector<5x128xf32>
    %307 = arith.subf %294, %306 : vector<5x128xf32>
    %cst_93 = arith.constant 9.99999974E-6 : f32
    %308 = vector.broadcast %cst_93 : f32 to vector<5x1xf32>
    %309 = arith.addf %305, %308 : vector<5x1xf32>
    %310 = math.rsqrt %309 : vector<5x1xf32>
    %311 = vector.broadcast %310 : vector<5x1xf32> to vector<5x128xf32>
    %312 = arith.mulf %307, %311 : vector<5x128xf32>
    %313 = vector.broadcast %8 : vector<1x128xf32> to vector<5x128xf32>
    %314 = arith.mulf %312, %313 : vector<5x128xf32>
    %315 = vector.broadcast %9 : vector<1x128xf32> to vector<5x128xf32>
    %316 = arith.addf %314, %315 : vector<5x128xf32>
    %317 = arith.truncf %316 : vector<5x128xf32> to vector<5x128xbf16>
    %c0_94 = arith.constant 0 : index
    %c0_95 = arith.constant 0 : index
    %c0_96 = arith.constant 0 : index
    %318 = vector.load %arg9[%c0_94, %c0_95, %c0_96] : memref<1x128x512xbf16, #tpu.memory_space<vmem>>, vector<1x128x512xbf16>
    %319 = vector.shape_cast %318 : vector<1x128x512xbf16> to vector<128x512xbf16>
    %cst_97 = arith.constant dense<0.000000e+00> : vector<5x512xf32>
    %320 = tpu.matmul %317, %319, %cst_97 {dimension_numbers = #tpu.dot_dimension_numbers<[1], [0], [0], [1], [0, 0, 1, 1], [], []>} : vector<5x128xbf16>, vector<128x512xbf16>, vector<5x512xf32> -> vector<5x512xf32>
    %321 = vector.broadcast %14 : vector<1x512xf32> to vector<5x512xf32>
    %322 = arith.addf %320, %321 : vector<5x512xf32>
    %cst_98 = arith.constant 1.702000e+00 : f32
    %323 = vector.broadcast %cst_98 : f32 to vector<5x512xf32>
    %324 = arith.mulf %323, %322 : vector<5x512xf32>
    %325 = arith.negf %324 : vector<5x512xf32>
    %326 = math.exp %325 : vector<5x512xf32>
    %cst_99 = arith.constant 1.000000e+00 : f32
    %327 = vector.broadcast %cst_99 : f32 to vector<5x512xf32>
    %328 = arith.addf %327, %326 : vector<5x512xf32>
    %329 = arith.divf %327, %328 : vector<5x512xf32>
    %330 = arith.mulf %322, %329 : vector<5x512xf32>
    %331 = arith.truncf %330 : vector<5x512xf32> to vector<5x512xbf16>
    %c0_100 = arith.constant 0 : index
    %c0_101 = arith.constant 0 : index
    %c0_102 = arith.constant 0 : index
    %332 = vector.load %arg11[%c0_100, %c0_101, %c0_102] : memref<1x512x128xbf16, #tpu.memory_space<vmem>>, vector<1x512x128xbf16>
    %333 = vector.shape_cast %332 : vector<1x512x128xbf16> to vector<512x128xbf16>
    %cst_103 = arith.constant dense<0.000000e+00> : vector<5x128xf32>
    %334 = tpu.matmul %331, %333, %cst_103 {dimension_numbers = #tpu.dot_dimension_numbers<[1], [0], [0], [1], [0, 0, 1, 1], [], []>} : vector<5x512xbf16>, vector<512x128xbf16>, vector<5x128xf32> -> vector<5x128xf32>
    %335 = vector.broadcast %10 : vector<1x128xf32> to vector<5x128xf32>
    %336 = arith.addf %334, %335 : vector<5x128xf32>
    %337 = arith.addf %294, %336 : vector<5x128xf32>
    %c1_104 = arith.constant 1 : index
    %c0_105 = arith.constant 0 : index
    %c0_106 = arith.constant 0 : index
    %338 = vector.load %arg19[%c1_104, %c0_105, %c0_106] : memref<2x5x128xf32, #tpu.memory_space<vmem>>, vector<1x5x128xf32>
    %339 = vector.shape_cast %338 : vector<1x5x128xf32> to vector<5x128xf32>
    %340 = vector.shape_cast %337 : vector<5x128xf32> to vector<1x5x128xf32>
    tpu.vector_store %arg19[%c1_104, %c0_105, %c0_106], %340 {strides = array<i32>} : memref<2x5x128xf32, #tpu.memory_space<vmem>>, vector<1x5x128xf32>,
    %c1_i32 = arith.constant 1 : i32
    %341 = arith.cmpi eq, %arg0, %c1_i32 : i32
    %342 = arith.extui %341 : i1 to i32
    %c0_i32_107 = arith.constant 0 : i32
    %343 = arith.cmpi ne, %342, %c0_i32_107 : i32
    scf.if %343 {
      %c0_109 = arith.constant 0 : index
      %c0_110 = arith.constant 0 : index
      %c0_111 = arith.constant 0 : index
      %347 = vector.load %arg19[%c0_109, %c0_110, %c0_111] : memref<2x5x128xf32, #tpu.memory_space<vmem>>, vector<2x5x128xf32>
      %c0_112 = arith.constant 0 : index
      %c0_113 = arith.constant 0 : index
      %c0_114 = arith.constant 0 : index
      %348 = vector.load %arg17[%c0_112, %c0_113, %c0_114] : memref<2x5x128xf32, #tpu.memory_space<vmem>>, vector<2x5x128xf32>
      tpu.vector_store %arg17[%c0_112, %c0_113, %c0_114], %347 {strides = array<i32>} : memref<2x5x128xf32, #tpu.memory_space<vmem>>, vector<2x5x128xf32>,
    } else {
    }
    %c2_i32 = arith.constant 2 : i32
    %344 = arith.cmpi eq, %arg0, %c2_i32 : i32
    %345 = arith.extui %344 : i1 to i32
    %c0_i32_108 = arith.constant 0 : i32
    %346 = arith.cmpi ne, %345, %c0_i32_108 : i32
    scf.if %346 {
      %c0_109 = arith.constant 0 : index
      %c0_110 = arith.constant 0 : index
      %347 = vector.load %arg12[%c0_109, %c0_110] : memref<2x128xf32, #tpu.memory_space<vmem>>, vector<1x128xf32>
      %c1_111 = arith.constant 1 : index
      %c0_112 = arith.constant 0 : index
      %348 = vector.load %arg12[%c1_111, %c0_112] : memref<2x128xf32, #tpu.memory_space<vmem>>, vector<1x128xf32>
      %c0_113 = arith.constant 0 : index
      %c0_114 = arith.constant 0 : index
      %c0_115 = arith.constant 0 : index
      %349 = vector.load %arg19[%c0_113, %c0_114, %c0_115] : memref<2x5x128xf32, #tpu.memory_space<vmem>>, vector<2x5x128xf32>
      %350 = vector.extract_strided_slice %349 {offsets = [0, 0, 0], sizes = [2, 1, 128], strides = [1, 1, 1]} : vector<2x5x128xf32> to vector<2x1x128xf32>
      %cst_116 = arith.constant dense<0.000000e+00> : vector<2x1xf32>
      %351 = vector.multi_reduction <add>, %350, %cst_116 [2] : vector<2x1x128xf32> to vector<2x1xf32>
      %352 = vector.shape_cast %351 : vector<2x1xf32> to vector<2x1x1xf32>
      %cst_117 = arith.constant 1.280000e+02 : f32
      %353 = vector.broadcast %cst_117 : f32 to vector<2x1x1xf32>
      %354 = arith.divf %352, %353 : vector<2x1x1xf32>
      %355 = vector.broadcast %354 : vector<2x1x1xf32> to vector<2x1x128xf32>
      %356 = arith.subf %350, %355 : vector<2x1x128xf32>
      %357 = arith.mulf %356, %356 : vector<2x1x128xf32>
      %cst_118 = arith.constant dense<0.000000e+00> : vector<2x1xf32>
      %358 = vector.multi_reduction <add>, %357, %cst_118 [2] : vector<2x1x128xf32> to vector<2x1xf32>
      %359 = vector.shape_cast %358 : vector<2x1xf32> to vector<2x1x1xf32>
      %cst_119 = arith.constant 1.280000e+02 : f32
      %360 = vector.broadcast %cst_119 : f32 to vector<2x1x1xf32>
      %361 = arith.divf %359, %360 : vector<2x1x1xf32>
      %362 = vector.broadcast %354 : vector<2x1x1xf32> to vector<2x1x128xf32>
      %363 = arith.subf %350, %362 : vector<2x1x128xf32>
      %cst_120 = arith.constant 9.99999974E-6 : f32
      %364 = vector.broadcast %cst_120 : f32 to vector<2x1x1xf32>
      %365 = arith.addf %361, %364 : vector<2x1x1xf32>
      %366 = math.rsqrt %365 : vector<2x1x1xf32>
      %367 = vector.broadcast %366 : vector<2x1x1xf32> to vector<2x1x128xf32>
      %368 = arith.mulf %363, %367 : vector<2x1x128xf32>
      %369 = vector.shape_cast %347 : vector<1x128xf32> to vector<1x1x128xf32>
      %370 = vector.broadcast %369 : vector<1x1x128xf32> to vector<2x1x128xf32>
      %371 = arith.mulf %368, %370 : vector<2x1x128xf32>
      %372 = vector.shape_cast %348 : vector<1x128xf32> to vector<1x1x128xf32>
      %373 = vector.broadcast %372 : vector<1x1x128xf32> to vector<2x1x128xf32>
      %374 = arith.addf %371, %373 : vector<2x1x128xf32>
      %cst_121 = arith.constant dense<0.000000e+00> : vector<1x128xf32>
      %375 = vector.multi_reduction <add>, %374, %cst_121 [0] : vector<2x1x128xf32> to vector<1x128xf32>
      %cst_122 = arith.constant 2.000000e+00 : f32
      %376 = vector.broadcast %cst_122 : f32 to vector<1x128xf32>
      %377 = arith.divf %375, %376 : vector<1x128xf32>
      %c0_123 = arith.constant 0 : index
      %c0_124 = arith.constant 0 : index
      %378 = vector.load %arg13[%c0_123, %c0_124] : memref<10x128xf32, #tpu.memory_space<vmem>>, vector<10x128xf32>
      %379 = vector.extract_strided_slice %378 {offsets = [0, 0], sizes = [1, 128], strides = [1, 1]} : vector<10x128xf32> to vector<1x128xf32>
      %380 = vector.extract_strided_slice %378 {offsets = [1, 0], sizes = [1, 128], strides = [1, 1]} : vector<10x128xf32> to vector<1x128xf32>
      %cst_125 = arith.constant dense<0.000000e+00> : vector<1xf32>
      %381 = vector.multi_reduction <add>, %377, %cst_125 [1] : vector<1x128xf32> to vector<1xf32>
      %382 = vector.shape_cast %381 : vector<1xf32> to vector<1x1xf32>
      %cst_126 = arith.constant 1.280000e+02 : f32
      %383 = vector.broadcast %cst_126 : f32 to vector<1x1xf32>
      %384 = arith.divf %382, %383 : vector<1x1xf32>
      %385 = vector.broadcast %384 : vector<1x1xf32> to vector<1x128xf32>
      %386 = arith.subf %377, %385 : vector<1x128xf32>
      %387 = arith.mulf %386, %386 : vector<1x128xf32>
      %cst_127 = arith.constant dense<0.000000e+00> : vector<1xf32>
      %388 = vector.multi_reduction <add>, %387, %cst_127 [1] : vector<1x128xf32> to vector<1xf32>
      %389 = vector.shape_cast %388 : vector<1xf32> to vector<1x1xf32>
      %cst_128 = arith.constant 1.280000e+02 : f32
      %390 = vector.broadcast %cst_128 : f32 to vector<1x1xf32>
      %391 = arith.divf %389, %390 : vector<1x1xf32>
      %392 = vector.broadcast %384 : vector<1x1xf32> to vector<1x128xf32>
      %393 = arith.subf %377, %392 : vector<1x128xf32>
      %cst_129 = arith.constant 9.99999974E-6 : f32
      %394 = vector.broadcast %cst_129 : f32 to vector<1x1xf32>
      %395 = arith.addf %391, %394 : vector<1x1xf32>
      %396 = math.rsqrt %395 : vector<1x1xf32>
      %397 = vector.broadcast %396 : vector<1x1xf32> to vector<1x128xf32>
      %398 = arith.mulf %393, %397 : vector<1x128xf32>
      %399 = arith.mulf %398, %379 : vector<1x128xf32>
      %400 = arith.addf %399, %380 : vector<1x128xf32>
      %401 = arith.truncf %400 : vector<1x128xf32> to vector<1x128xbf16>
      %c0_130 = arith.constant 0 : index
      %c0_131 = arith.constant 0 : index
      %c0_132 = arith.constant 0 : index
      %402 = vector.load %arg14[%c0_130, %c0_131, %c0_132] : memref<4x128x128xbf16, #tpu.memory_space<vmem>>, vector<1x128x128xbf16>
      %403 = vector.shape_cast %402 : vector<1x128x128xbf16> to vector<128x128xbf16>
      %cst_133 = arith.constant dense<0.000000e+00> : vector<1x128xf32>
      %404 = tpu.matmul %401, %403, %cst_133 {dimension_numbers = #tpu.dot_dimension_numbers<[1], [0], [0], [1], [0, 0, 1, 1], [], []>} : vector<1x128xbf16>, vector<128x128xbf16>, vector<1x128xf32> -> vector<1x128xf32>
      %405 = vector.extract_strided_slice %378 {offsets = [2, 0], sizes = [1, 128], strides = [1, 1]} : vector<10x128xf32> to vector<1x128xf32>
      %406 = arith.addf %404, %405 : vector<1x128xf32>
      %407 = arith.truncf %406 : vector<1x128xf32> to vector<1x128xbf16>
      %c1_134 = arith.constant 1 : index
      %c0_135 = arith.constant 0 : index
      %c0_136 = arith.constant 0 : index
      %408 = vector.load %arg14[%c1_134, %c0_135, %c0_136] : memref<4x128x128xbf16, #tpu.memory_space<vmem>>, vector<1x128x128xbf16>
      %409 = vector.shape_cast %408 : vector<1x128x128xbf16> to vector<128x128xbf16>
      %cst_137 = arith.constant dense<0.000000e+00> : vector<1x128xf32>
      %410 = tpu.matmul %407, %409, %cst_137 {dimension_numbers = #tpu.dot_dimension_numbers<[1], [0], [0], [1], [0, 0, 1, 1], [], []>} : vector<1x128xbf16>, vector<128x128xbf16>, vector<1x128xf32> -> vector<1x128xf32>
      %411 = vector.extract_strided_slice %378 {offsets = [3, 0], sizes = [1, 128], strides = [1, 1]} : vector<10x128xf32> to vector<1x128xf32>
      %412 = arith.addf %410, %411 : vector<1x128xf32>
      %413 = vector.extract_strided_slice %378 {offsets = [4, 0], sizes = [1, 128], strides = [1, 1]} : vector<10x128xf32> to vector<1x128xf32>
      %414 = vector.extract_strided_slice %378 {offsets = [5, 0], sizes = [1, 128], strides = [1, 1]} : vector<10x128xf32> to vector<1x128xf32>
      %cst_138 = arith.constant dense<0.000000e+00> : vector<1xf32>
      %415 = vector.multi_reduction <add>, %412, %cst_138 [1] : vector<1x128xf32> to vector<1xf32>
      %416 = vector.shape_cast %415 : vector<1xf32> to vector<1x1xf32>
      %cst_139 = arith.constant 1.280000e+02 : f32
      %417 = vector.broadcast %cst_139 : f32 to vector<1x1xf32>
      %418 = arith.divf %416, %417 : vector<1x1xf32>
      %419 = vector.broadcast %418 : vector<1x1xf32> to vector<1x128xf32>
      %420 = arith.subf %412, %419 : vector<1x128xf32>
      %421 = arith.mulf %420, %420 : vector<1x128xf32>
      %cst_140 = arith.constant dense<0.000000e+00> : vector<1xf32>
      %422 = vector.multi_reduction <add>, %421, %cst_140 [1] : vector<1x128xf32> to vector<1xf32>
      %423 = vector.shape_cast %422 : vector<1xf32> to vector<1x1xf32>
      %cst_141 = arith.constant 1.280000e+02 : f32
      %424 = vector.broadcast %cst_141 : f32 to vector<1x1xf32>
      %425 = arith.divf %423, %424 : vector<1x1xf32>
      %426 = vector.broadcast %418 : vector<1x1xf32> to vector<1x128xf32>
      %427 = arith.subf %412, %426 : vector<1x128xf32>
      %cst_142 = arith.constant 9.99999974E-6 : f32
      %428 = vector.broadcast %cst_142 : f32 to vector<1x1xf32>
      %429 = arith.addf %425, %428 : vector<1x1xf32>
      %430 = math.rsqrt %429 : vector<1x1xf32>
      %431 = vector.broadcast %430 : vector<1x1xf32> to vector<1x128xf32>
      %432 = arith.mulf %427, %431 : vector<1x128xf32>
      %433 = arith.mulf %432, %413 : vector<1x128xf32>
      %434 = arith.addf %433, %414 : vector<1x128xf32>
      %435 = arith.truncf %434 : vector<1x128xf32> to vector<1x128xbf16>
      %c2 = arith.constant 2 : index
      %c0_143 = arith.constant 0 : index
      %c0_144 = arith.constant 0 : index
      %436 = vector.load %arg14[%c2, %c0_143, %c0_144] : memref<4x128x128xbf16, #tpu.memory_space<vmem>>, vector<1x128x128xbf16>
      %437 = vector.shape_cast %436 : vector<1x128x128xbf16> to vector<128x128xbf16>
      %cst_145 = arith.constant dense<0.000000e+00> : vector<1x128xf32>
      %438 = tpu.matmul %435, %437, %cst_145 {dimension_numbers = #tpu.dot_dimension_numbers<[1], [0], [0], [1], [0, 0, 1, 1], [], []>} : vector<1x128xbf16>, vector<128x128xbf16>, vector<1x128xf32> -> vector<1x128xf32>
      %439 = vector.extract_strided_slice %378 {offsets = [6, 0], sizes = [1, 128], strides = [1, 1]} : vector<10x128xf32> to vector<1x128xf32>
      %440 = arith.addf %438, %439 : vector<1x128xf32>
      %441 = vector.extract_strided_slice %378 {offsets = [7, 0], sizes = [1, 128], strides = [1, 1]} : vector<10x128xf32> to vector<1x128xf32>
      %442 = vector.extract_strided_slice %378 {offsets = [8, 0], sizes = [1, 128], strides = [1, 1]} : vector<10x128xf32> to vector<1x128xf32>
      %cst_146 = arith.constant dense<0.000000e+00> : vector<1xf32>
      %443 = vector.multi_reduction <add>, %412, %cst_146 [1] : vector<1x128xf32> to vector<1xf32>
      %444 = vector.shape_cast %443 : vector<1xf32> to vector<1x1xf32>
      %cst_147 = arith.constant 1.280000e+02 : f32
      %445 = vector.broadcast %cst_147 : f32 to vector<1x1xf32>
      %446 = arith.divf %444, %445 : vector<1x1xf32>
      %447 = vector.broadcast %446 : vector<1x1xf32> to vector<1x128xf32>
      %448 = arith.subf %412, %447 : vector<1x128xf32>
      %449 = arith.mulf %448, %448 : vector<1x128xf32>
      %cst_148 = arith.constant dense<0.000000e+00> : vector<1xf32>
      %450 = vector.multi_reduction <add>, %449, %cst_148 [1] : vector<1x128xf32> to vector<1xf32>
      %451 = vector.shape_cast %450 : vector<1xf32> to vector<1x1xf32>
      %cst_149 = arith.constant 1.280000e+02 : f32
      %452 = vector.broadcast %cst_149 : f32 to vector<1x1xf32>
      %453 = arith.divf %451, %452 : vector<1x1xf32>
      %454 = vector.broadcast %446 : vector<1x1xf32> to vector<1x128xf32>
      %455 = arith.subf %412, %454 : vector<1x128xf32>
      %cst_150 = arith.constant 9.99999974E-6 : f32
      %456 = vector.broadcast %cst_150 : f32 to vector<1x1xf32>
      %457 = arith.addf %453, %456 : vector<1x1xf32>
      %458 = math.rsqrt %457 : vector<1x1xf32>
      %459 = vector.broadcast %458 : vector<1x1xf32> to vector<1x128xf32>
      %460 = arith.mulf %455, %459 : vector<1x128xf32>
      %461 = arith.mulf %460, %441 : vector<1x128xf32>
      %462 = arith.addf %461, %442 : vector<1x128xf32>
      %463 = arith.truncf %462 : vector<1x128xf32> to vector<1x128xbf16>
      %c3 = arith.constant 3 : index
      %c0_151 = arith.constant 0 : index
      %c0_152 = arith.constant 0 : index
      %464 = vector.load %arg14[%c3, %c0_151, %c0_152] : memref<4x128x128xbf16, #tpu.memory_space<vmem>>, vector<1x128x128xbf16>
      %465 = vector.shape_cast %464 : vector<1x128x128xbf16> to vector<128x128xbf16>
      %cst_153 = arith.constant dense<0.000000e+00> : vector<1x128xf32>
      %466 = tpu.matmul %463, %465, %cst_153 {dimension_numbers = #tpu.dot_dimension_numbers<[1], [0], [0], [1], [0, 0, 1, 1], [], []>} : vector<1x128xbf16>, vector<128x128xbf16>, vector<1x128xf32> -> vector<1x128xf32>
      %467 = vector.extract_strided_slice %378 {offsets = [9, 0], sizes = [1, 128], strides = [1, 1]} : vector<10x128xf32> to vector<1x128xf32>
      %468 = arith.addf %466, %467 : vector<1x128xf32>
      %469 = arith.truncf %440 : vector<1x128xf32> to vector<1x128xbf16>
      %c0_154 = arith.constant 0 : index
      %c0_155 = arith.constant 0 : index
      %c0_156 = arith.constant 0 : index
      %470 = vector.load %arg15[%c0_154, %c0_155, %c0_156] : memref<2x128x128xbf16, #tpu.memory_space<vmem>>, vector<1x128x128xbf16>
      %471 = vector.shape_cast %470 : vector<1x128x128xbf16> to vector<128x128xbf16>
      %cst_157 = arith.constant dense<0.000000e+00> : vector<1x128xf32>
      %472 = tpu.matmul %469, %471, %cst_157 {dimension_numbers = #tpu.dot_dimension_numbers<[1], [0], [0], [1], [0, 0, 1, 1], [], []>} : vector<1x128xbf16>, vector<128x128xbf16>, vector<1x128xf32> -> vector<1x128xf32>
      %473 = arith.truncf %468 : vector<1x128xf32> to vector<1x128xbf16>
      %c1_158 = arith.constant 1 : index
      %c0_159 = arith.constant 0 : index
      %c0_160 = arith.constant 0 : index
      %474 = vector.load %arg15[%c1_158, %c0_159, %c0_160] : memref<2x128x128xbf16, #tpu.memory_space<vmem>>, vector<1x128x128xbf16>
      %475 = vector.shape_cast %474 : vector<1x128x128xbf16> to vector<128x128xbf16>
      %cst_161 = arith.constant dense<0.000000e+00> : vector<1x128xf32>
      %476 = tpu.matmul %473, %475, %cst_161 {dimension_numbers = #tpu.dot_dimension_numbers<[1], [0], [0], [1], [0, 0, 1, 1], [], []>} : vector<1x128xbf16>, vector<128x128xbf16>, vector<1x128xf32> -> vector<1x128xf32>
      %477 = arith.addf %472, %476 : vector<1x128xf32>
      %c0_162 = arith.constant 0 : index
      %c0_163 = arith.constant 0 : index
      %478 = vector.load %arg16[%c0_162, %c0_163] : memref<1x128xf32, #tpu.memory_space<vmem>>, vector<1x128xf32>
      %479 = arith.addf %477, %478 : vector<1x128xf32>
      %c0_164 = arith.constant 0 : index
      %c0_165 = arith.constant 0 : index
      %480 = vector.load %arg18[%c0_164, %c0_165] : memref<1x128xf32, #tpu.memory_space<vmem>>, vector<1x128xf32>
      tpu.vector_store %arg18[%c0_164, %c0_165], %479 {strides = array<i32>} : memref<1x128xf32, #tpu.memory_space<vmem>>, vector<1x128xf32>,
    } else {
    }
    return
  }
  func.func @transform_0(%arg0: i32) -> (i32, i32, i32) {
    %c0_i32 = arith.constant 0 : i32
    %c0_i32_0 = arith.constant 0 : i32
    %c0_i32_1 = arith.constant 0 : i32
    %c0_i32_2 = arith.constant 0 : i32
    return %c0_i32, %c0_i32_0, %c0_i32_1 : i32, i32, i32
  }
  func.func @transform_1(%arg0: i32) -> (i32, i32) {
    %c0_i32 = arith.constant 0 : i32
    %c0_i32_0 = arith.constant 0 : i32
    %c0_i32_1 = arith.constant 0 : i32
    return %c0_i32, %c0_i32_0 : i32, i32
  }
  func.func @transform_2(%arg0: i32) -> (i32, i32) {
    %c0_i32 = arith.constant 0 : i32
    %c0_i32_0 = arith.constant 0 : i32
    %c0_i32_1 = arith.constant 0 : i32
    return %c0_i32, %c0_i32_0 : i32, i32
  }
  func.func @transform_3(%arg0: i32) -> (i32, i32) {
    %c0_i32 = arith.constant 0 : i32
    %c0_i32_0 = arith.constant 0 : i32
    %c0_i32_1 = arith.constant 0 : i32
    return %c0_i32, %c0_i32_0 : i32, i32
  }
  func.func @transform_4(%arg0: i32) -> (i32, i32, i32) {
    %c0_i32 = arith.constant 0 : i32
    %c0_i32_0 = arith.constant 0 : i32
    %c0_i32_1 = arith.constant 0 : i32
    return %arg0, %c0_i32, %c0_i32_0 : i32, i32, i32
  }
  func.func @transform_5(%arg0: i32) -> (i32, i32, i32) {
    %c0_i32 = arith.constant 0 : i32
    %c0_i32_0 = arith.constant 0 : i32
    %c0_i32_1 = arith.constant 0 : i32
    return %arg0, %c0_i32, %c0_i32_0 : i32, i32, i32
  }
  func.func @transform_6(%arg0: i32) -> (i32, i32, i32) {
    %c0_i32 = arith.constant 0 : i32
    %c0_i32_0 = arith.constant 0 : i32
    %c0_i32_1 = arith.constant 0 : i32
    return %arg0, %c0_i32, %c0_i32_0 : i32, i32, i32
  }
  func.func @transform_7(%arg0: i32) -> (i32, i32, i32) {
    %c0_i32 = arith.constant 0 : i32
    %c0_i32_0 = arith.constant 0 : i32
    %c0_i32_1 = arith.constant 0 : i32
    return %arg0, %c0_i32, %c0_i32_0 : i32, i32, i32
  }
  func.func @transform_8(%arg0: i32) -> (i32, i32, i32) {
    %c0_i32 = arith.constant 0 : i32
    %c0_i32_0 = arith.constant 0 : i32
    %c0_i32_1 = arith.constant 0 : i32
    return %arg0, %c0_i32, %c0_i32_0 : i32, i32, i32
  }
  func.func @transform_9(%arg0: i32) -> (i32, i32, i32) {
    %c0_i32 = arith.constant 0 : i32
    %c0_i32_0 = arith.constant 0 : i32
    %c0_i32_1 = arith.constant 0 : i32
    return %arg0, %c0_i32, %c0_i32_0 : i32, i32, i32
  }
  func.func @transform_10(%arg0: i32) -> (i32, i32, i32) {
    %c0_i32 = arith.constant 0 : i32
    %c0_i32_0 = arith.constant 0 : i32
    %c0_i32_1 = arith.constant 0 : i32
    return %arg0, %c0_i32, %c0_i32_0 : i32, i32, i32
  }
  func.func @transform_11(%arg0: i32) -> (i32, i32) {
    %c0_i32 = arith.constant 0 : i32
    %c0_i32_0 = arith.constant 0 : i32
    %c0_i32_1 = arith.constant 0 : i32
    return %c0_i32, %c0_i32_0 : i32, i32
  }
  func.func @transform_12(%arg0: i32) -> (i32, i32) {
    %c0_i32 = arith.constant 0 : i32
    %c0_i32_0 = arith.constant 0 : i32
    %c0_i32_1 = arith.constant 0 : i32
    return %c0_i32, %c0_i32_0 : i32, i32
  }
  func.func @transform_13(%arg0: i32) -> (i32, i32, i32) {
    %c0_i32 = arith.constant 0 : i32
    %c0_i32_0 = arith.constant 0 : i32
    %c0_i32_1 = arith.constant 0 : i32
    %c0_i32_2 = arith.constant 0 : i32
    return %c0_i32, %c0_i32_0, %c0_i32_1 : i32, i32, i32
  }
  func.func @transform_14(%arg0: i32) -> (i32, i32, i32) {
    %c0_i32 = arith.constant 0 : i32
    %c0_i32_0 = arith.constant 0 : i32
    %c0_i32_1 = arith.constant 0 : i32
    %c0_i32_2 = arith.constant 0 : i32
    return %c0_i32, %c0_i32_0, %c0_i32_1 : i32, i32, i32
  }
  func.func @transform_15(%arg0: i32) -> (i32, i32) {
    %c0_i32 = arith.constant 0 : i32
    %c0_i32_0 = arith.constant 0 : i32
    %c0_i32_1 = arith.constant 0 : i32
    return %c0_i32, %c0_i32_0 : i32, i32
  }
  func.func @transform_16(%arg0: i32) -> (i32, i32, i32) {
    %c0_i32 = arith.constant 0 : i32
    %c0_i32_0 = arith.constant 0 : i32
    %c0_i32_1 = arith.constant 0 : i32
    %c0_i32_2 = arith.constant 0 : i32
    return %c0_i32, %c0_i32_0, %c0_i32_1 : i32, i32, i32
  }
  func.func @transform_17(%arg0: i32) -> (i32, i32) {
    %c0_i32 = arith.constant 0 : i32
    %c0_i32_0 = arith.constant 0 : i32
    %c0_i32_1 = arith.constant 0 : i32
    return %c0_i32, %c0_i32_0 : i32, i32
  }
}

</mosaic_0001>

<bundles_post_ra>
// kernel: clip_network_forward.1
= control target key start
LH: loop header
LB: loop body
LE: loop exit
PB: predicated region body
PF: predicated region fallthrough
CT: control target
= control target key end

     0   :  { %s7245_s0 = inlined_call_operand.vmem [shape: bf16[2,5,192], index: 0, kind: input, shape index: {}]   ;;  %s7246_s1 = inlined_call_operand.hbm [shape: bf16[192,128], index: 1, kind: input, shape index: {}]   ;;  %s7247_s2 = inlined_call_operand.hbm [shape: f32[5,128], index: 2, kind: input, shape index: {}]   ;;  %s7248_s3 = inlined_call_operand.vmem [shape: f32[2,128], index: 3, kind: input, shape index: {}]   ;;  %s7249_s4 = inlined_call_operand.vmem [shape: bf16[3,128,384], index: 4, kind: input, shape index: {}]   ;;  %s7250_s5 = inlined_call_operand.hbm [shape: f32[3,1,384], index: 5, kind: input, shape index: {}]   ;;  %s7251_s6 = inlined_call_operand.hbm [shape: bf16[3,128,128], index: 6, kind: input, shape index: {}]   ;;  %s7252_s7 = inlined_call_operand.vmem [shape: f32[3,6,128], index: 7, kind: input, shape index: {}]   ;;  %s7253_s8 = inlined_call_operand.hbm [shape: bf16[3,128,512], index: 8, kind: input, shape index: {}]   ;;  %s7254_s9 = inlined_call_operand.hbm [shape: f32[3,1,512], index: 9, kind: input, shape index: {}]   ;;  %s7255_s10 = inlined_call_operand.hbm [shape: bf16[3,512,128], index: 10, kind: input, shape index: {}]   ;;  %s7256_s11 = inlined_call_operand.vmem [shape: f32[2,128], index: 11, kind: input, shape index: {}]   ;;  %s7257_s12 = inlined_call_operand.vmem [shape: f32[10,128], index: 12, kind: input, shape index: {}]   ;;  %s7258_s13 = inlined_call_operand.hbm [shape: bf16[4,128,128], index: 13, kind: input, shape index: {}]   ;;  %s7259_s14 = inlined_call_operand.hbm [shape: bf16[2,128,128], index: 14, kind: input, shape index: {}]   ;;  %s7260_s15 = inlined_call_operand.vmem [shape: f32[1,128], index: 15, kind: input, shape index: {}]   ;;  %s7261_s16 = inlined_call_operand.vmem [shape: f32[2,5,128], index: 16, kind: output, shape index: {0}]   ;;  %s7262_s17 = inlined_call_operand.vmem [shape: f32[1,128], index: 17, kind: output, shape index: {1}]  }
   0x1   :  { %7280 = sst [smem:[#allocation25_spill]] %s7245_s0 }
   0x2   :  { %7281 = sst [smem:[#allocation26_spill]] %s7246_s1 }
   0x3   :  { %7282 = sst [smem:[#allocation27_spill]] %s7248_s3 }
   0x4   :  { %7283 = sst [smem:[#allocation28_spill]] %s7249_s4 }
   0x5   :  { %7284 = sst [smem:[#allocation29_spill]] %s7250_s5 }
   0x6   :  { %7285 = sst [smem:[#allocation30_spill]] %s7251_s6 }
   0x7   :  { %7286 = sst [smem:[#allocation31_spill]] %s7252_s7 }
   0x8   :  { %7287 = sst [smem:[#allocation32_spill]] %s7253_s8 }
   0x9   :  { %7288 = sst [smem:[#allocation33_spill]] %s7256_s11 }
   0xa   :  { %7289 = sst [smem:[#allocation34_spill]] %s7257_s12 }
   0xb   :  { %7290 = sst [smem:[#allocation35_spill]] %s7260_s15 }
   0xc   :  { %7291 = sst [smem:[#allocation36_spill]] %s7261_s16 }
   0xd   :  { %7292 = sst [smem:[#allocation37_spill]] %s7262_s17 }
   0xe   :  { %23 = vsyncpa [#allocation4], 0 }
   0xf   :  { %24 = vsyncpa [#allocation6], 0 }
  0x10   :  { %25 = vsyncpa [#allocation14], 0  ;;  %s6273_s24 = smov 0   ;;  %s6275_s25 = smov 0  }
  0x11   :  { %s6277_s26 = smov 0   ;;  %s6279_s27 = smov 0  }
  0x12 LB: > { %7293 = sst [smem:[#allocation20_spill]] %s6158_s25  ;;  %s6292_s28 = sadd.s32 4294967295, %s6166_s27   ;;  %s6166_s27 = sphi %s6279_s27, %s7334_s27   ;;  %s6162_s26 = sphi %s6277_s26, %s7337_s26   ;;  %s6158_s25 = sphi %s6275_s25, %s7336_s25   ;;  %s6154_s24 = sphi %s6273_s24, %s7335_s24  }
  0x13   : > { %7294 = sst [smem:[#allocation21_spill]] %s6162_s26  ;;  %p161_p0 = scmp.ne.s32.totalorder %s6158_s25, %s6154_s24 }
  0x14   : > { %p162_p1 = scmp.eq.s32.totalorder %s6292_s28, 0  ;;  %p4314_p2 = scmp.ge.s32.totalorder %s6166_s27, 1 }
  0x15   : > { %p449_p3 = scmp.lt.s32.totalorder %s6166_s27, 4  ;;  %p4315_p4 = scmp.ne.s32.totalorder %s6292_s28, 0 }
  0x16   : > { %p6301_p5 = por %p162_p1, %p161_p0  ;;  %s7297_s18 = sld [smem:[#allocation26_spill]] }
  0x17   : > { %p6308_p6 = pnand %p4314_p2, %p449_p3  ;;  %s6168_s20 = smov [#allocation3]  }
  0x18   : > { %s7295_s29 = scalar_select %p6301_p5, 1, 0 }
  0x19   : > { %p5667_p7 = pneg %p6308_p6  ;;  %s465_s21 = sshll.u32 %s6168_s20, 4  ;;  %s466_s21 = int_to_ptr.vmem [resolvable:$true] %s465_s21 }
  0x1a   : > { %7296 = sst [smem:[#allocation22_spill]] %s7295_s29  ;;  %s6321_s23 = sadd.s32 1, %s6166_s27  }
  0x1b   : > { %p6316_p8 = pnand %p5667_p7, %p162_p1  ;;  %7300 = sst [smem:[#allocation23_spill]] %s6321_s23 }
  0x1c   : > { %s463_s19 = sshll.u32 %s7297_s18, 4  ;;  %s7266_s24 = smov 64   ;;  %s464_s19 = int_to_ptr.hbm [resolvable:$true] %s463_s19 }
  0x1d   : > { %s7268_s0 = smov 4   ;;  %s145_s30 = ssub.s32 %s6166_s27, %s6321_s23 }
  0x1e   : > { %5670 = dma.hbm_to_vmem [thread:$0]  (!%p6316_p8), %s464_s19, 1536, %s466_s21, [#allocation4], %s7266_s24, %s7266_s24, %s7268_s0  }
  0x1f   : > { %s148_s18 = sadd.s32 1, %s6162_s26  ;;  %p146_p9 = scmp.eq.s32.totalorder %s145_s30, 0 }
  0x20   : > { %p155_p10 = scmp.ne.s32.totalorder %s6162_s26, %s6158_s25  ;;  %p156_p11 = scmp.eq.s32.totalorder %s6166_s27, 0 }
  0x21   : > { %p5700_p12 = scmp.lt.s32.totalorder %s6166_s27, 3  ;;  %s539_s17 = sand.u32 1, %s6166_s27  }
  0x22   : > { %s6336_s20 = scalar_select %p146_p9, %s6162_s26, %s148_s18  }
  0x23   : > { %p157_p13 = por %p156_p11, %p155_p10  ;;  %s6340_s15 = sand.u32 1, %s6162_s26  }
  0x24   : > { %7301 = sst [smem:[#allocation24_spill]] %s6336_s20  ;;  %s5637_s12 = smul.u32 3, %s6340_s15 }
  0x25   : > { %p6343_p0 = pnand %p5700_p12, %p157_p13  ;;  %s5638_s19 = smul.u32 3, %s6166_s27 }
  0x26   : > { %s4320_s21 = sshll.u32 %s6340_s15, 6  ;;  %s7303_s5 = sld [smem:[#allocation29_spill]] }
  0x27   : > { %s543_s18 = scalar_lea.vmem [#allocation7], %s5637_s12  ;;  %s6352_s26 = scalar_lea.sflag [#allocation4], %s539_s17 }
  0x28   : > { %s551_s20 = sshll.u32 %s543_s18, 4  ;;  %p6356_p3 = pneg %p6343_p0  ;;  %s552_s20 = int_to_ptr.vmem [resolvable:$true] %s551_s20 }
  0x2c   : > { %s547_s0 = scalar_lea.hbm %s7303_s5, %s5638_s19 }
  0x2d   : > { %s549_s23 = sshll.u32 %s547_s0, 4  ;;  %s5883_s0 = scalar_lea.hbm %s7303_s5, 9  ;;  %s550_s23 = int_to_ptr.hbm [resolvable:$true] %s549_s23 }
  0x2e   : > { %s5876_s16 = sshra.s32 %s550_s23, 4  ;;  %s5877_s16 = int_to_ptr.hbm [resolvable:$true] %s5876_s16 }
  0x2f   : > { %s5878_s3 = scalar_lea.hbm %s5877_s16, 3  ;;  %p5884_p10 = scmp.lt.s32.totalorder %s5877_s16, %s7303_s5 }
  0x30   : > { %p5879_p2 = scmp.ne.s32.totalorder %s5877_s16, %s5878_s3  ;;  %p5885_p11 = scmp.lt.s32.totalorder %s5883_s0, %s5878_s3 }
  0x32   : > { %p5881_p7 = pnand %p6356_p3, %p5879_p2  ;;  %p5886_p12 = por %p5885_p11, %p5884_p10 }
  0x34   : > { %p5882_p9 = pneg %p5881_p7 }
  0x36   : > { %p5887_p13 = pnand %p5886_p12, %p5882_p9 }
  0x38   : > { %5890 = shalt.err (!%p5887_p13)
}
  0x39   : > { %5683 = dma.hbm_to_vmem [thread:$0]  (!%p6343_p0), %s550_s23, 48, %s552_s20, %s6352_s26  }
  0x3a   : > { %s5382_s30 = sshll.u32 %s6166_s27, 6  ;;  %s562_s18 = scalar_lea.vmem [#allocation8], %s4320_s21 }
  0x3b   : > { %s570_s7 = sshll.u32 %s562_s18, 4  ;;  %s7305_s6 = sld [smem:[#allocation30_spill]]  ;;  %s571_s7 = int_to_ptr.vmem [resolvable:$true] %s570_s7 }
  0x3c   : > { %s7277_s3 = sshll.u32 %s6340_s15, 8 }
  0x41   : > { %s567_s29 = scalar_lea.hbm %s7305_s6, %s5382_s30  ;;  %s5913_s20 = scalar_lea.hbm %s7305_s6, 192 }
  0x42   : > { %s568_s16 = sshll.u32 %s567_s29, 4  ;;  %s569_s16 = int_to_ptr.hbm [resolvable:$true] %s568_s16 }
  0x43   : > { %s5906_s0 = sshra.s32 %s569_s16, 4  ;;  %s5907_s0 = int_to_ptr.hbm [resolvable:$true] %s5906_s0 }
  0x44   : > { %s5908_s19 = scalar_lea.hbm %s5907_s0, 64  ;;  %p5914_p10 = scmp.lt.s32.totalorder %s5907_s0, %s7305_s6 }
  0x45   : > { %p5909_p2 = scmp.ne.s32.totalorder %s5907_s0, %s5908_s19  ;;  %p5915_p11 = scmp.lt.s32.totalorder %s5913_s20, %s5908_s19 }
  0x47   : > { %p5911_p7 = pnand %p5909_p2, %p6356_p3  ;;  %p5916_p12 = por %p5915_p11, %p5914_p10 }
  0x49   : > { %p5912_p9 = pneg %p5911_p7 }
  0x4b   : > { %p5917_p13 = pnand %p5916_p12, %p5912_p9 }
  0x4d   : > { %5920 = shalt.err (!%p5917_p13)
}
  0x4e   : > { %s7306_s29 = smov 4   ;;  %s7307_s30 = smov 64  }
  0x4f   : > { %5686 = dma.hbm_to_vmem [thread:$0]  (!%p6343_p0), %s569_s16, 1024, %s571_s7, %s6352_s26, %s7307_s30, %s7307_s30, %s7306_s29  }
  0x50   : > { %s7278_s12 = sshll.u32 %s6166_s27, 8  ;;  %s591_s24 = scalar_lea.vmem [#allocation9], %s7277_s3 }
  0x51   : > { %s599_s17 = sshll.u32 %s591_s24, 4  ;;  %s7308_s8 = sld [smem:[#allocation32_spill]]  ;;  %s600_s17 = int_to_ptr.vmem [resolvable:$true] %s599_s17 }
  0x57   : > { %s596_s23 = scalar_lea.hbm %s7308_s8, %s7278_s12  ;;  %s5943_s3 = scalar_lea.hbm %s7308_s8, 768 }
  0x58   : > { %s597_s20 = sshll.u32 %s596_s23, 4  ;;  %s598_s20 = int_to_ptr.hbm [resolvable:$true] %s597_s20 }
  0x59   : > { %s5936_s21 = sshra.s32 %s598_s20, 4  ;;  %s5937_s21 = int_to_ptr.hbm [resolvable:$true] %s5936_s21 }
  0x5a   : > { %s5938_s18 = scalar_lea.hbm %s5937_s21, 256  ;;  %p5944_p10 = scmp.lt.s32.totalorder %s5937_s21, %s7308_s8 }
  0x5b   : > { %p5939_p2 = scmp.ne.s32.totalorder %s5937_s21, %s5938_s18  ;;  %p5945_p11 = scmp.lt.s32.totalorder %s5943_s3, %s5938_s18 }
  0x5d   : > { %p5941_p7 = pnand %p5939_p2, %p6356_p3  ;;  %p5946_p12 = por %p5945_p11, %p5944_p10 }
  0x5f   : > { %p5942_p9 = pneg %p5941_p7 }
  0x61   : > { %p5947_p13 = pnand %p5946_p12, %p5942_p9 }
  0x63   : > { %5950 = shalt.err (!%p5947_p13)
}
  0x64   : > { %s6171_s0 = smov 256   ;;  %s6172_s19 = smov 16  }
  0x65   : > { %5689 = dma.hbm_to_vmem [thread:$0]  (!%p6343_p0), %s598_s20, 4096, %s600_s17, %s6352_s26, %s6171_s0, %s6171_s0, %s6172_s19  }
  0x66   : > { %s478_s16 = sshll.u32 %s7247_s2, 4  ;;  %s6173_s5 = smov [#allocation5]   ;;  %s479_s16 = int_to_ptr.hbm [resolvable:$true] %s478_s16 }
  0x67   : > { %s480_s21 = sshll.u32 %s6173_s5, 4  ;;  %s4326_s3 = sshll.u32 %s6340_s15, 2  ;;  %s481_s21 = int_to_ptr.vmem [resolvable:$true] %s480_s21 }
  0x68   : > { %5673 = dma.hbm_to_vmem [thread:$0]  (!%p6316_p8), %s479_s16, 128, %s481_s21, [#allocation6]  }
  0x69   : > { %s4327_s18 = sshll.u32 %s6166_s27, 2  ;;  %s613_s8 = scalar_lea.vmem [#allocation10], %s4326_s3 }
  0x6a   : > { %s617_s6 = scalar_lea.hbm %s7254_s9, %s4327_s18  ;;  %s621_s25 = sshll.u32 %s613_s8, 4  ;;  %s622_s25 = int_to_ptr.vmem [resolvable:$true] %s621_s25 }
  0x6b   : > { %s619_s17 = sshll.u32 %s617_s6, 4  ;;  %s498_s19 = sshll.u32 %s7258_s13, 4  ;;  %s620_s17 = int_to_ptr.hbm [resolvable:$true] %s619_s17  ;;  %s499_s19 = int_to_ptr.hbm [resolvable:$true] %s498_s19 }
  0x6c   : > { %s5996_s23 = sshra.s32 %s620_s17, 4  ;;  %s6003_s12 = scalar_lea.hbm %s7254_s9, 12  ;;  %s5997_s23 = int_to_ptr.hbm [resolvable:$true] %s5996_s23 }
  0x6d   : > { %s5998_s7 = scalar_lea.hbm %s5997_s23, 4  ;;  %p6004_p10 = scmp.lt.s32.totalorder %s5997_s23, %s7254_s9 }
  0x6e   : > { %p5999_p2 = scmp.ne.s32.totalorder %s5997_s23, %s5998_s7  ;;  %p6005_p11 = scmp.lt.s32.totalorder %s6003_s12, %s5998_s7 }
  0x70   : > { %p6001_p7 = pnand %p5999_p2, %p6356_p3  ;;  %p6006_p12 = por %p6005_p11, %p6004_p10 }
  0x72   : > { %p6002_p9 = pneg %p6001_p7 }
  0x74   : > { %p6007_p13 = pnand %p6006_p12, %p6002_p9 }
  0x76   : > { %6010 = shalt.err (!%p6007_p13)
}
  0x77   : > { %5692 = dma.hbm_to_vmem [thread:$0]  (!%p6343_p0), %s620_s17, 64, %s622_s25, %s6352_s26  }
  0x78   : > { %s6174_s6 = smov [#allocation12]   ;;  %s512_s20 = sshll.u32 %s7259_s14, 4  ;;  %s513_s20 = int_to_ptr.hbm [resolvable:$true] %s512_s20 }
  0x79   : > { %s500_s3 = sshll.u32 %s6174_s6, 4  ;;  %s6175_s0 = smov [#allocation13]   ;;  %s501_s3 = int_to_ptr.vmem [resolvable:$true] %s500_s3 }
  0x7a   : > { %5676 = dma.hbm_to_vmem [thread:$0]  (!%p6316_p8), %s499_s19, 4096, %s501_s3, [#allocation6], %s7307_s30, %s7307_s30, %s7306_s29  }
  0x7b   : > { %s514_s23 = sshll.u32 %s6175_s0, 4  ;;  %s7309_s7 = sshll.u32 %s6166_s27, 8  ;;  %s515_s23 = int_to_ptr.vmem [resolvable:$true] %s514_s23 }
  0x7c   : > { %s637_s17 = scalar_lea.hbm %s7255_s10, %s7309_s7  ;;  %s7310_s12 = sshll.u32 %s6340_s15, 8 }
  0x7d   : > { %s638_s5 = sshll.u32 %s637_s17, 4  ;;  %s632_s21 = scalar_lea.vmem [#allocation11], %s7310_s12  ;;  %s639_s5 = int_to_ptr.hbm [resolvable:$true] %s638_s5 }
  0x7e   : > { %5679 = dma.hbm_to_vmem [thread:$0]  (!%p6316_p8), %s513_s20, 2048, %s515_s23, [#allocation14], %s7307_s30, %s7307_s30, %s7306_s29  }
  0x7f   : > { %s640_s8 = sshll.u32 %s632_s21, 4  ;;  %s6086_s19 = sshra.s32 %s639_s5, 4  ;;  %s641_s8 = int_to_ptr.vmem [resolvable:$true] %s640_s8  ;;  %s6087_s19 = int_to_ptr.hbm [resolvable:$true] %s6086_s19 }
  0x80   : > { %s6088_s6 = scalar_lea.hbm %s6087_s19, 256  ;;  %s6093_s22 = scalar_lea.hbm %s7255_s10, 768 }
  0x81   : > { %p6089_p2 = scmp.ne.s32.totalorder %s6087_s19, %s6088_s6  ;;  %p6094_p8 = scmp.lt.s32.totalorder %s6087_s19, %s7255_s10 }
  0x82   : > { %p6095_p10 = scmp.lt.s32.totalorder %s6093_s22, %s6088_s6 }
  0x83   : > { %p6091_p7 = pnand %p6089_p2, %p6356_p3 }
  0x84   : > { %p6096_p11 = por %p6095_p10, %p6094_p8 }
  0x85   : > { %p6092_p9 = pneg %p6091_p7 }
  0x87   : > { %p6097_p12 = pnand %p6096_p11, %p6092_p9 }
  0x89   : > { %6100 = shalt.err (!%p6097_p12)
}
  0x8a   : > { %5695 = dma.hbm_to_vmem [thread:$0]  (!%p6343_p0), %s639_s5, 4096, %s641_s8, %s6352_s26, %s7307_s30, %s7307_s30, %s7306_s29  }
  0x8b   : > { %652 = sbr.rel (%p6308_p6) target bundleno = 5656 (0x1618), region = 84 }
  0x90   : > { %6133 = dma.done.wait (%p162_p1), [#allocation4], 1536  }
  0x91   : > { %6135 = vsyncadd (%p162_p1), [#allocation4], 4294965760 }
  0x92   : > { %6137 = dma.done.wait (%p162_p1), [#allocation6], 128  }
  0x93   : > { %6139 = vsyncadd (%p162_p1), [#allocation6], 4294967168  ;;  %s7311_s4 = sld [smem:[#allocation20_spill]]  ;;  %s664_s15 = sand.u32 1, %s6292_s28  }
  0x94   : > { %s665_s1 = scalar_lea.sflag [#allocation4], %s664_s15 }
  0x99   : > { %s666_s26 = sand.u32 1, %s7311_s4  }
  0x9a   : > { %s5639_s29 = smul.u32 3, %s666_s26 }
  0x9c   : > { %s6479_s30 = scalar_lea.vmem [#allocation7], %s5639_s29 }
  0x9d   : > { %6141 = dma.done.wait (%p6301_p5), %s665_s1, 9328  }
  0x9e   : > { %6143 = vsyncadd (%p6301_p5), %s665_s1, 4294957968  ;;  %s4334_s20 = sshll.u32 %s666_s26, 6  ;;  %s4335_s0 = sshll.u32 %s666_s26, 8 }
  0x9f   : > { %s4336_s23 = sshll.u32 %s666_s26, 2  ;;  %s6485_s7 = scalar_lea.vmem [#allocation8], %s4334_s20 }
  0xa0   : > { %s6487_s16 = scalar_lea.vmem [#allocation9], %s4335_s0  ;;  %s6489_s25 = scalar_lea.vmem [#allocation10], %s4336_s23 }
  0xa1   : > { %s6491_s17 = scalar_lea.vmem [#allocation11], %s4335_s0 }
  0xa2   : > { %6145 = dma.done.wait (%p162_p1), [#allocation6], 4096  }
  0xa3   : > { %6147 = vsyncadd (%p162_p1), [#allocation6], 4294963200 }
  0xa4   : > { %6149 = dma.done.wait (%p162_p1), [#allocation14], 2048  }
  0xa5   : > { %6151 = vsyncadd (%p162_p1), [#allocation14], 4294965248  ;;  %p794_p5 = scmp.lt.s32.totalorder %s6292_s28, 2  ;;  %s7313_s6 = sld [smem:[#allocation31_spill]] }
  0xa6   : > { %s7314_s18 = sld [smem:[#allocation28_spill]] }
  0xa7   : > { %s795_s5 = scalar_select %p794_p5, %s6292_s28, 2 }
  0xa8   : > { %807 = sbr.rel (%p4315_p4) target bundleno = 612 (0x264), region = 124  ;;  %s7315_s15 = sld [smem:[#allocation25_spill]] (!%p4315_p4) }
  0xa9   : > { %s5640_s12 = smul.u32 192, %s795_s5  ;;  %s4341_s21 = sshll.u32 %s795_s5, 3 }
  0xaa   : > { %s7316_s0 = sld [smem:[#allocation27_spill]] (!%p4315_p4) }
  0xab   : > { %s6506_s27 = scalar_lea.vmem %s7313_s6, %s4341_s21 }
  0xac   : > { %s6511_s24 = scalar_lea.vmem %s7314_s18, %s5640_s12 }
  0xad   : > { %v5392_v0 = vld [vmem:[#allocation3 + $0x38] sm:$0xff]  ;;  %v5391_v2 = vld [vmem:[#allocation3 + $0x30] sm:$0xff]  ;;  %v5390_v4 = vld [vmem:[#allocation3 + $0x28] sm:$0xff]  ;;  %vm914_vm0 = vcmask 523264   ;;  %vm944_vm1 = vcmask 1044480   ;;  %v6176_v37 = vmov 128.0  }
  0xae   : > { %v5396_v1 = vld [vmem:[#allocation3 + $0x58] sm:$0xff]  ;;  %918 = vmatpush.bf16.msra.mxu0 %v5392_v0  ;;  %990 = vmatpush.bf16.msra.mxu2 %v5392_v0  ;;  %v5395_v3 = vld [vmem:[#allocation3 + $0x50] sm:$0xff]  ;;  %v5394_v5 = vld [vmem:[#allocation3 + $0x48] sm:$0xff]  ;;  %5754 = vrcp.f32 %v6176_v37 }
  0xaf   : > { %935 = vmatpush.bf16.msra.mxu1 %v5396_v1  ;;  %1007 = vmatpush.bf16.msra.mxu3 %v5396_v1  ;;  %v835_v6 = vld [vmem:[%s7315_s15] sm:$0x77]  ;;  %v4392_v7 = vld [vmem:[%s7315_s15 + $0x8] sm:$0x77]  ;;  %v5389_v8 = vld [vmem:[#allocation3 + $0x20] sm:$0xff] }
  0xb0   : > { %v5393_v9 = vld [vmem:[#allocation3 + $0x40] sm:$0xff]  ;;  %v838_v10 = vunpack.c.h.b16 %v835_v6  ;;  %v983_v11 = vunpack.c.h.b16 %v4392_v7  ;;  %v5388_v12 = vld [vmem:[#allocation3 + $0x18] sm:$0xff]  ;;  %v5387_v15 = vld [vmem:[#allocation3 + $0x10] sm:$0xff]  ;;  %v837_v17 = vunpack.c.l.b16 %v835_v6  ;;  %v982_v18 = vunpack.c.l.b16 %v4392_v7 }
  0xb1   : > { %v5386_v16 = vld [vmem:[#allocation3 + $0x8] sm:$0xff]  ;;  %v5385_v19 = vld [vmem:[#allocation3] sm:$0xff]  ;;  %v5753_v7 = vld [vmem:[%s7316_s0 + $0x1] ss:$0 sm:$0xff] }
  0xb2   : > { %919 = vmatpush.bf16.msra.mxu0 %v5391_v2  ;;  %991 = vmatpush.bf16.msra.mxu2 %v5391_v2  ;;  %v840_v13 = vpack.c.b16 %v838_v10, %v838_v10  ;;  %v985_v14 = vpack.c.b16 %v983_v11, %v983_v11  ;;  %v839_v20 = vpack.c.b16 %v837_v17, %v837_v17  ;;  %v832_v25 = vld [vmem:[#allocation5] sm:$0x1f] }
  0xb3   : > { %936 = vmatpush.bf16.msra.mxu1 %v5395_v3  ;;  %1008 = vmatpush.bf16.msra.mxu3 %v5395_v3  ;;  %v984_v21 = vpack.c.b16 %v982_v18, %v982_v18 }
  0xb4   : > { %v5755_v38 = vpop.eup %5754 }
  0xb5   : > { %v949_v39 = vmul.f32 128.0, %v5755_v38  ;;  %vm953_vm2 = vweird.f32 %v5755_v38 }
  0xb6   : > { %920 = vmatpush.bf16.msra.mxu0 %v5390_v4  ;;  %992 = vmatpush.bf16.msra.mxu2 %v5390_v4  ;;  %v5752_v4 = vld [vmem:[%s7316_s0] ss:$0 sm:$0xff] }
  0xb7   : > { %937 = vmatpush.bf16.msra.mxu1 %v5394_v5  ;;  %1009 = vmatpush.bf16.msra.mxu3 %v5394_v5  ;;  %v950_v40 = vsub.f32 1.0, %v949_v39 }
  0xb9   : > { %v951_v41 = vmul.f32 %v5755_v38, %v950_v40 }
  0xba   : > { %921 = vmatpush.bf16.msra.mxu0 %v5389_v8  ;;  %993 = vmatpush.bf16.msra.mxu2 %v5389_v8 }
  0xbb   : > { %938 = vmatpush.bf16.msra.mxu1 %v5393_v9  ;;  %1010 = vmatpush.bf16.msra.mxu3 %v5393_v9  ;;  %v952_v42 = vadd.f32 %v5755_v38, %v951_v41 }
  0xbd   : > { %v954_v43 = vsel %vm953_vm2, %v5755_v38, %v952_v42 }
  0xbe   : > { %922 = vmatpush.bf16.msra.mxu0 %v5388_v12  ;;  %994 = vmatpush.bf16.msra.mxu2 %v5388_v12 }
  0xbf   : > { %4391 = vmatmul.msk.bf16.vlgmr.msra.gmra.mxu1 %vm914_vm0, %v840_v13  ;;  %4393 = vmatmul.msk.bf16.vlgmr.msra.gmra.mxu3 %vm914_vm0, %v985_v14 }
  0xc2   : > { %923 = vmatpush.bf16.msra.mxu0 %v5387_v15  ;;  %995 = vmatpush.bf16.msra.mxu2 %v5387_v15 }
  0xc6   : > { %924 = vmatpush.bf16.msra.mxu0 %v5386_v16  ;;  %996 = vmatpush.bf16.msra.mxu2 %v5386_v16 }
  0xca   : > { %925 = vmatpush.bf16.msra.mxu0 %v5385_v19  ;;  %997 = vmatpush.bf16.msra.mxu2 %v5385_v19 }
  0xcd   : > { %926 = vmatmul.bf16.vlgmr.msra.gmra.mxu0 %v839_v20  ;;  %998 = vmatmul.bf16.vlgmr.msra.gmra.mxu2 %v984_v21 }
 0x13c   : > { %v940_v22 = vpop.f32.mrf.mxu1 }
 0x142   : > { %v1012_v23 = vpop.f32.mrf.mxu3 }
 0x144   : > { %v942_v24 = vpop.f32.mrf.mxu1 }
 0x14a   : > { %v927_v26 = vpop.f32.mrf.mxu0  ;;  %v1014_v27 = vpop.f32.mrf.mxu3 }
 0x14b   : > { %v928_v28 = vadd.f32 %v927_v26, %v832_v25 }
 0x14d   : > { %v941_v29 = vadd.f32 %v940_v22, %v928_v28 }
 0x14f   : > { %v945_v30 = vsel %vm944_vm1, %v941_v29, 0.0 }
 0x150   : > { %v999_v31 = vpop.f32.mrf.mxu2  ;;  %946 = vadd.xlane.f32.xlu0 %v945_v30 }
 0x151   : > { %v1000_v32 = vadd.f32 %v999_v31, %v832_v25 }
 0x152   : > { %v929_v33 = vpop.f32.mrf.mxu0 }
 0x153   : > { %v1013_v34 = vadd.f32 %v1012_v23, %v1000_v32 }
 0x155   : > { %v1016_v35 = vsel %vm944_vm1, %v1013_v34, 0.0 }
 0x158   : > { %v1001_v36 = vpop.f32.mrf.mxu2  ;;  %1017 = vadd.xlane.f32.xlu0 %v1016_v35 }
 0x1c3   : > { %v947_v44 = vpop.xlane.xlu0 %946 }
 0x1c4   : > { %v955_v45 = vmul.f32 %v954_v43, %v947_v44 }
 0x1c6   : > { %v956_v46 = vsub.f32 %v941_v29, %v955_v45 }
 0x1c8   : > { %v957_v47 = vmul.f32 %v956_v46, %v956_v46 }
 0x1ca   : > { %v958_v48 = vsel %vm944_vm1, %v957_v47, 0.0 }
 0x1cb   : > { %959 = vadd.xlane.f32.xlu1 %v958_v48  ;;  %v1018_v49 = vpop.xlane.xlu0 %1017 }
 0x1cc   : > { %v1019_v50 = vmul.f32 %v1018_v49, %v954_v43 }
 0x1ce   : > { %v1020_v51 = vsub.f32 %v1013_v34, %v1019_v50 }
 0x1d0   : > { %v1021_v52 = vmul.f32 %v1020_v51, %v1020_v51 }
 0x1d2   : > { %v1022_v53 = vsel %vm944_vm1, %v1021_v52, 0.0 }
 0x1d3   : > { %1023 = vadd.xlane.f32.xlu1 %v1022_v53 }
 0x23e   : > { %v960_v54 = vpop.xlane.xlu1 %959 }
 0x23f   : > { %v961_v55 = vmul.f32 %v960_v54, %v954_v43 }
 0x241   : > { %v962_v56 = vadd.f32 1e-05, %v961_v55 }
 0x243   : > { %5756 = vrsqrt.f32 %v962_v56  ;;  %vm969_vm4 = vweird.f32 %v962_v56 }
 0x246   : > { %v1024_v57 = vpop.xlane.xlu1 %1023 }
 0x247   : > { %v1025_v58 = vmul.f32 %v1024_v57, %v954_v43 }
 0x249   : > { %v5757_v59 = vpop.eup %5756  ;;  %v1026_v60 = vadd.f32 1e-05, %v1025_v58 }
 0x24a   : > { %v964_v61 = vmul.f32 %v5757_v59, %v962_v56  ;;  %vm970_vm3 = vweird.f32 %v5757_v59 }
 0x24b   : > { %5758 = vrsqrt.f32 %v1026_v60  ;;  %vm971_vm5 = vmor %vm969_vm4, %vm970_vm3  ;;  %vm1033_vm7 = vweird.f32 %v1026_v60 }
 0x24c   : > { %v965_v62 = vmul.f32 %v5757_v59, %v964_v61 }
 0x24e   : > { %v966_v63 = vmul.f32 0.5, %v965_v62 }
 0x250   : > { %v967_v0 = vsub.f32 1.5, %v966_v63 }
 0x251   : > { %v5759_v1 = vpop.eup %5758 }
 0x252   : > { %v968_v2 = vmul.f32 %v5757_v59, %v967_v0  ;;  %v1028_v3 = vmul.f32 %v5759_v1, %v1026_v60  ;;  %vm1034_vm6 = vweird.f32 %v5759_v1 }
 0x253   : > { %vm1035_vm8 = vmor %vm1033_vm7, %vm1034_vm6 }
 0x254   : > { %v972_v5 = vsel %vm971_vm5, %v5757_v59, %v968_v2  ;;  %v1029_v6 = vmul.f32 %v5759_v1, %v1028_v3 }
 0x255   : > { %v973_v8 = vmul.f32 %v972_v5, %v956_v46 }
 0x256   : > { %v1030_v9 = vmul.f32 0.5, %v1029_v6 }
 0x257   : > { %v975_v10 = vmul.f32 %v5752_v4, %v973_v8 }
 0x258   : > { %v1031_v11 = vsub.f32 1.5, %v1030_v9 }
 0x259   : > { %v977_v12 = vadd.f32 %v5753_v7, %v975_v10 }
 0x25a   : > { %v1032_v13 = vmul.f32 %v5759_v1, %v1031_v11 }
 0x25b   : > { %978 = vst [vmem:[#allocation2] sm:$0x1f] %v977_v12 }
 0x25c   : > { %v1036_v14 = vsel %vm1035_vm8, %v5759_v1, %v1032_v13 }
 0x25d   : > { %v1037_v15 = vmul.f32 %v1036_v14, %v1020_v51 }
 0x25f   : > { %v1038_v16 = vmul.f32 %v5752_v4, %v1037_v15 }
 0x261   : > { %v1039_v17 = vadd.f32 %v5753_v7, %v1038_v16 }
 0x263   : > { %1041 = vst [vmem:[#allocation2 + $0x8] sm:$0x1f] %v1039_v17 }
 0x264 PF: > { %v6531_v18 = vld [vmem:[#allocation2] sm:$0x1f]  ;;  %vm1046_vm9 = vcmask 1044480   ;;  %v6177_v20 = vmov 128.0   ;;  %v4480_v21 = vld [vmem:[%s6511_s24 + $0xa8] sm:$0xf] }
 0x265   : > { %v1047_v19 = vsel %vm1046_vm9, %v6531_v18, 0.0  ;;  %5760 = vrcp.f32 %v6177_v20  ;;  %v5419_v22 = vld [vmem:[%s6511_s24 + $0xb0] sm:$0xf0]  ;;  %v5418_v23 = vld [vmem:[%s6511_s24 + $0xac] sm:$0xf]  ;;  %vm1289_vm14 = vcmask 261120  }
 0x266   : > { %1048 = vadd.xlane.f32.xlu0 %v1047_v19  ;;  %v4481_v24 = vor.u32 %v5419_v22, %v4480_v21  ;;  %v4482_v25 = vld [vmem:[%s6511_s24 + $0xb4] sm:$0xf0]  ;;  %v4488_v26 = vld [vmem:[%s6511_s24 + $0xb0] sm:$0xf]  ;;  %v5420_v27 = vld [vmem:[%s6511_s24 + $0xb8] sm:$0xf0] }
 0x267   : > { %v4485_v28 = vor.u32 %v5418_v23, %v4482_v25  ;;  %v4489_v29 = vor.u32 %v5420_v27, %v4488_v26  ;;  %v4468_v41 = vld [vmem:[%s6511_s24 + $0x90] sm:$0xf]  ;;  %v5416_v42 = vld [vmem:[%s6511_s24 + $0x98] sm:$0xf0]  ;;  %v5415_v43 = vld [vmem:[%s6511_s24 + $0x94] sm:$0xf] }
 0x268   : > { %1248 = vmatpush.bf16.msra.mxu0 %v4481_v24  ;;  %v4469_v44 = vor.u32 %v5416_v42, %v4468_v41  ;;  %v4470_v45 = vld [vmem:[%s6511_s24 + $0x9c] sm:$0xf0]  ;;  %v4476_v46 = vld [vmem:[%s6511_s24 + $0x98] sm:$0xf]  ;;  %v5417_v47 = vld [vmem:[%s6511_s24 + $0xa0] sm:$0xf0] }
 0x269   : > { %1261 = vmatpush.bf16.msra.mxu1 %v4485_v28  ;;  %1274 = vmatpush.bf16.msra.mxu2 %v4489_v29  ;;  %v4473_v48 = vor.u32 %v5415_v43, %v4470_v45  ;;  %v4477_v49 = vor.u32 %v5417_v47, %v4476_v46  ;;  %v4456_v50 = vld [vmem:[%s6511_s24 + $0x78] sm:$0xf]  ;;  %v5413_v51 = vld [vmem:[%s6511_s24 + $0x80] sm:$0xf0]  ;;  %v5412_v52 = vld [vmem:[%s6511_s24 + $0x7c] sm:$0xf] }
 0x26a   : > { %v4457_v53 = vor.u32 %v5413_v51, %v4456_v50  ;;  %v4458_v54 = vld [vmem:[%s6511_s24 + $0x84] sm:$0xf0]  ;;  %v4464_v55 = vld [vmem:[%s6511_s24 + $0x80] sm:$0xf]  ;;  %v5414_v56 = vld [vmem:[%s6511_s24 + $0x88] sm:$0xf0] }
 0x26b   : > { %v5761_v30 = vpop.eup %5760  ;;  %v4461_v57 = vor.u32 %v5412_v52, %v4458_v54  ;;  %v4465_v58 = vor.u32 %v5414_v56, %v4464_v55  ;;  %v4444_v59 = vld [vmem:[%s6511_s24 + $0x60] sm:$0xf]  ;;  %v5410_v60 = vld [vmem:[%s6511_s24 + $0x68] sm:$0xf0]  ;;  %v5409_v61 = vld [vmem:[%s6511_s24 + $0x64] sm:$0xf] }
 0x26c   : > { %v1051_v31 = vmul.f32 128.0, %v5761_v30  ;;  %vm1055_vm10 = vweird.f32 %v5761_v30  ;;  %1249 = vmatpush.bf16.msra.mxu0 %v4469_v44  ;;  %v4445_v62 = vor.u32 %v5410_v60, %v4444_v59  ;;  %v4446_v63 = vld [vmem:[%s6511_s24 + $0x6c] sm:$0xf0]  ;;  %v4452_v0 = vld [vmem:[%s6511_s24 + $0x68] sm:$0xf]  ;;  %vm1327_vm15 = vcmask 1041408  }
 0x26d   : > { %1262 = vmatpush.bf16.msra.mxu1 %v4473_v48  ;;  %1275 = vmatpush.bf16.msra.mxu2 %v4477_v49  ;;  %v5411_v1 = vld [vmem:[%s6511_s24 + $0x70] sm:$0xf0]  ;;  %v4449_v2 = vor.u32 %v5409_v61, %v4446_v63  ;;  %v4432_v4 = vld [vmem:[%s6511_s24 + $0x48] sm:$0xf]  ;;  %v5406_v6 = vld [vmem:[%s6511_s24 + $0x4c] sm:$0xf] }
 0x26e   : > { %v1052_v32 = vsub.f32 1.0, %v1051_v31  ;;  %v4453_v3 = vor.u32 %v5411_v1, %v4452_v0  ;;  %v5407_v5 = vld [vmem:[%s6511_s24 + $0x50] sm:$0xf0]  ;;  %v4434_v8 = vld [vmem:[%s6511_s24 + $0x54] sm:$0xf0]  ;;  %s6178_s12 = smov 64  }
 0x26f   : > { %v4433_v7 = vor.u32 %v5407_v5, %v4432_v4  ;;  %v4440_v9 = vld [vmem:[%s6511_s24 + $0x50] sm:$0xf]  ;;  %v5408_v10 = vld [vmem:[%s6511_s24 + $0x58] sm:$0xf0]  ;;  %v4437_v11 = vor.u32 %v5406_v6, %v4434_v8  ;;  %v5403_v15 = vld [vmem:[%s6511_s24 + $0x34] sm:$0xf] }
 0x270   : > { %v1053_v33 = vmul.f32 %v5761_v30, %v1052_v32  ;;  %1250 = vmatpush.bf16.msra.mxu0 %v4457_v53  ;;  %v4441_v12 = vor.u32 %v5408_v10, %v4440_v9  ;;  %v4420_v13 = vld [vmem:[%s6511_s24 + $0x30] sm:$0xf]  ;;  %v5404_v14 = vld [vmem:[%s6511_s24 + $0x38] sm:$0xf0]  ;;  %v4422_v17 = vld [vmem:[%s6511_s24 + $0x3c] sm:$0xf0] }
 0x271   : > { %1263 = vmatpush.bf16.msra.mxu1 %v4461_v57  ;;  %1276 = vmatpush.bf16.msra.mxu2 %v4465_v58  ;;  %v4421_v16 = vor.u32 %v5404_v14, %v4420_v13  ;;  %v4428_v19 = vld [vmem:[%s6511_s24 + $0x38] sm:$0xf]  ;;  %v5405_v20 = vld [vmem:[%s6511_s24 + $0x40] sm:$0xf0]  ;;  %v4425_v21 = vor.u32 %v5403_v15, %v4422_v17  ;;  %v5400_v25 = vld [vmem:[%s6511_s24 + $0x1c] sm:$0xf] }
 0x272   : > { %v1054_v34 = vadd.f32 %v5761_v30, %v1053_v33  ;;  %v4429_v22 = vor.u32 %v5405_v20, %v4428_v19  ;;  %v4408_v23 = vld [vmem:[%s6511_s24 + $0x18] sm:$0xf]  ;;  %v5401_v24 = vld [vmem:[%s6511_s24 + $0x20] sm:$0xf0]  ;;  %v4410_v27 = vld [vmem:[%s6511_s24 + $0x24] sm:$0xf0] }
 0x273   : > { %v4409_v26 = vor.u32 %v5401_v24, %v4408_v23  ;;  %v4416_v28 = vld [vmem:[%s6511_s24 + $0x20] sm:$0xf]  ;;  %v5402_v29 = vld [vmem:[%s6511_s24 + $0x28] sm:$0xf0]  ;;  %v6604_v60 = vld [vmem:[%s6479_s30] sm:$0x7] }
 0x274   : > { %v6541_v35 = vsel %vm1055_vm10, %v5761_v30, %v1054_v34  ;;  %1251 = vmatpush.bf16.msra.mxu0 %v4445_v62  ;;  %v4413_v30 = vor.u32 %v5400_v25, %v4410_v27  ;;  %v4417_v31 = vor.u32 %v5402_v29, %v4416_v28  ;;  %v4396_v32 = vld [vmem:[%s6511_s24] sm:$0xf]  ;;  %v5398_v33 = vld [vmem:[%s6511_s24 + $0x8] sm:$0xf0]  ;;  %v5397_v34 = vld [vmem:[%s6511_s24 + $0x4] sm:$0xf] }
 0x275   : > { %1264 = vmatpush.bf16.msra.mxu1 %v4449_v2  ;;  %1277 = vmatpush.bf16.msra.mxu2 %v4453_v3  ;;  %v6594_v51 = vld [vmem:[%s6506_s27] sm:$0x3f]  ;;  %v1115_v61 = vperm.slane %v6604_v60, 1  ;;  %v1114_v0 = vperm.slane %v6604_v60, 0  ;;  %v1116_v2 = vperm.slane %v6604_v60, 2  ;;  %s6179_s21 = smov 96  }
 0x276   : > { %v1076_v53 = vperm.slane %v6594_v51, 0  ;;  %v1078_v56 = vperm.slane %v6594_v51, 1  ;;  %vm1328_vm0 = vcmask 1042432   ;;  %v6180_v4 = vmov 65535   ;;  %s6181_s30 = smov 32   ;;  %p5186_p1 = scmp.ne.s32.totalorder %s6292_s28, 1 }
 0x277   : > { %v1329_v5 = vsel %vm1327_vm15, 4294967295, %v6180_v4  ;;  %vm1309_vm1 = vcmask 36864   ;;  %vm1323_vm2 = vcmask 39936   ;;  %vm1531_vm3 = vcmask 523264  }
 0x278   : > { %1252 = vmatpush.bf16.msra.mxu0 %v4433_v7  ;;  %vm1533_vm4 = vcmask 785408  }
 0x279   : > { %1265 = vmatpush.bf16.msra.mxu1 %v4437_v11  ;;  %1278 = vmatpush.bf16.msra.mxu2 %v4441_v12  ;;  %v6618_v11 = vsel %vm1328_vm0, %v1329_v5, 0 }
 0x27c   : > { %1253 = vmatpush.bf16.msra.mxu0 %v4421_v16 }
 0x27d   : > { %1266 = vmatpush.bf16.msra.mxu1 %v4425_v21  ;;  %1279 = vmatpush.bf16.msra.mxu2 %v4429_v22 }
 0x280   : > { %1254 = vmatpush.bf16.msra.mxu0 %v4409_v26 }
 0x281   : > { %1267 = vmatpush.bf16.msra.mxu1 %v4413_v30  ;;  %1280 = vmatpush.bf16.msra.mxu2 %v4417_v31 }
 0x2d9   : > { %v1049_v36 = vpop.xlane.xlu0 %1048 }
 0x2da   : > { %v1057_v37 = vmul.f32 %v6541_v35, %v1049_v36  ;;  %v4397_v36 = vor.u32 %v5398_v33, %v4396_v32 }
 0x2dc   : > { %v6545_v38 = vsub.f32 %v6531_v18, %v1057_v37  ;;  %v4398_v37 = vld [vmem:[%s6511_s24 + $0xc] sm:$0xf0]  ;;  %1255 = vmatpush.bf16.msra.mxu0 %v4397_v36 }
 0x2dd   : > { %v4401_v41 = vor.u32 %v5397_v34, %v4398_v37 }
 0x2de   : > { %v1059_v39 = vmul.f32 %v6545_v38, %v6545_v38 }
 0x2df   : > { %1268 = vmatpush.bf16.msra.mxu1 %v4401_v41 }
 0x2e0   : > { %v1060_v40 = vsel %vm1046_vm9, %v1059_v39, 0.0  ;;  %v4404_v39 = vld [vmem:[%s6511_s24 + $0x8] sm:$0xf] }
 0x2e1   : > { %1061 = vadd.xlane.f32.xlu0 %v1060_v40  ;;  %v5399_v40 = vld [vmem:[%s6511_s24 + $0x10] sm:$0xf0] }
 0x2e2   : > { %v4405_v42 = vor.u32 %v5399_v40, %v4404_v39 }
 0x2e4   : > { %1281 = vmatpush.bf16.msra.mxu2 %v4405_v42 }
 0x354   : > { %v1062_v43 = vpop.xlane.xlu0 %1061 }
 0x355   : > { %v1063_v44 = vmul.f32 %v1062_v43, %v6541_v35 }
 0x357   : > { %v1064_v45 = vadd.f32 1e-05, %v1063_v44 }
 0x359   : > { %5762 = vrsqrt.f32 %v1064_v45  ;;  %vm1071_vm12 = vweird.f32 %v1064_v45 }
 0x35f   : > { %v5763_v46 = vpop.eup %5762 }
 0x360   : > { %v1066_v47 = vmul.f32 %v5763_v46, %v1064_v45  ;;  %vm1072_vm11 = vweird.f32 %v5763_v46 }
 0x361   : > { %vm1073_vm13 = vmor %vm1071_vm12, %vm1072_vm11 }
 0x362   : > { %v1067_v48 = vmul.f32 %v5763_v46, %v1066_v47 }
 0x364   : > { %v1068_v49 = vmul.f32 0.5, %v1067_v48 }
 0x366   : > { %v1069_v50 = vsub.f32 1.5, %v1068_v49 }
 0x368   : > { %v1070_v52 = vmul.f32 %v5763_v46, %v1069_v50 }
 0x36a   : > { %v1074_v54 = vsel %vm1073_vm13, %v5763_v46, %v1070_v52 }
 0x36b   : > { %v1075_v55 = vmul.f32 %v1074_v54, %v6545_v38 }
 0x36d   : > { %v1077_v57 = vmul.f32 %v1076_v53, %v1075_v55 }
 0x36f   : > { %v1079_v58 = vadd.f32 %v1078_v56, %v1077_v57 }
 0x371   : > { %v1080_v59 = vpack.c.bf16 %v1079_v58, %v1079_v58 }
 0x373   : > { %1256 = vmatmul.bf16.vlgmr.msra.gmra.mxu0 %v1080_v59  ;;  %1269 = vmatmul.bf16.vlgmr.msra.gmra.mxu1 %v1080_v59 }
 0x374   : > { %1282 = vmatmul.bf16.vlgmr.msra.gmra.mxu2 %v1080_v59 }
 0x3f0   : > { %v1257_v62 = vpop.f32.mrf.mxu0  ;;  %v1270_v63 = vpop.f32.mrf.mxu1 }
 0x3f1   : > { %v1271_v38 = vadd.f32 %v1270_v63, %v1115_v61  ;;  %v1258_v6 = vadd.f32 %v1257_v62, %v1114_v0 }
 0x3f3   : > { %v1288_v1 = vpack.c.bf16 %v1271_v38, %v1271_v38  ;;  %v1287_v13 = vpack.c.bf16 %v1258_v6, %v1258_v6 }
 0x3f5   : > { %1408 = vrot.lane.b32.xlu0 %v1288_v1, %s6178_s12  ;;  %1351 = vrot.lane.b32.xlu2 %v1288_v1, %s6179_s21  ;;  %v1294_v3 = vsel %vm1289_vm14, %v1288_v1, 0 }
 0x3f6   : > { %1303 = vmatpush.bf16.xpose.msra.mxu3 %v1294_v3 }
 0x3f7   : > { %v1283_v7 = vpop.f32.mrf.mxu2 }
 0x3f8   : > { %v1284_v8 = vadd.f32 %v1283_v7, %v1116_v2  ;;  %v1259_v9 = vpop.f32.mrf.mxu0  ;;  %v1272_v10 = vpop.f32.mrf.mxu1 }
 0x3fa   : > { %v6620_v12 = vpack.c.bf16 %v1284_v8, %v1284_v8 }
 0x3fc   : > { %v1332_v14 = vand.u32 %v6618_v11, %v6620_v12 }
 0x3fd   : > { %1348 = vrot.lane.b32.xlu2 %v1287_v13, %s6179_s21  ;;  %4490 = vmatmul.msk.bf16.vlgmr.msra.gmra.mxu3 %vm1289_vm14, %v1287_v13 }
 0x3fe   : > { %1341 = vmatpush.bf16.msrb.mxu3 %v1332_v14 }
 0x3ff   : > { %v1285_v15 = vpop.f32.mrf.mxu2 }
 0x405   : > { %1406 = vrot.lane.b32.xlu2 %v1287_v13, %s6178_s12 }
 0x40d   : > { %1462 = vrot.lane.b32.xlu2 %v1287_v13, %s6181_s30 }
 0x44f   : > { %v1352_v16 = vpop.permute.xlu2 %1351 }
 0x450   : > { %v1357_v17 = vsel %vm1289_vm14, %v1352_v16, 0 }
 0x451   : > { %1366 = vmatpush.bf16.xpose.msra.mxu3 %v1357_v17 }
 0x457   : > { %v1349_v19 = vpop.permute.xlu2 %1348 }
 0x45f   : > { %v1407_v22 = vpop.permute.xlu2 %1406 }
 0x467   : > { %v1409_v20 = vpop.permute.xlu0 %1408  ;;  %v1463_v45 = vpop.permute.xlu2 %1462 }
 0x468   : > { %v1414_v21 = vsel %vm1289_vm14, %v1409_v20, 0 }
 0x469   : > { %1423 = vmatpush.bf16.xpose.msrb.mxu2 %v1414_v21 }
 0x470   : > { %4494 = vmatmul.msk.bf16.vlgmr.msrb.gmra.mxu2 %vm1289_vm14, %v1407_v22 }
 0x480   : > { %v1305_v23 = vpop.f32.mrf.mxu3 }
 0x481   : > { %v1310_v24 = vsel %vm1309_vm1, %v1305_v23, -inf }
 0x482   : > { %1311 = vmax.xlane.f32.xlu1 %v1310_v24 }
 0x488   : > { %v1307_v25 = vpop.f32.mrf.mxu3 }
 0x4f3   : > { %v1425_v26 = vpop.f32.mrf.mxu2 }
 0x4f4   : > { %v1429_v27 = vsel %vm1309_vm1, %v1425_v26, -inf }
 0x4f5   : > { %1430 = vmax.xlane.f32.xlu0 %v1429_v27  ;;  %v1312_v28 = vpop.xlane.xlu1 %1311 }
 0x4f6   : > { %v1313_v29 = vsub.f32 %v1305_v23, %v1312_v28 }
 0x4f8   : > { %v1314_v30 = vmul.f32 1.442695, %v1313_v29 }
 0x4fa   : > { %5764 = vpow2.f32 %v1314_v30  ;;  %v5428_v30 = vld [vmem:[%s6485_s7 + $0x38] sm:$0xff] }
 0x4fb   : > { %v1427_v31 = vpop.f32.mrf.mxu2  ;;  %1601 = vmatpush.bf16.msrb.mxu1 %v5428_v30  ;;  %v5456_v30 = vld [vmem:[%s6487_s16 + $0xd4] sm:$0xf0] }
 0x4fc   : > { %v5427_v31 = vld [vmem:[%s6485_s7 + $0x30] sm:$0xff] }
 0x4ff   : > { %1602 = vmatpush.bf16.msrb.mxu1 %v5427_v31 }
 0x500   : > { %v5765_v32 = vpop.eup %5764 }
 0x501   : > { %v1316_v33 = vsel %vm1309_vm1, %v5765_v32, 0.0 }
 0x502   : > { %1317 = vadd.xlane.f32.xlu1 %v1316_v33  ;;  %v5426_v33 = vld [vmem:[%s6485_s7 + $0x28] sm:$0xff] }
 0x503   : > { %1603 = vmatpush.bf16.msrb.mxu1 %v5426_v33  ;;  %v5454_v33 = vld [vmem:[%s6487_s16 + $0xcc] sm:$0xf] }
 0x509   : > { %1385 = vrot.lane.b32.xlu0 %v6620_v12, %s6179_s21 }
 0x51b   : > { %1464 = vrot.lane.b32.xlu1 %v1288_v1, %s6181_s30 }
 0x568   : > { %v1431_v34 = vpop.xlane.xlu0 %1430 }
 0x569   : > { %v1432_v47 = vsub.f32 %v1425_v26, %v1431_v34 }
 0x56b   : > { %v1433_v49 = vmul.f32 1.442695, %v1432_v47 }
 0x575   : > { %v1318_v36 = vpop.xlane.xlu1 %1317 }
 0x576   : > { %5766 = vrcp.f32 %v1318_v36 }
 0x577   : > { %5768 = vpow2.f32 %v1433_v49 }
 0x57b   : > { %v1386_v37 = vpop.permute.xlu0 %1385 }
 0x57c   : > { %v5767_v39 = vpop.eup %5766  ;;  %v1391_v40 = vand.u32 %v1386_v37, %v6618_v11 }
 0x57d   : > { %v1320_v41 = vmul.f32 %v5767_v39, %v5765_v32  ;;  %v5769_v54 = vpop.eup %5768  ;;  %v5425_v39 = vld [vmem:[%s6485_s7 + $0x20] sm:$0xff] }
 0x57e   : > { %1400 = vmatpush.bf16.msrb.mxu0 %v1391_v40  ;;  %v1435_v57 = vsel %vm1309_vm1, %v5769_v54, 0.0  ;;  %1604 = vmatpush.bf16.msrb.mxu1 %v5425_v39  ;;  %v5424_v40 = vld [vmem:[%s6485_s7 + $0x18] sm:$0xff]  ;;  %v5451_v39 = vld [vmem:[%s6487_s16 + $0xac] sm:$0xf0] }
 0x57f   : > { %v1321_v42 = vpack.c.bf16 %v1320_v41, %v1320_v41  ;;  %v5423_v41 = vld [vmem:[%s6485_s7 + $0x10] sm:$0xff] }
 0x581   : > { %4491 = vmatmul.msk.bf16.vlgmr.msrb.gmra.mxu3 %vm1323_vm2, %v1321_v42  ;;  %v5422_v42 = vld [vmem:[%s6485_s7 + $0x8] sm:$0xff] }
 0x582   : > { %1605 = vmatpush.bf16.msrb.mxu1 %v5424_v40  ;;  %v5449_v40 = vld [vmem:[%s6487_s16 + $0xa4] sm:$0xf] }
 0x586   : > { %1606 = vmatpush.bf16.msrb.mxu1 %v5423_v41 }
 0x58a   : > { %1607 = vmatpush.bf16.msrb.mxu1 %v5422_v42  ;;  %v4614_v42 = vld [vmem:[%s6487_s16 + $0xb0] sm:$0xf0] }
 0x58d   : > { %v1465_v43 = vpop.permute.xlu1 %1464 }
 0x58e   : > { %v1470_v44 = vsel %vm1289_vm14, %v1465_v43, 0  ;;  %v5421_v43 = vld [vmem:[%s6485_s7] sm:$0xff] }
 0x58f   : > { %1479 = vmatpush.bf16.xpose.msrb.mxu3 %v1470_v44  ;;  %1608 = vmatpush.bf16.msrb.mxu1 %v5421_v43  ;;  %v4620_v43 = vld [vmem:[%s6487_s16 + $0xa8] sm:$0xf] }
 0x591   : > { %4492 = vmatmul.msk.bf16.vlgmr.msra.gmra.mxu3 %vm1289_vm14, %v1349_v19 }
 0x5a1   : > { %4496 = vmatmul.msk.bf16.vlgmr.msrb.gmra.mxu3 %vm1289_vm14, %v1463_v45 }
 0x604   : > { %v6642_v46 = vpop.f32.mrf.mxu3 }
 0x60c   : > { %v1345_v48 = vpop.f32.mrf.mxu3 }
 0x614   : > { %v1368_v50 = vpop.f32.mrf.mxu3 }
 0x615   : > { %v1372_v52 = vsel %vm1309_vm1, %v1368_v50, -inf }
 0x616   : > { %1373 = vmax.xlane.f32.xlu2 %v1372_v52 }
 0x61c   : > { %v1370_v55 = vpop.f32.mrf.mxu3 }
 0x61e   : > { %1436 = vadd.xlane.f32.xlu2 %v1435_v57  ;;  %v1552_v57 = vperm.slane %v6594_v51, 2 }
 0x624   : > { %v1481_v58 = vpop.f32.mrf.mxu3 }
 0x625   : > { %v1485_v59 = vsel %vm1309_vm1, %v1481_v58, -inf }
 0x626   : > { %1486 = vmax.xlane.f32.xlu1 %v1485_v59 }
 0x62c   : > { %v1483_v62 = vpop.f32.mrf.mxu3 }
 0x63f   : > { %1441 = vrot.lane.b32.xlu1 %v6620_v12, %s6178_s12 }
 0x689   : > { %v1374_v63 = vpop.xlane.xlu2 %1373 }
 0x68a   : > { %v1375_v38 = vsub.f32 %v1368_v50, %v1374_v63 }
 0x68c   : > { %v1376_v1 = vmul.f32 1.442695, %v1375_v38 }
 0x68e   : > { %5770 = vpow2.f32 %v1376_v1  ;;  %v4644_v1 = vld [vmem:[%s6487_s16 + $0xe0] sm:$0xf] }
 0x691   : > { %v1437_v9 = vpop.xlane.xlu2 %1436 }
 0x694   : > { %v5771_v3 = vpop.eup %5770 }
 0x695   : > { %v1378_v4 = vsel %vm1309_vm1, %v5771_v3, 0.0 }
 0x696   : > { %1379 = vadd.xlane.f32.xlu2 %v1378_v4  ;;  %v5457_v4 = vld [vmem:[%s6487_s16 + $0xe4] sm:$0xf] }
 0x699   : > { %v1487_v5 = vpop.xlane.xlu1 %1486 }
 0x69a   : > { %v1488_v6 = vsub.f32 %v1481_v58, %v1487_v5 }
 0x69c   : > { %v1489_v7 = vmul.f32 1.442695, %v1488_v6 }
 0x69e   : > { %5772 = vpow2.f32 %v1489_v7  ;;  %v4646_v7 = vld [vmem:[%s6487_s16 + $0xf0] sm:$0xf0] }
 0x69f   : > { %5774 = vrcp.f32 %v1437_v9  ;;  %v5460_v9 = vld [vmem:[%s6487_s16 + $0xf4] sm:$0xf0] }
 0x6a4   : > { %v5773_v8 = vpop.eup %5772 }
 0x6a5   : > { %v1491_v10 = vsel %vm1309_vm1, %v5773_v8, 0.0  ;;  %v5775_v13 = vpop.eup %5774 }
 0x6a6   : > { %1492 = vadd.xlane.f32.xlu2 %v1491_v10  ;;  %v1439_v14 = vmul.f32 %v5775_v13, %v5769_v54  ;;  %v2295_v54 = vld [vmem:[#allocation2 + $0x8] sm:$0x1f]  ;;  %v4649_v10 = vor.u32 %v5457_v4, %v4646_v7  ;;  %v4606_v4 = vld [vmem:[%s6487_s16 + $0x98] sm:$0xf0]  ;;  %v5443_v7 = vld [vmem:[%s6487_s16 + $0x6c] sm:$0xf0] }
 0x6a7   : > { %v2296_v55 = vsel %vm1046_vm9, %v2295_v54, 0.0 }
 0x6a8   : > { %v1440_v17 = vpack.c.bf16 %v1439_v14, %v1439_v14  ;;  %v4654_v14 = vld [vmem:[%s6487_s16 + $0xf8] sm:$0xf0]  ;;  %1856 = vmatpush.bf16.msra.mxu3 %v4649_v10  ;;  %v4582_v10 = vld [vmem:[%s6487_s16 + $0x70] sm:$0xf0] }
 0x6b1   : > { %v1442_v15 = vpop.permute.xlu1 %1441 }
 0x6b2   : > { %v1447_v16 = vand.u32 %v1442_v15, %v6618_v11 }
 0x6b4   : > { %1456 = vmatpush.bf16.msra.mxu2 %v1447_v16 }
 0x6b7   : > { %4495 = vmatmul.msk.bf16.vlgmr.msra.gmra.mxu2 %vm1323_vm2, %v1440_v17 }
 0x6be   : > { %1497 = vrot.lane.b32.xlu2 %v6620_v12, %s6181_s30 }
 0x6e7   : > { %2297 = vadd.xlane.f32.xlu2 %v2296_v55  ;;  %v5445_v55 = vld [vmem:[%s6487_s16 + $0x84] sm:$0xf] }
 0x709   : > { %v1380_v19 = vpop.xlane.xlu2 %1379 }
 0x70a   : > { %5776 = vrcp.f32 %v1380_v19 }
 0x710   : > { %v5777_v20 = vpop.eup %5776 }
 0x711   : > { %v1382_v21 = vmul.f32 %v5777_v20, %v5771_v3  ;;  %v5459_v3 = vld [vmem:[%s6487_s16 + $0xec] sm:$0xf0] }
 0x712   : > { %v4645_v6 = vor.u32 %v5459_v3, %v4644_v1  ;;  %v5446_v3 = vld [vmem:[%s6487_s16 + $0x8c] sm:$0xf] }
 0x713   : > { %v1383_v22 = vpack.c.bf16 %v1382_v21, %v1382_v21 }
 0x714   : > { %1843 = vmatpush.bf16.msrb.mxu2 %v4645_v6  ;;  %v4580_v6 = vld [vmem:[%s6487_s16 + $0x60] sm:$0xf] }
 0x715   : > { %4493 = vmatmul.msk.bf16.vlgmr.msrb.gmra.mxu0 %vm1323_vm2, %v1383_v22 }
 0x719   : > { %v1493_v23 = vpop.xlane.xlu2 %1492 }
 0x71a   : > { %5778 = vrcp.f32 %v1493_v23 }
 0x720   : > { %v5779_v24 = vpop.eup %5778 }
 0x721   : > { %v1495_v25 = vmul.f32 %v5779_v24, %v5773_v8  ;;  %v1498_v26 = vpop.permute.xlu2 %1497  ;;  %v4652_v8 = vld [vmem:[%s6487_s16 + $0xe8] sm:$0xf] }
 0x722   : > { %v1503_v27 = vand.u32 %v1498_v26, %v6618_v11  ;;  %v4653_v13 = vor.u32 %v5460_v9, %v4652_v8  ;;  %v5455_v26 = vld [vmem:[%s6487_s16 + $0xcc] sm:$0xf0]  ;;  %v5441_v8 = vld [vmem:[%s6487_s16 + $0x64] sm:$0xf]  ;;  %v4581_v9 = vor.u32 %v5443_v7, %v4580_v6 }
 0x723   : > { %v1496_v28 = vpack.c.bf16 %v1495_v25, %v1495_v25  ;;  %v4628_v25 = vld [vmem:[%s6487_s16 + $0xc0] sm:$0xf] }
 0x724   : > { %1512 = vmatpush.bf16.msra.mxu0 %v1503_v27  ;;  %v5453_v27 = vld [vmem:[%s6487_s16 + $0xc4] sm:$0xf] }
 0x725   : > { %v5476_v7 = vld [vmem:[%s6491_s17 + $0x78] sm:$0xff] }
 0x727   : > { %4497 = vmatmul.msk.bf16.vlgmr.msra.gmra.mxu0 %vm1323_vm2, %v1496_v28  ;;  %v4629_v28 = vor.u32 %v5455_v26, %v4628_v25  ;;  %v4566_v26 = vld [vmem:[%s6487_s16 + $0x50] sm:$0xf0] }
 0x728   : > { %1869 = vmatpush.bf16.msrb.mxu0 %v4653_v13  ;;  %v4588_v13 = vld [vmem:[%s6487_s16 + $0x68] sm:$0xf] }
 0x729   : > { %1844 = vmatpush.bf16.msrb.mxu2 %v4629_v28  ;;  %v5440_v28 = vld [vmem:[%s6487_s16 + $0x54] sm:$0xf0] }
 0x73a   : > { %v1458_v12 = vpop.f32.mrf.mxu2 }
 0x742   : > { %v1460_v29 = vpop.f32.mrf.mxu2 }
 0x743   : > { %v4636_v29 = vld [vmem:[%s6487_s16 + $0xc8] sm:$0xf] }
 0x75a   : > { %v2298_v38 = vpop.xlane.xlu2 %2297 }
 0x75b   : > { %v2299_v5 = vmul.f32 %v2298_v38, %v6541_v35 }
 0x75d   : > { %v6691_v15 = vsub.f32 %v2295_v54, %v2299_v5  ;;  %v5447_v54 = vld [vmem:[%s6487_s16 + $0x8c] sm:$0xf0]  ;;  %v4609_v5 = vor.u32 %v5446_v3, %v4606_v4  ;;  %v5484_v4 = vld [vmem:[%s6491_s17 + $0xb8] sm:$0xff] }
 0x75f   : > { %v2301_v17 = vmul.f32 %v6691_v15, %v6691_v15 }
 0x761   : > { %v2302_v19 = vsel %vm1046_vm9, %v2301_v17, 0.0  ;;  %v5442_v17 = vld [vmem:[%s6487_s16 + $0x6c] sm:$0xf] }
 0x792   : > { %v1402_v32 = vpop.f32.mrf.mxu0 }
 0x793   : > { %1519 = vrot.lane.b32.xlu0 %v1402_v32, %s6181_s30  ;;  %v4637_v32 = vor.u32 %v5456_v30, %v4636_v29  ;;  %v5438_v30 = vld [vmem:[%s6487_s16 + $0x4c] sm:$0xf] }
 0x795   : > { %1870 = vmatpush.bf16.msrb.mxu0 %v4637_v32 }
 0x79a   : > { %v1404_v34 = vpop.f32.mrf.mxu0 }
 0x79b   : > { %1523 = vrot.lane.b32.xlu0 %v1458_v12, %s6178_s12  ;;  %v4630_v12 = vld [vmem:[%s6487_s16 + $0xd0] sm:$0xf0]  ;;  %v4638_v34 = vld [vmem:[%s6487_s16 + $0xd8] sm:$0xf0] }
 0x79c   : > { %v4633_v31 = vor.u32 %v5453_v27, %v4630_v12  ;;  %v4572_v27 = vld [vmem:[%s6487_s16 + $0x48] sm:$0xf] }
 0x79d   : > { %v4573_v29 = vor.u32 %v5440_v28, %v4572_v27  ;;  %v5482_v27 = vld [vmem:[%s6491_s17 + $0xa8] sm:$0xff]  ;;  %v5475_v28 = vld [vmem:[%s6491_s17 + $0x70] sm:$0xff] }
 0x79e   : > { %1857 = vmatpush.bf16.msra.mxu3 %v4633_v31  ;;  %v4574_v31 = vld [vmem:[%s6487_s16 + $0x58] sm:$0xf0] }
 0x79f   : > { %v4577_v32 = vor.u32 %v5438_v30, %v4574_v31  ;;  %v5466_v30 = vld [vmem:[%s6491_s17 + $0x28] sm:$0xff] }
 0x7a0   : > { %v5474_v31 = vld [vmem:[%s6491_s17 + $0x68] sm:$0xff] }
 0x7a4   : > { %v1514_v36 = vpop.f32.mrf.mxu0 }
 0x7a5   : > { %1527 = vrot.lane.b32.xlu1 %v1514_v36, %s6179_s21  ;;  %v4641_v36 = vor.u32 %v5454_v33, %v4638_v34  ;;  %v4548_v33 = vld [vmem:[%s6487_s16 + $0x20] sm:$0xf]  ;;  %v5435_v34 = vld [vmem:[%s6487_s16 + $0x2c] sm:$0xf0] }
 0x7ac   : > { %v1516_v37 = vpop.f32.mrf.mxu0 }
 0x7ad   : > { %v4612_v37 = vld [vmem:[%s6487_s16 + $0xa0] sm:$0xf] }
 0x7ae   : > { %v4613_v41 = vor.u32 %v5451_v39, %v4612_v37  ;;  %v4549_v37 = vor.u32 %v5435_v34, %v4548_v33  ;;  %v4550_v39 = vld [vmem:[%s6487_s16 + $0x30] sm:$0xf0]  ;;  %v5491_v33 = vld [vmem:[%s6491_s17 + $0xf0] sm:$0xff]  ;;  %v5465_v34 = vld [vmem:[%s6491_s17 + $0x20] sm:$0xff] }
 0x7b0   : > { %1845 = vmatpush.bf16.msrb.mxu2 %v4613_v41  ;;  %v5436_v41 = vld [vmem:[%s6487_s16 + $0x34] sm:$0xf0] }
 0x805   : > { %v1520_v44 = vpop.permute.xlu0 %1519 }
 0x806   : > { %v1530_v47 = vsel %vm1289_vm14, %v6642_v46, %v1520_v44  ;;  %v5452_v44 = vld [vmem:[%s6487_s16 + $0xb4] sm:$0xf0] }
 0x80d   : > { %v1524_v45 = vpop.permute.xlu0 %1523 }
 0x80e   : > { %v1532_v48 = vsel %vm1531_vm3, %v1530_v47, %v1524_v45  ;;  %v4617_v45 = vor.u32 %v5449_v40, %v4614_v42  ;;  %v4621_v47 = vor.u32 %v5452_v44, %v4620_v43  ;;  %v4556_v40 = vld [vmem:[%s6487_s16 + $0x28] sm:$0xf]  ;;  %v5434_v44 = vld [vmem:[%s6487_s16 + $0x2c] sm:$0xf] }
 0x80f   : > { %v4557_v43 = vor.u32 %v5436_v41, %v4556_v40  ;;  %v5464_v40 = vld [vmem:[%s6491_s17 + $0x18] sm:$0xff] }
 0x810   : > { %1858 = vmatpush.bf16.msra.mxu3 %v4617_v45  ;;  %1871 = vmatpush.bf16.msrb.mxu0 %v4621_v47  ;;  %v4558_v45 = vld [vmem:[%s6487_s16 + $0x38] sm:$0xf0]  ;;  %v4532_v47 = vld [vmem:[%s6487_s16] sm:$0xf] }
 0x811   : > { %v5472_v41 = vld [vmem:[%s6491_s17 + $0x58] sm:$0xff] }
 0x817   : > { %v1528_v49 = vpop.permute.xlu1 %1527 }
 0x818   : > { %v1534_v50 = vsel %vm1533_vm4, %v1532_v48, %v1528_v49  ;;  %v5450_v48 = vld [vmem:[%s6487_s16 + $0xac] sm:$0xf]  ;;  %v4622_v49 = vld [vmem:[%s6487_s16 + $0xb8] sm:$0xf0] }
 0x819   : > { %v1535_v52 = vpack.c.bf16 %v1534_v50, %v1534_v50  ;;  %v4625_v50 = vor.u32 %v5450_v48, %v4622_v49  ;;  %v4561_v48 = vor.u32 %v5434_v44, %v4558_v45  ;;  %v5431_v49 = vld [vmem:[%s6487_s16 + $0xc] sm:$0xf0]  ;;  %v5463_v44 = vld [vmem:[%s6491_s17 + $0x10] sm:$0xff] }
 0x81a   : > { %v5471_v45 = vld [vmem:[%s6491_s17 + $0x50] sm:$0xff] }
 0x81b   : > { %1609 = vmatmul.bf16.vlgmr.msrb.gmra.mxu1 %v1535_v52  ;;  %v4596_v52 = vld [vmem:[%s6487_s16 + $0x80] sm:$0xf] }
 0x898   : > { %v1610_v46 = vpop.f32.mrf.mxu1 }
 0x899   : > { %v1611_v58 = vadd.f32 %v1610_v46, %v1552_v57  ;;  %v4597_v46 = vor.u32 %v5447_v54, %v4596_v52  ;;  %v4534_v52 = vld [vmem:[%s6487_s16 + $0x10] sm:$0xf0]  ;;  %v4533_v54 = vor.u32 %v5431_v49, %v4532_v47  ;;  %v5477_v47 = vld [vmem:[%s6491_s17 + $0x80] sm:$0xff]  ;;  %v5516_v49 = vld [vmem:[%s6511_s24 + $0xb8] sm:$0xf0] }
 0x89b   : > { %v6678_v59 = vadd.f32 %v1611_v58, %v6531_v18  ;;  %v5458_v18 = vld [vmem:[%s6487_s16 + $0xec] sm:$0xf]  ;;  %v4598_v58 = vld [vmem:[%s6487_s16 + $0x90] sm:$0xf0]  ;;  %1846 = vmatpush.bf16.msrb.mxu2 %v4597_v46  ;;  %v4540_v46 = vld [vmem:[%s6487_s16 + $0x8] sm:$0xf] }
 0x89c   : > { %v4657_v16 = vor.u32 %v5458_v18, %v4654_v14  ;;  %v4601_v38 = vor.u32 %v5445_v55, %v4598_v58  ;;  %v5444_v18 = vld [vmem:[%s6487_s16 + $0x74] sm:$0xf0]  ;;  %v4585_v14 = vor.u32 %v5441_v8, %v4582_v10 }
 0x89d   : > { %v1615_v62 = vsel %vm1046_vm9, %v6678_v59, 0.0  ;;  %v5432_v58 = vld [vmem:[%s6487_s16 + $0x14] sm:$0xf0] }
 0x89e   : > { %1616 = vadd.xlane.f32.xlu0 %v1615_v62  ;;  %1882 = vmatpush.bf16.msra.mxu1 %v4657_v16  ;;  %v4604_v62 = vld [vmem:[%s6487_s16 + $0x88] sm:$0xf]  ;;  %v4589_v16 = vor.u32 %v5444_v18, %v4588_v13  ;;  %v5483_v8 = vld [vmem:[%s6491_s17 + $0xb0] sm:$0xff] }
 0x89f   : > { %1859 = vmatpush.bf16.msra.mxu3 %v4601_v38  ;;  %1847 = vmatpush.bf16.msrb.mxu2 %v4581_v9  ;;  %v4542_v38 = vld [vmem:[%s6487_s16 + $0x18] sm:$0xf0] }
 0x8a0   : > { %v1612_v63 = vpop.f32.mrf.mxu1 }
 0x8a1   : > { %v5448_v63 = vld [vmem:[%s6487_s16 + $0x94] sm:$0xf0] }
 0x8a2   : > { %1883 = vmatpush.bf16.msra.mxu1 %v4641_v36  ;;  %v4605_v1 = vor.u32 %v5448_v63, %v4604_v62  ;;  %v5433_v36 = vld [vmem:[%s6487_s16 + $0x24] sm:$0xf]  ;;  %v5430_v62 = vld [vmem:[%s6487_s16 + $0xc] sm:$0xf]  ;;  %v4541_v63 = vor.u32 %v5432_v58, %v4540_v46  ;;  %v5470_v46 = vld [vmem:[%s6491_s17 + $0x48] sm:$0xff] }
 0x8a3   : > { %1860 = vmatpush.bf16.msra.mxu3 %v4585_v14  ;;  %v4553_v42 = vor.u32 %v5433_v36, %v4550_v39  ;;  %v5473_v36 = vld [vmem:[%s6491_s17 + $0x60] sm:$0xff]  ;;  %v5490_v39 = vld [vmem:[%s6491_s17 + $0xe8] sm:$0xff] }
 0x8a4   : > { %1872 = vmatpush.bf16.msrb.mxu0 %v4605_v1  ;;  %v4545_v1 = vor.u32 %v5430_v62, %v4542_v38  ;;  %v4872_v62 = vld [vmem:[%s6511_s24 + $0x98] sm:$0xf]  ;;  %v6800_v38 = vld [vmem:[%s6489_s25] sm:$0xf]  ;;  %s7327_s25 = sld [smem:[#allocation36_spill]] (!%p5186_p1) }
 0x8a6   : > { %2303 = vadd.xlane.f32.xlu0 %v2302_v19  ;;  %1884 = vmatpush.bf16.msra.mxu1 %v4625_v50  ;;  %v4590_v19 = vld [vmem:[%s6487_s16 + $0x78] sm:$0xf0]  ;;  %v5429_v50 = vld [vmem:[%s6487_s16 + $0x4] sm:$0xf] }
 0x8a7   : > { %v4537_v55 = vor.u32 %v5429_v50, %v4534_v52  ;;  %v5488_v52 = vld [vmem:[%s6491_s17 + $0xd8] sm:$0xff] }
 0x8a8   : > { %1873 = vmatpush.bf16.msrb.mxu0 %v4589_v16 }
 0x8aa   : > { %1885 = vmatpush.bf16.msra.mxu1 %v4609_v5  ;;  %v5468_v5 = vld [vmem:[%s6491_s17 + $0x38] sm:$0xff] }
 0x8ac   : > { %1874 = vmatpush.bf16.msrb.mxu0 %v4573_v29  ;;  %v5492_v29 = vld [vmem:[%s6491_s17 + $0xf8] sm:$0xff] }
 0x8b0   : > { %1875 = vmatpush.bf16.msrb.mxu0 %v4557_v43  ;;  %v5489_v43 = vld [vmem:[%s6491_s17 + $0xe0] sm:$0xff] }
 0x8b4   : > { %1876 = vmatpush.bf16.msrb.mxu0 %v4541_v63  ;;  %v5513_v63 = vld [vmem:[%s6511_s24 + $0xa0] sm:$0xf0] }
 0x8b8   : > { %2266 = vmatpush.bf16.msra.mxu0 %v5484_v4  ;;  %v5461_v4 = vld [vmem:[%s6491_s17] sm:$0xff] }
 0x8bc   : > { %2267 = vmatpush.bf16.msra.mxu0 %v5483_v8  ;;  %v5514_v8 = vld [vmem:[%s6511_s24 + $0xac] sm:$0xf] }
 0x8c0   : > { %2268 = vmatpush.bf16.msra.mxu0 %v5482_v27  ;;  %v5511_v27 = vld [vmem:[%s6511_s24 + $0x94] sm:$0xf] }
 0x911   : > { %v1617_v20 = vpop.xlane.xlu0 %1616 }
 0x912   : > { %v1618_v21 = vmul.f32 %v1617_v20, %v6541_v35  ;;  %v4593_v20 = vor.u32 %v5442_v17, %v4590_v19  ;;  %v1637_v19 = vperm.slane %v6594_v51, 3 }
 0x914   : > { %v6698_v22 = vsub.f32 %v6678_v59, %v1618_v21  ;;  %v4564_v21 = vld [vmem:[%s6487_s16 + $0x40] sm:$0xf]  ;;  %1886 = vmatpush.bf16.msra.mxu1 %v4593_v20 }
 0x916   : > { %v1620_v23 = vmul.f32 %v6698_v22, %v6698_v22 }
 0x918   : > { %v1621_v24 = vsel %vm1046_vm9, %v1620_v23, 0.0  ;;  %v5439_v23 = vld [vmem:[%s6487_s16 + $0x4c] sm:$0xf0]  ;;  %1887 = vmatpush.bf16.msra.mxu1 %v4577_v32  ;;  %v5480_v32 = vld [vmem:[%s6491_s17 + $0x98] sm:$0xff] }
 0x919   : > { %1622 = vadd.xlane.f32.xlu1 %v1621_v24  ;;  %v5437_v24 = vld [vmem:[%s6487_s16 + $0x44] sm:$0xf]  ;;  %v4565_v25 = vor.u32 %v5439_v23, %v4564_v21  ;;  %v1639_v23 = vperm.slane %v6594_v51, 4  ;;  %v2304_v50 = vpop.xlane.xlu0 %2303 }
 0x91a   : > { %v4569_v12 = vor.u32 %v5437_v24, %v4566_v26  ;;  %v2305_v58 = vmul.f32 %v2304_v50, %v6541_v35  ;;  %v4836_v50 = vld [vmem:[%s6511_s24 + $0x50] sm:$0xf]  ;;  %v5564_v51 = vld [vmem:[%s6491_s17 + $0x38] sm:$0xff] }
 0x91b   : > { %1848 = vmatpush.bf16.msrb.mxu2 %v4565_v25 }
 0x91c   : > { %1861 = vmatpush.bf16.msra.mxu3 %v4569_v12  ;;  %1888 = vmatpush.bf16.msra.mxu1 %v4561_v48  ;;  %v5481_v12 = vld [vmem:[%s6491_s17 + $0xa0] sm:$0xff]  ;;  %v4884_v48 = vld [vmem:[%s6511_s24 + $0xb0] sm:$0xf] }
 0x91d   : > { %2269 = vmatpush.bf16.msra.mxu0 %v5481_v12 }
 0x91f   : > { %1849 = vmatpush.bf16.msrb.mxu2 %v4549_v37  ;;  %v5479_v37 = vld [vmem:[%s6491_s17 + $0x90] sm:$0xff] }
 0x920   : > { %1862 = vmatpush.bf16.msra.mxu3 %v4553_v42  ;;  %1889 = vmatpush.bf16.msra.mxu1 %v4545_v1  ;;  %v5478_v42 = vld [vmem:[%s6491_s17 + $0x88] sm:$0xff]  ;;  %v5487_v1 = vld [vmem:[%s6491_s17 + $0xd0] sm:$0xff] }
 0x921   : > { %2270 = vmatpush.bf16.msra.mxu0 %v5480_v32  ;;  %v4848_v32 = vld [vmem:[%s6511_s24 + $0x68] sm:$0xf] }
 0x923   : > { %1850 = vmatpush.bf16.msrb.mxu2 %v4533_v54  ;;  %v4885_v54 = vor.u32 %v5516_v49, %v4884_v48  ;;  %v4854_v48 = vld [vmem:[%s6511_s24 + $0x84] sm:$0xf0] }
 0x924   : > { %1863 = vmatpush.bf16.msra.mxu3 %v4537_v55  ;;  %2279 = vmatpush.bf16.msrb.mxu1 %v5492_v29  ;;  %v5462_v55 = vld [vmem:[%s6491_s17 + $0x8] sm:$0xff] }
 0x925   : > { %2271 = vmatpush.bf16.msra.mxu0 %v5479_v37  ;;  %v1676_v37 = vperm.slane %v6800_v38, 1 }
 0x927   : > { %2240 = vmatpush.bf16.msra.mxu2 %v5468_v5  ;;  %v5469_v5 = vld [vmem:[%s6491_s17 + $0x40] sm:$0xff] }
 0x928   : > { %2253 = vmatpush.bf16.msrb.mxu3 %v5476_v7  ;;  %2280 = vmatpush.bf16.msrb.mxu1 %v5491_v33  ;;  %v5515_v7 = vld [vmem:[%s6511_s24 + $0xb0] sm:$0xf0] }
 0x929   : > { %2272 = vmatpush.bf16.msra.mxu0 %v5478_v42  ;;  %v5507_v33 = vld [vmem:[%s6511_s24 + $0x70] sm:$0xf0]  ;;  %v5509_v42 = vld [vmem:[%s6511_s24 + $0x80] sm:$0xf0] }
 0x92c   : > { %2254 = vmatpush.bf16.msrb.mxu3 %v5475_v28  ;;  %2281 = vmatpush.bf16.msrb.mxu1 %v5490_v39  ;;  %v4866_v28 = vld [vmem:[%s6511_s24 + $0x9c] sm:$0xf0]  ;;  %v5485_v39 = vld [vmem:[%s6491_s17 + $0xc0] sm:$0xff] }
 0x92d   : > { %2273 = vmatpush.bf16.msra.mxu0 %v5477_v47 }
 0x930   : > { %2255 = vmatpush.bf16.msrb.mxu3 %v5474_v31  ;;  %2282 = vmatpush.bf16.msrb.mxu1 %v5489_v43  ;;  %v4869_v31 = vor.u32 %v5511_v27, %v4866_v28  ;;  %v5508_v43 = vld [vmem:[%s6511_s24 + $0x7c] sm:$0xf]  ;;  %v4828_v28 = vld [vmem:[%s6511_s24 + $0x48] sm:$0xf] }
 0x931   : > { %v4857_v49 = vor.u32 %v5508_v43, %v4854_v48  ;;  %v5499_v48 = vld [vmem:[%s6511_s24 + $0x34] sm:$0xf] }
 0x934   : > { %2256 = vmatpush.bf16.msrb.mxu3 %v5473_v36  ;;  %2283 = vmatpush.bf16.msrb.mxu1 %v5488_v52  ;;  %v5504_v52 = vld [vmem:[%s6511_s24 + $0x58] sm:$0xf0] }
 0x938   : > { %2257 = vmatpush.bf16.msrb.mxu3 %v5472_v41  ;;  %2284 = vmatpush.bf16.msrb.mxu1 %v5487_v1  ;;  %v4852_v41 = vld [vmem:[%s6511_s24 + $0x78] sm:$0xf] }
 0x939   : > { %v4853_v47 = vor.u32 %v5509_v42, %v4852_v41  ;;  %v4816_v41 = vld [vmem:[%s6511_s24 + $0x30] sm:$0xf] }
 0x93c   : > { %2258 = vmatpush.bf16.msrb.mxu3 %v5471_v45 }
 0x940   : > { %2259 = vmatpush.bf16.msrb.mxu3 %v5470_v46 }
 0x944   : > { %2260 = vmatpush.bf16.msrb.mxu3 %v5469_v5  ;;  %v5506_v5 = vld [vmem:[%s6511_s24 + $0x68] sm:$0xf0] }
 0x98c   : > { %v1623_v3 = vpop.xlane.xlu1 %1622 }
 0x98d   : > { %v1624_v6 = vmul.f32 %v1623_v3, %v6541_v35  ;;  %v4873_v3 = vor.u32 %v5513_v63, %v4872_v62  ;;  %v4837_v62 = vor.u32 %v5504_v52, %v4836_v50 }
 0x98f   : > { %v1625_v9 = vadd.f32 1e-05, %v1624_v6  ;;  %v4876_v6 = vld [vmem:[%s6511_s24 + $0xa8] sm:$0xf] }
 0x991   : > { %5780 = vrsqrt.f32 %v1625_v9  ;;  %vm1632_vm6 = vweird.f32 %v1625_v9 }
 0x997   : > { %v5781_v10 = vpop.eup %5780 }
 0x998   : > { %v1627_v13 = vmul.f32 %v5781_v10, %v1625_v9  ;;  %vm1633_vm5 = vweird.f32 %v5781_v10  ;;  %v4878_v9 = vld [vmem:[%s6511_s24 + $0xb4] sm:$0xf0] }
 0x999   : > { %vm1634_vm7 = vmor %vm1632_vm6, %vm1633_vm5 }
 0x99a   : > { %v1628_v18 = vmul.f32 %v5781_v10, %v1627_v13  ;;  %v4877_v13 = vor.u32 %v5515_v7, %v4876_v6  ;;  %v5505_v6 = vld [vmem:[%s6511_s24 + $0x64] sm:$0xf] }
 0x99c   : > { %v1629_v14 = vmul.f32 0.5, %v1628_v18  ;;  %v4881_v18 = vor.u32 %v5514_v8, %v4878_v9  ;;  %v4842_v8 = vld [vmem:[%s6511_s24 + $0x6c] sm:$0xf0] }
 0x99e   : > { %v1630_v16 = vsub.f32 1.5, %v1629_v14  ;;  %v4860_v14 = vld [vmem:[%s6511_s24 + $0x80] sm:$0xf] }
 0x9a0   : > { %v1631_v17 = vmul.f32 %v5781_v10, %v1630_v16  ;;  %v5510_v16 = vld [vmem:[%s6511_s24 + $0x88] sm:$0xf0] }
 0x9a2   : > { %v1635_v20 = vsel %vm1634_vm7, %v5781_v10, %v1631_v17  ;;  %v6809_v10 = vadd.f32 1e-05, %v2305_v58  ;;  %v1677_v17 = vperm.slane %v6800_v38, 2 }
 0x9a3   : > { %v1636_v21 = vmul.f32 %v1635_v20, %v6698_v22  ;;  %v5467_v22 = vld [vmem:[%s6491_s17 + $0x30] sm:$0xff]  ;;  %v1678_v20 = vperm.slane %v6800_v38, 3 }
 0x9a4   : > { %2241 = vmatpush.bf16.msra.mxu2 %v5467_v22  ;;  %5782 = vrsqrt.f32 %v6809_v10  ;;  %vm2313_vm8 = vweird.f32 %v6809_v10 }
 0x9a5   : > { %v1638_v24 = vmul.f32 %v1637_v19, %v1636_v21  ;;  %v5486_v21 = vld [vmem:[%s6491_s17 + $0xc8] sm:$0xff] }
 0x9a6   : > { %2285 = vmatpush.bf16.msrb.mxu1 %v5486_v21  ;;  %v4824_v21 = vld [vmem:[%s6511_s24 + $0x38] sm:$0xf] }
 0x9a7   : > { %v1640_v25 = vadd.f32 %v1639_v23, %v1638_v24  ;;  %v4861_v24 = vor.u32 %v5510_v16, %v4860_v14  ;;  %v4845_v16 = vor.u32 %v5505_v6, %v4842_v8  ;;  %v5497_v6 = vld [vmem:[%s6511_s24 + $0x20] sm:$0xf0]  ;;  %v5496_v8 = vld [vmem:[%s6511_s24 + $0x1c] sm:$0xf] }
 0x9a8   : > { %2242 = vmatpush.bf16.msra.mxu2 %v5466_v30  ;;  %v1675_v30 = vperm.slane %v6800_v38, 0 }
 0x9a9   : > { %v1641_v26 = vpack.c.bf16 %v1640_v25, %v1640_v25  ;;  %v4864_v25 = vld [vmem:[%s6511_s24 + $0x90] sm:$0xf] }
 0x9aa   : > { %2286 = vmatpush.bf16.msrb.mxu1 %v5485_v39  ;;  %v6842_v63 = vpop.eup %5782  ;;  %v4812_v39 = vld [vmem:[%s6511_s24 + $0x20] sm:$0xf] }
 0x9ab   : > { %1851 = vmatmul.bf16.vlgmr.msrb.gmra.mxu2 %v1641_v26  ;;  %1864 = vmatmul.bf16.vlgmr.msra.gmra.mxu3 %v1641_v26  ;;  %vm2314_vm10 = vweird.f32 %v6842_v63 }
 0x9ac   : > { %1877 = vmatmul.bf16.vlgmr.msrb.gmra.mxu0 %v1641_v26  ;;  %1890 = vmatmul.bf16.vlgmr.msra.gmra.mxu1 %v1641_v26  ;;  %v5512_v26 = vld [vmem:[%s6511_s24 + $0x98] sm:$0xf0]  ;;  %vm6915_vm5 = vmor %vm2313_vm8, %vm2314_vm10 }
 0x9ad   : > { %2243 = vmatpush.bf16.msra.mxu2 %v5465_v34  ;;  %2507 = vmatpush.bf16.msrb.mxu0 %v4885_v54  ;;  %v4865_v22 = vor.u32 %v5512_v26, %v4864_v25  ;;  %v2308_v25 = vmul.f32 %v6842_v63, %v6809_v10 }
 0x9ae   : > { %2494 = vmatpush.bf16.msra.mxu3 %v4881_v18 }
 0x9af   : > { %v2309_v52 = vmul.f32 %v6842_v63, %v2308_v25 }
 0x9b1   : > { %2244 = vmatpush.bf16.msra.mxu2 %v5464_v40  ;;  %2508 = vmatpush.bf16.msrb.mxu0 %v4873_v3  ;;  %v4849_v40 = vor.u32 %v5507_v33, %v4848_v32 }
 0x9b2   : > { %2495 = vmatpush.bf16.msra.mxu3 %v4869_v31  ;;  %v4830_v31 = vld [vmem:[%s6511_s24 + $0x54] sm:$0xf0] }
 0x9b5   : > { %2245 = vmatpush.bf16.msra.mxu2 %v5463_v44  ;;  %2509 = vmatpush.bf16.msrb.mxu0 %v4861_v24  ;;  %v5501_v24 = vld [vmem:[%s6511_s24 + $0x40] sm:$0xf0] }
 0x9b6   : > { %2496 = vmatpush.bf16.msra.mxu3 %v4857_v49  ;;  %v4818_v49 = vld [vmem:[%s6511_s24 + $0x3c] sm:$0xf0] }
 0x9b9   : > { %2246 = vmatpush.bf16.msra.mxu2 %v5462_v55  ;;  %2510 = vmatpush.bf16.msrb.mxu0 %v4849_v40  ;;  %v5498_v40 = vld [vmem:[%s6511_s24 + $0x28] sm:$0xf0] }
 0x9ba   : > { %2497 = vmatpush.bf16.msra.mxu3 %v4845_v16 }
 0x9bd   : > { %2247 = vmatpush.bf16.msra.mxu2 %v5461_v4  ;;  %v4840_v4 = vld [vmem:[%s6511_s24 + $0x60] sm:$0xf]  ;;  %2511 = vmatpush.bf16.msrb.mxu0 %v4837_v62  ;;  %v5495_v62 = vld [vmem:[%s6511_s24 + $0x10] sm:$0xf0] }
 0x9be   : > { %v4841_v7 = vor.u32 %v5506_v5, %v4840_v4  ;;  %v4804_v5 = vld [vmem:[%s6511_s24 + $0x18] sm:$0xf] }
 0x9c1   : > { %2481 = vmatpush.bf16.msrb.mxu2 %v4877_v13 }
 0x9c5   : > { %2482 = vmatpush.bf16.msrb.mxu2 %v4865_v22  ;;  %v4825_v22 = vor.u32 %v5501_v24, %v4824_v21 }
 0x9c7   : > { %2512 = vmatpush.bf16.msrb.mxu0 %v4825_v22  ;;  %v4792_v22 = vld [vmem:[%s6511_s24] sm:$0xf] }
 0x9c9   : > { %2483 = vmatpush.bf16.msrb.mxu2 %v4853_v47  ;;  %v5500_v47 = vld [vmem:[%s6511_s24 + $0x38] sm:$0xf0] }
 0x9cd   : > { %2484 = vmatpush.bf16.msrb.mxu2 %v4841_v7 }
 0xa29   : > { %v1878_v12 = vpop.f32.mrf.mxu0  ;;  %v1891_v29 = vpop.f32.mrf.mxu1 }
 0xa2a   : > { %v6826_v34 = vadd.f32 %v1878_v12, %v1677_v17  ;;  %v6830_v36 = vadd.f32 %v1891_v29, %v1678_v20  ;;  %v5503_v12 = vld [vmem:[%s6511_s24 + $0x50] sm:$0xf0]  ;;  %v5502_v29 = vld [vmem:[%s6511_s24 + $0x4c] sm:$0xf] }
 0xa2b   : > { %v4829_v32 = vor.u32 %v5503_v12, %v4828_v28  ;;  %v4833_v33 = vor.u32 %v5502_v29, %v4830_v31  ;;  %v5494_v28 = vld [vmem:[%s6511_s24 + $0x8] sm:$0xf0] }
 0xa2c   : > { %v4660_v44 = vmul.f32 -1.702, %v6826_v34  ;;  %v4661_v45 = vmul.f32 -1.702, %v6830_v36 }
 0xa2d   : > { %2485 = vmatpush.bf16.msrb.mxu2 %v4829_v32  ;;  %2498 = vmatpush.bf16.msra.mxu3 %v4833_v33  ;;  %v5493_v32 = vld [vmem:[%s6511_s24 + $0x4] sm:$0xf]  ;;  %v4794_v33 = vld [vmem:[%s6511_s24 + $0xc] sm:$0xf0] }
 0xa2e   : > { %v1907_v54 = vmul.f32 1.442695, %v4660_v44  ;;  %v1909_v55 = vmul.f32 1.442695, %v4661_v45  ;;  %v1852_v46 = vpop.f32.mrf.mxu2  ;;  %v1865_v58 = vpop.f32.mrf.mxu3  ;;  %v4813_v45 = vor.u32 %v5498_v40, %v4812_v39 }
 0xa2f   : > { %v6846_v1 = vadd.f32 %v1852_v46, %v1675_v30  ;;  %v6850_v3 = vadd.f32 %v1865_v58, %v1676_v37  ;;  %v4821_v46 = vor.u32 %v5499_v48, %v4818_v49  ;;  %v4800_v58 = vld [vmem:[%s6511_s24 + $0x8] sm:$0xf] }
 0xa30   : > { %5784 = vpow2.f32 %v1907_v54  ;;  %2513 = vmatpush.bf16.msrb.mxu0 %v4813_v45  ;;  %v4801_v7 = vor.u32 %v5495_v62, %v4800_v58  ;;  %v4797_v45 = vor.u32 %v5493_v32, %v4794_v33 }
 0xa31   : > { %5786 = vpow2.f32 %v1909_v55  ;;  %v4658_v9 = vmul.f32 -1.702, %v6846_v1  ;;  %v4659_v13 = vmul.f32 -1.702, %v6850_v3  ;;  %v1880_v18 = vpop.f32.mrf.mxu0  ;;  %v1893_v14 = vpop.f32.mrf.mxu1  ;;  %v4817_v55 = vor.u32 %v5500_v47, %v4816_v41  ;;  %2499 = vmatpush.bf16.msra.mxu3 %v4821_v46 }
 0xa32   : > { %v2310_v18 = vmul.f32 0.5, %v2309_v52  ;;  %v4805_v14 = vor.u32 %v5497_v6, %v4804_v5 }
 0xa33   : > { %v1903_v26 = vmul.f32 1.442695, %v4658_v9  ;;  %v1905_v27 = vmul.f32 1.442695, %v4659_v13  ;;  %v4806_v9 = vld [vmem:[%s6511_s24 + $0x24] sm:$0xf0]  ;;  %2486 = vmatpush.bf16.msrb.mxu2 %v4817_v55 }
 0xa34   : > { %v4809_v16 = vor.u32 %v5496_v8, %v4806_v9  ;;  %2514 = vmatpush.bf16.msrb.mxu0 %v4801_v7 }
 0xa35   : > { %5788 = vpow2.f32 %v1903_v26 }
 0xa36   : > { %v5785_v42 = vpop.eup %5784  ;;  %5790 = vpow2.f32 %v1905_v27  ;;  %v1854_v43 = vpop.f32.mrf.mxu2  ;;  %v2311_v27 = vsub.f32 1.5, %v2310_v18  ;;  %2500 = vmatpush.bf16.msra.mxu3 %v4809_v16 }
 0xa37   : > { %v1867_v44 = vpop.f32.mrf.mxu3  ;;  %v5787_v50 = vpop.eup %5786  ;;  %v6873_v54 = vadd.f32 1.0, %v5785_v42  ;;  %2487 = vmatpush.bf16.msrb.mxu2 %v4805_v14 }
 0xa38   : > { %v6877_v4 = vadd.f32 1.0, %v5787_v50  ;;  %v4793_v44 = vor.u32 %v5494_v28, %v4792_v22  ;;  %v2312_v47 = vmul.f32 %v6842_v63, %v2311_v27 }
 0xa39   : > { %5792 = vrcp.f32 %v6873_v54  ;;  %v1954_v31 = vand.u32 2147483647, %v6873_v54  ;;  %v1956_v39 = vand.u32 2147483648, %v6873_v54  ;;  %vm1950_vm11 = vweird.f32 %v6873_v54 }
 0xa3a   : > { %5794 = vrcp.f32 %v6877_v4  ;;  %v1969_v41 = vand.u32 2147483647, %v6877_v4  ;;  %v1971_v43 = vand.u32 2147483648, %v6877_v4  ;;  %vm1965_vm15 = vweird.f32 %v6877_v4  ;;  %2501 = vmatpush.bf16.msra.mxu3 %v4797_v45 }
 0xa3b   : > { %v5789_v13 = vpop.eup %5788  ;;  %vm6905_vm13 = vcmp.eq.f32.partialorder %v1954_v31, 8.507059e+37  ;;  %2488 = vmatpush.bf16.msrb.mxu2 %v4793_v44  ;;  %v1957_v46 = vor.u32 1.1754944e-38, %v1956_v39 }
 0xa3c   : > { %v5791_v21 = vpop.eup %5790  ;;  %v6885_v24 = vadd.f32 1.0, %v5789_v13  ;;  %vm6919_vm6 = vcmp.eq.f32.partialorder %v1969_v41, 8.507059e+37  ;;  %v1972_v8 = vor.u32 1.1754944e-38, %v1971_v43 }
 0xa3d   : > { %v6887_v25 = vadd.f32 1.0, %v5791_v21 }
 0xa3e   : > { %5796 = vrcp.f32 %v6885_v24  ;;  %v1924_v10 = vand.u32 2147483647, %v6885_v24  ;;  %v1926_v14 = vand.u32 2147483648, %v6885_v24 }
 0xa3f   : > { %v5793_v26 = vpop.eup %5792  ;;  %5798 = vrcp.f32 %v6887_v25  ;;  %v1939_v27 = vand.u32 2147483647, %v6887_v25  ;;  %v1941_v22 = vand.u32 2147483648, %v6887_v25 }
 0xa40   : > { %v5795_v12 = vpop.eup %5794  ;;  %v1946_v29 = vmul.f32 %v5793_v26, %v6873_v54  ;;  %vm1951_vm12 = vweird.f32 %v5793_v26 }
 0xa41   : > { %v1961_v40 = vmul.f32 %v5795_v12, %v6877_v4  ;;  %vm1966_vm0 = vweird.f32 %v5795_v12  ;;  %vm1952_vm7 = vmor %vm1950_vm11, %vm1951_vm12  ;;  %v2316_v4 = vsel %vm6915_vm5, %v6842_v63, %v2312_v47  ;;  %vm1920_vm12 = vweird.f32 %v6885_v24 }
 0xa42   : > { %v1947_v42 = vsub.f32 1.0, %v1946_v29  ;;  %vm1967_vm8 = vmor %vm1965_vm15, %vm1966_vm0  ;;  %vm1935_vm15 = vweird.f32 %v6887_v25  ;;  %vm1925_vm0 = vcmp.eq.f32.partialorder %v1924_v10, 8.507059e+37  ;;  %v1942_v43 = vor.u32 1.1754944e-38, %v1941_v22 }
 0xa43   : > { %v1962_v48 = vsub.f32 1.0, %v1961_v40 }
 0xa44   : > { %v5797_v49 = vpop.eup %5796  ;;  %v1948_v50 = vmul.f32 %v5793_v26, %v1947_v42 }
 0xa45   : > { %v5799_v55 = vpop.eup %5798  ;;  %v1963_v58 = vmul.f32 %v5795_v12, %v1962_v48  ;;  %v1916_v62 = vmul.f32 %v5797_v49, %v6885_v24  ;;  %vm1921_vm10 = vweird.f32 %v5797_v49  ;;  %v2317_v24 = vmul.f32 %v2316_v4, %v6691_v15  ;;  %v6952_v15 = vld [vmem:[%s6506_s27] sm:$0x3f] }
 0xa46   : > { %v1949_v6 = vadd.f32 %v5793_v26, %v1948_v50  ;;  %v1931_v9 = vmul.f32 %v5799_v55, %v6887_v25  ;;  %vm1936_vm11 = vweird.f32 %v5799_v55 }
 0xa47   : > { %v1964_v13 = vadd.f32 %v5795_v12, %v1963_v58  ;;  %v1917_v18 = vsub.f32 1.0, %v1916_v62 }
 0xa48   : > { %v1953_v16 = vsel %vm1952_vm7, %v5793_v26, %v1949_v6  ;;  %v1932_v21 = vsub.f32 1.0, %v1931_v9  ;;  %vm1940_vm7 = vcmp.eq.f32.partialorder %v1939_v27, 8.507059e+37 }
 0xa49   : > { %v1958_v28 = vsel %vm6905_vm13, %v1957_v46, %v1953_v16  ;;  %v1968_v54 = vsel %vm1967_vm8, %v5795_v12, %v1964_v13  ;;  %v1918_v29 = vmul.f32 %v5797_v49, %v1917_v18  ;;  %vm1922_vm13 = vmor %vm1920_vm12, %vm1921_vm10  ;;  %v1927_v12 = vor.u32 1.1754944e-38, %v1926_v14 }
 0xa4a   : > { %v1977_v31 = vmul.f32 %v1958_v28, %v6826_v34  ;;  %v1973_v32 = vsel %vm6919_vm6, %v1972_v8, %v1968_v54  ;;  %v1933_v26 = vmul.f32 %v5799_v55, %v1932_v21  ;;  %vm1937_vm6 = vmor %vm1935_vm15, %vm1936_vm11 }
 0xa4b   : > { %v1978_v33 = vmul.f32 %v1973_v32, %v6830_v36  ;;  %v1919_v39 = vadd.f32 %v5797_v49, %v1918_v29 }
 0xa4c   : > { %v1981_v40 = vpack.c.bf16 %v1977_v31, %v1977_v31  ;;  %v1934_v41 = vadd.f32 %v5799_v55, %v1933_v26 }
 0xa4d   : > { %v1982_v34 = vpack.c.bf16 %v1978_v33, %v1978_v33  ;;  %v1923_v42 = vsel %vm1922_vm13, %v5797_v49, %v1919_v39  ;;  %v2318_v49 = vmul.f32 %v2317_v24, %v1076_v53 }
 0xa4e   : > { %v1928_v44 = vsel %vm1925_vm0, %v1927_v12, %v1923_v42  ;;  %v1938_v45 = vsel %vm1937_vm6, %v5799_v55, %v1934_v41  ;;  %2274 = vmatmul.bf16.vlgmr.msra.gmra.mxu0 %v1981_v40 }
 0xa4f   : > { %v1975_v36 = vmul.f32 %v1928_v44, %v6846_v1  ;;  %v1943_v63 = vsel %vm1940_vm7, %v1942_v43, %v1938_v45  ;;  %2287 = vmatmul.bf16.vlgmr.msrb.gmra.mxu1 %v1982_v34  ;;  %v2319_v50 = vadd.f32 %v2318_v49, %v1078_v56 }
 0xa50   : > { %v1976_v47 = vmul.f32 %v1943_v63, %v6850_v3  ;;  %v2047_v3 = vperm.slane %v6952_v15, 5 }
 0xa51   : > { %v1979_v48 = vpack.c.bf16 %v1975_v36, %v1975_v36  ;;  %v2320_v52 = vpack.c.bf16 %v2319_v50, %v2319_v50 }
 0xa52   : > { %v1980_v25 = vpack.c.bf16 %v1976_v47, %v1976_v47 }
 0xa53   : > { %2248 = vmatmul.bf16.vlgmr.msra.gmra.mxu2 %v1979_v48 }
 0xa54   : > { %2261 = vmatmul.bf16.vlgmr.msrb.gmra.mxu3 %v1980_v25 }
 0xa5e   : > { %2515 = vmatmul.bf16.vlgmr.msrb.gmra.mxu0 %v2320_v52 }
 0xa63   : > { %2489 = vmatmul.bf16.vlgmr.msrb.gmra.mxu2 %v2320_v52 }
 0xa64   : > { %2502 = vmatmul.bf16.vlgmr.msra.gmra.mxu3 %v2320_v52 }
 0xacb   : > { %v2275_v1 = vpop.f32.mrf.mxu0 }
 0xacc   : > { %v2288_v55 = vpop.f32.mrf.mxu1 }
 0xad3   : > { %v2277_v46 = vpop.f32.mrf.mxu0 }
 0xad4   : > { %v2290_v58 = vpop.f32.mrf.mxu1 }
 0xad6   : > { %v2249_v62 = vpop.f32.mrf.mxu2 }
 0xad7   : > { %v2250_v5 = vadd.f32 %v2249_v62, %v2047_v3  ;;  %v2262_v53 = vpop.f32.mrf.mxu3 }
 0xad9   : > { %v2263_v6 = vadd.f32 %v2262_v53, %v2250_v5 }
 0xadb   : > { %v2276_v7 = vadd.f32 %v2275_v1, %v2263_v6  ;;  %v2516_v56 = vpop.f32.mrf.mxu0 }
 0xadc   : > { %v2517_v8 = vadd.f32 %v2516_v56, %v1116_v2 }
 0xadd   : > { %v2289_v9 = vadd.f32 %v2288_v55, %v2276_v7 }
 0xade   : > { %v6959_v13 = vpack.c.bf16 %v2517_v8, %v2517_v8  ;;  %v2251_v18 = vpop.f32.mrf.mxu2 }
 0xadf   : > { %v2292_v10 = vadd.f32 %v2289_v9, %v6678_v59  ;;  %v2264_v14 = vpop.f32.mrf.mxu3 }
 0xae0   : > { %v2558_v16 = vand.u32 %v6959_v13, %v6618_v11 }
 0xae1   : > { %2293 = vst [vmem:[#allocation2] sm:$0x1f] %v2292_v10 }
 0xae2   : > { %2567 = vmatpush.bf16.msra.mxu2 %v2558_v16 }
 0xae3   : > { %v2518_v21 = vpop.f32.mrf.mxu0 }
 0xae6   : > { %v2490_v27 = vpop.f32.mrf.mxu2 }
 0xae7   : > { %v2491_v22 = vadd.f32 %v2490_v27, %v1114_v0  ;;  %v2503_v28 = vpop.f32.mrf.mxu3 }
 0xae8   : > { %v2504_v2 = vadd.f32 %v2503_v28, %v1115_v61 }
 0xae9   : > { %v2520_v54 = vpack.c.bf16 %v2491_v22, %v2491_v22 }
 0xaea   : > { %v2521_v29 = vpack.c.bf16 %v2504_v2, %v2504_v2 }
 0xaeb   : > { %2574 = vrot.lane.b32.xlu2 %v2520_v54, %s6179_s21 }
 0xaec   : > { %2634 = vrot.lane.b32.xlu0 %v2521_v29, %s6178_s12  ;;  %2577 = vrot.lane.b32.xlu1 %v2521_v29, %s6179_s21  ;;  %v2526_v59 = vsel %vm1289_vm14, %v2521_v29, 0 }
 0xaed   : > { %2535 = vmatpush.bf16.xpose.msra.mxu1 %v2526_v59 }
 0xaee   : > { %v2492_v31 = vpop.f32.mrf.mxu2 }
 0xaef   : > { %v2505_v32 = vpop.f32.mrf.mxu3 }
 0xaf3   : > { %2688 = vrot.lane.b32.xlu2 %v2520_v54, %s6181_s30 }
 0xaf4   : > { %2632 = vrot.lane.b32.xlu0 %v2520_v54, %s6178_s12  ;;  %2690 = vrot.lane.b32.xlu1 %v2521_v29, %s6181_s30 }
 0xaf5   : > { %4886 = vmatmul.msk.bf16.vlgmr.msra.gmra.mxu1 %vm1289_vm14, %v2520_v54 }
 0xb45   : > { %v2575_v4 = vpop.permute.xlu2 %2574 }
 0xb4d   : > { %v2689_v34 = vpop.permute.xlu2 %2688 }
 0xb5e   : > { %v2635_v60 = vpop.permute.xlu0 %2634  ;;  %v2578_v61 = vpop.permute.xlu1 %2577 }
 0xb5f   : > { %v2640_v0 = vsel %vm1289_vm14, %v2635_v60, 0  ;;  %v2583_v26 = vsel %vm1289_vm14, %v2578_v61, 0 }
 0xb60   : > { %2592 = vmatpush.bf16.xpose.msrb.mxu3 %v2583_v26  ;;  %2649 = vmatpush.bf16.xpose.msrb.mxu1 %v2640_v0 }
 0xb66   : > { %v2633_v33 = vpop.permute.xlu0 %2632  ;;  %v2691_v39 = vpop.permute.xlu1 %2690 }
 0xb67   : > { %v2696_v40 = vsel %vm1289_vm14, %v2691_v39, 0  ;;  %4888 = vmatmul.msk.bf16.vlgmr.msrb.gmra.mxu3 %vm1289_vm14, %v2575_v4  ;;  %4890 = vmatmul.msk.bf16.vlgmr.msrb.gmra.mxu1 %vm1289_vm14, %v2633_v33 }
 0xb68   : > { %2705 = vmatpush.bf16.xpose.msra.mxu3 %v2696_v40 }
 0xb72   : > { %v2537_v12 = vpop.f32.mrf.mxu1 }
 0xb73   : > { %v2541_v41 = vsel %vm1309_vm1, %v2537_v12, -inf }
 0xb74   : > { %2542 = vmax.xlane.f32.xlu1 %v2541_v41 }
 0xb77   : > { %4892 = vmatmul.msk.bf16.vlgmr.msra.gmra.mxu3 %vm1289_vm14, %v2689_v34 }
 0xb7a   : > { %v2539_v42 = vpop.f32.mrf.mxu1 }
 0xbe4   : > { %v2651_v43 = vpop.f32.mrf.mxu1 }
 0xbe5   : > { %v2655_v44 = vsel %vm1309_vm1, %v2651_v43, -inf }
 0xbe6   : > { %2656 = vmax.xlane.f32.xlu2 %v2655_v44 }
 0xbe7   : > { %v2543_v45 = vpop.xlane.xlu1 %2542 }
 0xbe8   : > { %v2544_v36 = vsub.f32 %v2537_v12, %v2543_v45 }
 0xbea   : > { %v2545_v63 = vmul.f32 1.442695, %v2544_v36  ;;  %v2594_v24 = vpop.f32.mrf.mxu3 }
 0xbeb   : > { %v2598_v47 = vsel %vm1309_vm1, %v2594_v24, -inf }
 0xbec   : > { %5800 = vpow2.f32 %v2545_v63  ;;  %2599 = vmax.xlane.f32.xlu0 %v2598_v47  ;;  %v2653_v48 = vpop.f32.mrf.mxu1 }
 0xbed   : > { %v5524_v48 = vld [vmem:[%s6485_s7 + $0x38] sm:$0xff] }
 0xbee   : > { %2824 = vmatpush.bf16.msra.mxu1 %v5524_v48 }
 0xbf2   : > { %v5801_v25 = vpop.eup %5800  ;;  %v2596_v49 = vpop.f32.mrf.mxu3 }
 0xbf3   : > { %v2547_v50 = vsel %vm1309_vm1, %v5801_v25, 0.0  ;;  %v5522_v49 = vld [vmem:[%s6485_s7 + $0x28] sm:$0xff] }
 0xbf4   : > { %2548 = vadd.xlane.f32.xlu0 %v2547_v50  ;;  %v5521_v50 = vld [vmem:[%s6485_s7 + $0x20] sm:$0xff] }
 0xbfa   : > { %v2707_v52 = vpop.f32.mrf.mxu3 }
 0xbfb   : > { %v2711_v1 = vsel %vm1309_vm1, %v2707_v52, -inf }
 0xbfc   : > { %2712 = vmax.xlane.f32.xlu1 %v2711_v1  ;;  %v5519_v1 = vld [vmem:[%s6485_s7 + $0x10] sm:$0xff] }
 0xc02   : > { %v2709_v55 = vpop.f32.mrf.mxu3 }
 0xc03   : > { %v5518_v55 = vld [vmem:[%s6485_s7 + $0x8] sm:$0xff] }
 0xc15   : > { %2611 = vrot.lane.b32.xlu1 %v6959_v13, %s6179_s21 }
 0xc59   : > { %v2657_v46 = vpop.xlane.xlu2 %2656 }
 0xc5a   : > { %v2658_v58 = vsub.f32 %v2651_v43, %v2657_v46  ;;  %v5517_v46 = vld [vmem:[%s6485_s7] sm:$0xff] }
 0xc5c   : > { %v2659_v62 = vmul.f32 1.442695, %v2658_v58 }
 0xc5e   : > { %5802 = vpow2.f32 %v2659_v62 }
 0xc5f   : > { %v2600_v5 = vpop.xlane.xlu0 %2599 }
 0xc60   : > { %v2601_v53 = vsub.f32 %v2594_v24, %v2600_v5 }
 0xc62   : > { %v2602_v6 = vmul.f32 1.442695, %v2601_v53 }
 0xc64   : > { %v5803_v7 = vpop.eup %5802  ;;  %5804 = vpow2.f32 %v2602_v6 }
 0xc65   : > { %v2661_v56 = vsel %vm1309_vm1, %v5803_v7, 0.0 }
 0xc66   : > { %2662 = vadd.xlane.f32.xlu0 %v2661_v56 }
 0xc67   : > { %v2549_v8 = vpop.xlane.xlu0 %2548 }
 0xc68   : > { %5806 = vrcp.f32 %v2549_v8 }
 0xc6a   : > { %v5805_v9 = vpop.eup %5804 }
 0xc6b   : > { %v2604_v18 = vsel %vm1309_vm1, %v5805_v9, 0.0 }
 0xc6c   : > { %2605 = vadd.xlane.f32.xlu2 %v2604_v18  ;;  %v5835_v18 = vld [vmem:[#allocation2 + $0x8] sm:$0x1f] }
 0xc6e   : > { %v5807_v10 = vpop.eup %5806 }
 0xc6f   : > { %v2551_v14 = vmul.f32 %v5807_v10, %v5801_v25  ;;  %v2713_v16 = vpop.xlane.xlu1 %2712  ;;  %v5523_v25 = vld [vmem:[%s6485_s7 + $0x30] sm:$0xff] }
 0xc70   : > { %v2714_v21 = vsub.f32 %v2707_v52, %v2713_v16  ;;  %2825 = vmatpush.bf16.msra.mxu1 %v5523_v25  ;;  %v5520_v52 = vld [vmem:[%s6485_s7 + $0x18] sm:$0xff]  ;;  %v5010_v25 = vld [vmem:[%s6487_s16 + $0xb0] sm:$0xf0] }
 0xc71   : > { %v2552_v27 = vpack.c.bf16 %v2551_v14, %v2551_v14 }
 0xc72   : > { %v2715_v22 = vmul.f32 1.442695, %v2714_v21  ;;  %v5040_v21 = vld [vmem:[%s6487_s16 + $0xe0] sm:$0xf] }
 0xc73   : > { %4887 = vmatmul.msk.bf16.vlgmr.msra.gmra.mxu2 %vm1323_vm2, %v2552_v27  ;;  %v5555_v27 = vld [vmem:[%s6487_s16 + $0xec] sm:$0xf0] }
 0xc74   : > { %5808 = vpow2.f32 %v2715_v22  ;;  %2826 = vmatpush.bf16.msra.mxu1 %v5522_v49  ;;  %v5553_v22 = vld [vmem:[%s6487_s16 + $0xe4] sm:$0xf]  ;;  %v5016_v49 = vld [vmem:[%s6487_s16 + $0xa8] sm:$0xf] }
 0xc78   : > { %2827 = vmatpush.bf16.msra.mxu1 %v5521_v50  ;;  %v5548_v50 = vld [vmem:[%s6487_s16 + $0xb4] sm:$0xf0] }
 0xc7a   : > { %v5809_v28 = vpop.eup %5808 }
 0xc7b   : > { %v2717_v2 = vsel %vm1309_vm1, %v5809_v28, 0.0 }
 0xc7c   : > { %2718 = vadd.xlane.f32.xlu0 %v2717_v2  ;;  %2828 = vmatpush.bf16.msra.mxu1 %v5520_v52  ;;  %v5042_v2 = vld [vmem:[%s6487_s16 + $0xf0] sm:$0xf0] }
 0xc80   : > { %2829 = vmatpush.bf16.msra.mxu1 %v5519_v1  ;;  %v5017_v1 = vor.u32 %v5548_v50, %v5016_v49  ;;  %v5530_v50 = vld [vmem:[%s6487_s16 + $0x2c] sm:$0xf] }
 0xc84   : > { %2667 = vrot.lane.b32.xlu2 %v6959_v13, %s6178_s12  ;;  %2830 = vmatpush.bf16.msra.mxu1 %v5518_v55  ;;  %v5546_v55 = vld [vmem:[%s6487_s16 + $0xac] sm:$0xf] }
 0xc87   : > { %v2612_v54 = vpop.permute.xlu1 %2611 }
 0xc88   : > { %v2617_v29 = vand.u32 %v2612_v54, %v6618_v11  ;;  %2831 = vmatpush.bf16.msra.mxu1 %v5517_v46  ;;  %v5048_v54 = vld [vmem:[%s6487_s16 + $0xe8] sm:$0xf]  ;;  %v5018_v46 = vld [vmem:[%s6487_s16 + $0xb8] sm:$0xf0] }
 0xc8a   : > { %2626 = vmatpush.bf16.msra.mxu0 %v2617_v29  ;;  %v5556_v29 = vld [vmem:[%s6487_s16 + $0xf4] sm:$0xf0] }
 0xc90   : > { %2723 = vrot.lane.b32.xlu0 %v6959_v13, %s6181_s30 }
 0xcd9   : > { %v2663_v59 = vpop.xlane.xlu0 %2662 }
 0xcda   : > { %5810 = vrcp.f32 %v2663_v59  ;;  %v5045_v59 = vor.u32 %v5553_v22, %v5042_v2  ;;  %v5539_v22 = vld [vmem:[%s6487_s16 + $0x6c] sm:$0xf0] }
 0xcdc   : > { %3068 = vmatpush.bf16.msrb.mxu3 %v5045_v59  ;;  %v5540_v59 = vld [vmem:[%s6487_s16 + $0x74] sm:$0xf0] }
 0xcdf   : > { %v2606_v31 = vpop.xlane.xlu2 %2605 }
 0xce0   : > { %5812 = vrcp.f32 %v2606_v31  ;;  %v5811_v32 = vpop.eup %5810  ;;  %v5554_v31 = vld [vmem:[%s6487_s16 + $0xec] sm:$0xf] }
 0xce1   : > { %v2665_v61 = vmul.f32 %v5811_v32, %v5803_v7  ;;  %v5050_v32 = vld [vmem:[%s6487_s16 + $0xf8] sm:$0xf0] }
 0xce3   : > { %v2666_v39 = vpack.c.bf16 %v2665_v61, %v2665_v61 }
 0xce6   : > { %v5813_v60 = vpop.eup %5812 }
 0xce7   : > { %v2608_v0 = vmul.f32 %v5813_v60, %v5805_v9  ;;  %v2668_v26 = vpop.permute.xlu2 %2667  ;;  %v5053_v60 = vor.u32 %v5554_v31, %v5050_v32  ;;  %v5538_v32 = vld [vmem:[%s6487_s16 + $0x6c] sm:$0xf] }
 0xce8   : > { %v2673_v4 = vand.u32 %v2668_v26, %v6618_v11 }
 0xce9   : > { %v2609_v33 = vpack.c.bf16 %v2608_v0, %v2608_v0  ;;  %3094 = vmatpush.bf16.msrb.mxu1 %v5053_v60  ;;  %v4986_v60 = vld [vmem:[%s6487_s16 + $0x78] sm:$0xf0] }
 0xcea   : > { %2682 = vmatpush.bf16.msrb.mxu2 %v2673_v4 }
 0xceb   : > { %4889 = vmatmul.msk.bf16.vlgmr.msra.gmra.mxu0 %vm1323_vm2, %v2609_v33 }
 0xced   : > { %4891 = vmatmul.msk.bf16.vlgmr.msrb.gmra.mxu2 %vm1323_vm2, %v2666_v39  ;;  %v5024_v39 = vld [vmem:[%s6487_s16 + $0xc0] sm:$0xf] }
 0xcef   : > { %v2719_v40 = vpop.xlane.xlu0 %2718 }
 0xcf0   : > { %5814 = vrcp.f32 %v2719_v40  ;;  %v5551_v40 = vld [vmem:[%s6487_s16 + $0xcc] sm:$0xf0] }
 0xcf6   : > { %v2569_v13 = vpop.f32.mrf.mxu2  ;;  %v5815_v41 = vpop.eup %5814 }
 0xcf7   : > { %v2721_v34 = vmul.f32 %v5815_v41, %v5809_v28  ;;  %v5041_v28 = vor.u32 %v5555_v27, %v5040_v21  ;;  %v5026_v41 = vld [vmem:[%s6487_s16 + $0xd0] sm:$0xf0]  ;;  %v4976_v27 = vld [vmem:[%s6487_s16 + $0x60] sm:$0xf] }
 0xcf8   : > { %v4977_v2 = vor.u32 %v5539_v22, %v4976_v27 }
 0xcf9   : > { %v2722_v44 = vpack.c.bf16 %v2721_v34, %v2721_v34  ;;  %3055 = vmatpush.bf16.msra.mxu2 %v5041_v28  ;;  %v5032_v34 = vld [vmem:[%s6487_s16 + $0xc8] sm:$0xf]  ;;  %v5537_v28 = vld [vmem:[%s6487_s16 + $0x64] sm:$0xf] }
 0xcfe   : > { %v2571_v12 = vpop.f32.mrf.mxu2 }
 0xcff   : > { %v5025_v12 = vor.u32 %v5551_v40, %v5024_v39  ;;  %v4962_v40 = vld [vmem:[%s6487_s16 + $0x50] sm:$0xf0] }
 0xd01   : > { %3056 = vmatpush.bf16.msra.mxu2 %v5025_v12  ;;  %v5536_v12 = vld [vmem:[%s6487_s16 + $0x54] sm:$0xf0] }
 0xd02   : > { %v2724_v42 = vpop.permute.xlu0 %2723 }
 0xd03   : > { %v2729_v43 = vand.u32 %v2724_v42, %v6618_v11  ;;  %v5552_v42 = vld [vmem:[%s6487_s16 + $0xd4] sm:$0xf0] }
 0xd05   : > { %2738 = vmatpush.bf16.msrb.mxu0 %v2729_v43 }
 0xd08   : > { %4893 = vmatmul.msk.bf16.vlgmr.msrb.gmra.mxu0 %vm1323_vm2, %v2722_v44  ;;  %v5033_v44 = vor.u32 %v5552_v42, %v5032_v34  ;;  %v5534_v42 = vld [vmem:[%s6487_s16 + $0x4c] sm:$0xf] }
 0xd68   : > { %v2628_v45 = vpop.f32.mrf.mxu0 }
 0xd69   : > { %2745 = vrot.lane.b32.xlu1 %v2628_v45, %s6181_s30  ;;  %v5550_v45 = vld [vmem:[%s6487_s16 + $0xcc] sm:$0xf] }
 0xd70   : > { %v2630_v36 = vpop.f32.mrf.mxu0  ;;  %v2684_v63 = vpop.f32.mrf.mxu2 }
 0xd71   : > { %2749 = vrot.lane.b32.xlu2 %v2684_v63, %s6178_s12  ;;  %v5034_v36 = vld [vmem:[%s6487_s16 + $0xd8] sm:$0xf0] }
 0xd72   : > { %v5037_v63 = vor.u32 %v5550_v45, %v5034_v36  ;;  %v4944_v45 = vld [vmem:[%s6487_s16 + $0x20] sm:$0xf]  ;;  %v5531_v36 = vld [vmem:[%s6487_s16 + $0x2c] sm:$0xf0] }
 0xd74   : > { %3095 = vmatpush.bf16.msrb.mxu1 %v5037_v63  ;;  %v5529_v63 = vld [vmem:[%s6487_s16 + $0x24] sm:$0xf] }
 0xd78   : > { %v2686_v24 = vpop.f32.mrf.mxu2 }
 0xd79   : > { %v5008_v24 = vld [vmem:[%s6487_s16 + $0xa0] sm:$0xf] }
 0xd85   : > { %v2740_v47 = vpop.f32.mrf.mxu0 }
 0xd86   : > { %2753 = vrot.lane.b32.xlu1 %v2740_v47, %s6179_s21  ;;  %v5547_v47 = vld [vmem:[%s6487_s16 + $0xac] sm:$0xf0] }
 0xd87   : > { %v5009_v48 = vor.u32 %v5547_v47, %v5008_v24  ;;  %v4945_v24 = vor.u32 %v5531_v36, %v4944_v45  ;;  %v4946_v47 = vld [vmem:[%s6487_s16 + $0x30] sm:$0xf0]  ;;  %v5569_v45 = vld [vmem:[%s6491_s17 + $0x60] sm:$0xff]  ;;  %v5575_v36 = vld [vmem:[%s6491_s17 + $0x90] sm:$0xff] }
 0xd89   : > { %3057 = vmatpush.bf16.msra.mxu2 %v5009_v48  ;;  %v5532_v48 = vld [vmem:[%s6487_s16 + $0x34] sm:$0xf0] }
 0xd8d   : > { %v2742_v11 = vpop.f32.mrf.mxu0 }
 0xd8e   : > { %v5545_v11 = vld [vmem:[%s6487_s16 + $0xa4] sm:$0xf] }
 0xd8f   : > { %v5013_v52 = vor.u32 %v5545_v11, %v5010_v25  ;;  %v4952_v11 = vld [vmem:[%s6487_s16 + $0x28] sm:$0xf]  ;;  %v4949_v25 = vor.u32 %v5529_v63, %v4946_v47  ;;  %v5583_v63 = vld [vmem:[%s6491_s17 + $0xd0] sm:$0xff]  ;;  %v5568_v47 = vld [vmem:[%s6491_s17 + $0x58] sm:$0xff] }
 0xd90   : > { %v4953_v49 = vor.u32 %v5532_v48, %v4952_v11  ;;  %v5574_v11 = vld [vmem:[%s6491_s17 + $0x88] sm:$0xff] }
 0xd91   : > { %v5582_v48 = vld [vmem:[%s6491_s17 + $0xc8] sm:$0xff] }
 0xdcb   : > { %v2750_v5 = vpop.permute.xlu2 %2749 }
 0xddb   : > { %v2746_v58 = vpop.permute.xlu1 %2745 }
 0xddc   : > { %v2756_v62 = vsel %vm1289_vm14, %v2569_v13, %v2746_v58  ;;  %v5549_v13 = vld [vmem:[%s6487_s16 + $0xc4] sm:$0xf]  ;;  %v5021_v58 = vor.u32 %v5546_v55, %v5018_v46  ;;  %v5527_v46 = vld [vmem:[%s6487_s16 + $0xc] sm:$0xf0] }
 0xddd   : > { %v2757_v6 = vsel %vm1531_vm3, %v2756_v62, %v2750_v5  ;;  %v5029_v43 = vor.u32 %v5549_v13, %v5026_v41  ;;  %v4992_v62 = vld [vmem:[%s6487_s16 + $0x80] sm:$0xf]  ;;  %v5543_v5 = vld [vmem:[%s6487_s16 + $0x8c] sm:$0xf0]  ;;  %v4968_v13 = vld [vmem:[%s6487_s16 + $0x48] sm:$0xf] }
 0xdde   : > { %3096 = vmatpush.bf16.msrb.mxu1 %v5021_v58  ;;  %v4969_v34 = vor.u32 %v5536_v12, %v4968_v13  ;;  %v5525_v58 = vld [vmem:[%s6487_s16 + $0x4] sm:$0xf]  ;;  %v5577_v13 = vld [vmem:[%s6491_s17 + $0xa0] sm:$0xff] }
 0xddf   : > { %3069 = vmatpush.bf16.msrb.mxu3 %v5029_v43  ;;  %v4970_v43 = vld [vmem:[%s6487_s16 + $0x58] sm:$0xf0]  ;;  %v5585_v12 = vld [vmem:[%s6491_s17 + $0xe0] sm:$0xff] }
 0xde3   : > { %3070 = vmatpush.bf16.msrb.mxu3 %v5013_v52  ;;  %v4954_v52 = vld [vmem:[%s6487_s16 + $0x38] sm:$0xf0] }
 0xde4   : > { %v4957_v55 = vor.u32 %v5530_v50, %v4954_v52 }
 0xdf8   : > { %v2754_v53 = vpop.permute.xlu1 %2753 }
 0xdf9   : > { %v2758_v7 = vsel %vm1533_vm4, %v2757_v6, %v2754_v53  ;;  %v5541_v53 = vld [vmem:[%s6487_s16 + $0x84] sm:$0xf]  ;;  %v4993_v6 = vor.u32 %v5543_v5, %v4992_v62  ;;  %v4930_v62 = vld [vmem:[%s6487_s16 + $0x10] sm:$0xf0] }
 0xdfa   : > { %v2759_v56 = vpack.c.bf16 %v2758_v7, %v2758_v7  ;;  %v4994_v7 = vld [vmem:[%s6487_s16 + $0x90] sm:$0xf0] }
 0xdfb   : > { %3058 = vmatpush.bf16.msra.mxu2 %v4993_v6  ;;  %v4936_v6 = vld [vmem:[%s6487_s16 + $0x8] sm:$0xf] }
 0xdfc   : > { %2832 = vmatmul.bf16.vlgmr.msra.gmra.mxu1 %v2759_v56  ;;  %v5000_v56 = vld [vmem:[%s6487_s16 + $0x88] sm:$0xf] }
 0xdff   : > { %3059 = vmatpush.bf16.msra.mxu2 %v4977_v2 }
 0xe79   : > { %v2833_v8 = vpop.f32.mrf.mxu1 }
 0xe7a   : > { %v2834_v9 = vadd.f32 %v2833_v8, %v1552_v57  ;;  %v5049_v57 = vor.u32 %v5556_v29, %v5048_v54  ;;  %v5544_v8 = vld [vmem:[%s6487_s16 + $0x94] sm:$0xf0]  ;;  %v4978_v54 = vld [vmem:[%s6487_s16 + $0x70] sm:$0xf0]  ;;  %v4984_v29 = vld [vmem:[%s6487_s16 + $0x68] sm:$0xf] }
 0xe7b   : > { %v4985_v31 = vor.u32 %v5540_v59, %v4984_v29 }
 0xe7c   : > { %v7019_v10 = vadd.f32 %v5835_v18, %v2834_v9  ;;  %3081 = vmatpush.bf16.msra.mxu0 %v5049_v57  ;;  %v4997_v9 = vor.u32 %v5541_v53, %v4994_v7  ;;  %v5001_v18 = vor.u32 %v5544_v8, %v5000_v56  ;;  %v4981_v57 = vor.u32 %v5537_v28, %v4978_v54  ;;  %v5528_v7 = vld [vmem:[%s6487_s16 + $0x14] sm:$0xf0]  ;;  %v5526_v56 = vld [vmem:[%s6487_s16 + $0xc] sm:$0xf] }
 0xe7d   : > { %v4933_v53 = vor.u32 %v5525_v58, %v4930_v62  ;;  %v4937_v8 = vor.u32 %v5528_v7, %v4936_v6  ;;  %v5581_v58 = vld [vmem:[%s6491_s17 + $0xc0] sm:$0xff]  ;;  %v5566_v6 = vld [vmem:[%s6491_s17 + $0x48] sm:$0xff] }
 0xe7e   : > { %v2838_v14 = vsel %vm1046_vm9, %v7019_v10, 0.0  ;;  %3071 = vmatpush.bf16.msrb.mxu3 %v4997_v9  ;;  %v4938_v9 = vld [vmem:[%s6487_s16 + $0x18] sm:$0xf0] }
 0xe7f   : > { %2839 = vadd.xlane.f32.xlu2 %v2838_v14  ;;  %v5542_v14 = vld [vmem:[%s6487_s16 + $0x8c] sm:$0xf] }
 0xe80   : > { %3082 = vmatpush.bf16.msra.mxu0 %v5033_v44  ;;  %v4973_v44 = vor.u32 %v5534_v42, %v4970_v43  ;;  %v5576_v42 = vld [vmem:[%s6491_s17 + $0x98] sm:$0xff] }
 0xe81   : > { %v2835_v16 = vpop.f32.mrf.mxu1  ;;  %v5584_v43 = vld [vmem:[%s6491_s17 + $0xd8] sm:$0xff] }
 0xe82   : > { %v5002_v16 = vld [vmem:[%s6487_s16 + $0x98] sm:$0xf0]  ;;  %3072 = vmatpush.bf16.msrb.mxu3 %v4981_v57 }
 0xe83   : > { %v5005_v21 = vor.u32 %v5542_v14, %v5002_v16 }
 0xe84   : > { %3083 = vmatpush.bf16.msra.mxu0 %v5017_v1  ;;  %v4928_v1 = vld [vmem:[%s6487_s16] sm:$0xf] }
 0xe85   : > { %3097 = vmatpush.bf16.msrb.mxu1 %v5005_v21  ;;  %v4929_v5 = vor.u32 %v5527_v46, %v4928_v1  ;;  %v5573_v46 = vld [vmem:[%s6491_s17 + $0x80] sm:$0xff] }
 0xe88   : > { %3084 = vmatpush.bf16.msra.mxu0 %v5001_v18  ;;  %v4941_v18 = vor.u32 %v5526_v56, %v4938_v9 }
 0xe8c   : > { %3085 = vmatpush.bf16.msra.mxu0 %v4985_v31 }
 0xe90   : > { %3086 = vmatpush.bf16.msra.mxu0 %v4969_v34  ;;  %v5570_v34 = vld [vmem:[%s6491_s17 + $0x68] sm:$0xff] }
 0xe94   : > { %3087 = vmatpush.bf16.msra.mxu0 %v4953_v49  ;;  %v5567_v49 = vld [vmem:[%s6491_s17 + $0x50] sm:$0xff] }
 0xe98   : > { %3088 = vmatpush.bf16.msra.mxu0 %v4937_v8 }
 0xef2   : > { %v2840_v61 = vpop.xlane.xlu2 %2839 }
 0xef3   : > { %v2841_v0 = vmul.f32 %v2840_v61, %v6541_v35  ;;  %v4989_v61 = vor.u32 %v5538_v32, %v4986_v60 }
 0xef5   : > { %v7033_v26 = vsub.f32 %v7019_v10, %v2841_v0  ;;  %v4960_v0 = vld [vmem:[%s6487_s16 + $0x40] sm:$0xf]  ;;  %3098 = vmatpush.bf16.msrb.mxu1 %v4989_v61 }
 0xef6   : > { %v5580_v61 = vld [vmem:[%s6491_s17 + $0xb8] sm:$0xff] }
 0xef7   : > { %v2843_v4 = vmul.f32 %v7033_v26, %v7033_v26  ;;  %3477 = vmatpush.bf16.msrb.mxu0 %v5580_v61 }
 0xef9   : > { %v2844_v33 = vsel %vm1046_vm9, %v2843_v4, 0.0  ;;  %v5535_v4 = vld [vmem:[%s6487_s16 + $0x4c] sm:$0xf0]  ;;  %3099 = vmatpush.bf16.msrb.mxu1 %v4973_v44  ;;  %v5561_v44 = vld [vmem:[%s6491_s17 + $0x20] sm:$0xff] }
 0xefa   : > { %2845 = vadd.xlane.f32.xlu0 %v2844_v33  ;;  %v5533_v33 = vld [vmem:[%s6487_s16 + $0x44] sm:$0xf]  ;;  %v4961_v39 = vor.u32 %v5535_v4, %v4960_v0  ;;  %v5578_v4 = vld [vmem:[%s6491_s17 + $0xa8] sm:$0xff] }
 0xefb   : > { %v4965_v41 = vor.u32 %v5533_v33, %v4962_v40  ;;  %v5588_v0 = vld [vmem:[%s6491_s17 + $0xf8] sm:$0xff]  ;;  %v5586_v33 = vld [vmem:[%s6491_s17 + $0xe8] sm:$0xff]  ;;  %v5571_v40 = vld [vmem:[%s6491_s17 + $0x70] sm:$0xff] }
 0xefc   : > { %3060 = vmatpush.bf16.msra.mxu2 %v4961_v39  ;;  %v5563_v39 = vld [vmem:[%s6491_s17 + $0x30] sm:$0xff] }
 0xefd   : > { %3073 = vmatpush.bf16.msrb.mxu3 %v4965_v41  ;;  %3100 = vmatpush.bf16.msrb.mxu1 %v4957_v55  ;;  %v5562_v41 = vld [vmem:[%s6491_s17 + $0x28] sm:$0xff] }
 0xf00   : > { %3061 = vmatpush.bf16.msra.mxu2 %v4945_v24  ;;  %v5560_v24 = vld [vmem:[%s6491_s17 + $0x18] sm:$0xff] }
 0xf01   : > { %3074 = vmatpush.bf16.msrb.mxu3 %v4949_v25  ;;  %3101 = vmatpush.bf16.msrb.mxu1 %v4941_v18  ;;  %v5559_v25 = vld [vmem:[%s6491_s17 + $0x10] sm:$0xff]  ;;  %v5557_v18 = vld [vmem:[%s6491_s17] sm:$0xff] }
 0xf04   : > { %3062 = vmatpush.bf16.msra.mxu2 %v4929_v5 }
 0xf05   : > { %3075 = vmatpush.bf16.msrb.mxu3 %v4933_v53  ;;  %3490 = vmatpush.bf16.msra.mxu1 %v5588_v0  ;;  %v5558_v53 = vld [vmem:[%s6491_s17 + $0x8] sm:$0xff] }
 0xf08   : > { %3451 = vmatpush.bf16.msrb.mxu2 %v5564_v51 }
 0xf0c   : > { %3452 = vmatpush.bf16.msrb.mxu2 %v5563_v39 }
 0xf10   : > { %3453 = vmatpush.bf16.msrb.mxu2 %v5562_v41 }
 0xf14   : > { %3454 = vmatpush.bf16.msrb.mxu2 %v5561_v44 }
 0xf18   : > { %3455 = vmatpush.bf16.msrb.mxu2 %v5560_v24 }
 0xf1c   : > { %3456 = vmatpush.bf16.msrb.mxu2 %v5559_v25 }
 0xf20   : > { %3457 = vmatpush.bf16.msrb.mxu2 %v5558_v53 }
 0xf24   : > { %3458 = vmatpush.bf16.msrb.mxu2 %v5557_v18 }
 0xf6d   : > { %v2846_v14 = vpop.xlane.xlu0 %2845 }
 0xf6e   : > { %v2847_v16 = vmul.f32 %v2846_v14, %v6541_v35  ;;  %v5565_v14 = vld [vmem:[%s6491_s17 + $0x40] sm:$0xff] }
 0xf70   : > { %v2848_v21 = vadd.f32 1e-05, %v2847_v16 }
 0xf72   : > { %5816 = vrsqrt.f32 %v2848_v21  ;;  %vm2855_vm14 = vweird.f32 %v2848_v21 }
 0xf78   : > { %v5817_v27 = vpop.eup %5816 }
 0xf79   : > { %v2850_v22 = vmul.f32 %v5817_v27, %v2848_v21  ;;  %vm2856_vm9 = vweird.f32 %v5817_v27 }
 0xf7a   : > { %vm2857_vm1 = vmor %vm2855_vm14, %vm2856_vm9 }
 0xf7b   : > { %v2851_v28 = vmul.f32 %v5817_v27, %v2850_v22 }
 0xf7d   : > { %v2852_v2 = vmul.f32 0.5, %v2851_v28 }
 0xf7f   : > { %v2853_v54 = vsub.f32 1.5, %v2852_v2 }
 0xf81   : > { %v2854_v29 = vmul.f32 %v5817_v27, %v2853_v54 }
 0xf83   : > { %v2858_v59 = vsel %vm2857_vm1, %v5817_v27, %v2854_v29 }
 0xf84   : > { %v2859_v57 = vmul.f32 %v2858_v59, %v7033_v26  ;;  %v5579_v26 = vld [vmem:[%s6491_s17 + $0xb0] sm:$0xff] }
 0xf85   : > { %3478 = vmatpush.bf16.msrb.mxu0 %v5579_v26 }
 0xf86   : > { %v2860_v31 = vmul.f32 %v2859_v57, %v1637_v19  ;;  %v5587_v19 = vld [vmem:[%s6491_s17 + $0xf0] sm:$0xff] }
 0xf87   : > { %3491 = vmatpush.bf16.msra.mxu1 %v5587_v19 }
 0xf88   : > { %v2861_v32 = vadd.f32 %v2860_v31, %v1639_v23  ;;  %v5572_v23 = vld [vmem:[%s6491_s17 + $0x78] sm:$0xff]  ;;  %s7328_s17 = smov (!%p5186_p1), %s7327_s25 }
 0xf89   : > { %3464 = vmatpush.bf16.msra.mxu3 %v5572_v23  ;;  %3479 = vmatpush.bf16.msrb.mxu0 %v5578_v4 }
 0xf8a   : > { %v2862_v60 = vpack.c.bf16 %v2861_v32, %v2861_v32 }
 0xf8b   : > { %3492 = vmatpush.bf16.msra.mxu1 %v5586_v33 }
 0xf8c   : > { %3063 = vmatmul.bf16.vlgmr.msra.gmra.mxu2 %v2862_v60  ;;  %3076 = vmatmul.bf16.vlgmr.msrb.gmra.mxu3 %v2862_v60 }
 0xf8d   : > { %3089 = vmatmul.bf16.vlgmr.msra.gmra.mxu0 %v2862_v60  ;;  %3102 = vmatmul.bf16.vlgmr.msrb.gmra.mxu1 %v2862_v60 }
 0xf8e   : > { %3465 = vmatpush.bf16.msra.mxu3 %v5571_v40  ;;  %3480 = vmatpush.bf16.msrb.mxu0 %v5577_v13 }
 0xf8f   : > { %3493 = vmatpush.bf16.msra.mxu1 %v5585_v12 }
 0xf92   : > { %3466 = vmatpush.bf16.msra.mxu3 %v5570_v34  ;;  %3481 = vmatpush.bf16.msrb.mxu0 %v5576_v42 }
 0xf93   : > { %3494 = vmatpush.bf16.msra.mxu1 %v5584_v43 }
 0xf96   : > { %3467 = vmatpush.bf16.msra.mxu3 %v5569_v45  ;;  %3482 = vmatpush.bf16.msrb.mxu0 %v5575_v36 }
 0xf97   : > { %3495 = vmatpush.bf16.msra.mxu1 %v5583_v63 }
 0xf9a   : > { %3468 = vmatpush.bf16.msra.mxu3 %v5568_v47  ;;  %3483 = vmatpush.bf16.msrb.mxu0 %v5574_v11 }
 0xf9b   : > { %3496 = vmatpush.bf16.msra.mxu1 %v5582_v48 }
 0xf9e   : > { %3469 = vmatpush.bf16.msra.mxu3 %v5567_v49  ;;  %3484 = vmatpush.bf16.msrb.mxu0 %v5573_v46 }
 0xf9f   : > { %3497 = vmatpush.bf16.msra.mxu1 %v5581_v58 }
 0xfa2   : > { %3470 = vmatpush.bf16.msra.mxu3 %v5566_v6 }
 0xfa6   : > { %3471 = vmatpush.bf16.msra.mxu3 %v5565_v14 }
0x100a   : > { %v3090_v50 = vpop.f32.mrf.mxu0  ;;  %v3103_v52 = vpop.f32.mrf.mxu1 }
0x100b   : > { %v7128_v1 = vadd.f32 %v3090_v50, %v1677_v17  ;;  %v7132_v55 = vadd.f32 %v3103_v52, %v1678_v20 }
0x100d   : > { %v5056_v62 = vmul.f32 -1.702, %v7128_v1  ;;  %v5057_v5 = vmul.f32 -1.702, %v7132_v55 }
0x100f   : > { %v3119_v17 = vmul.f32 1.442695, %v5056_v62  ;;  %v3121_v7 = vmul.f32 1.442695, %v5057_v5  ;;  %v3064_v56 = vpop.f32.mrf.mxu2  ;;  %v3077_v8 = vpop.f32.mrf.mxu3 }
0x1010   : > { %v7142_v20 = vadd.f32 %v3064_v56, %v1675_v30  ;;  %v7146_v9 = vadd.f32 %v3077_v8, %v1676_v37 }
0x1011   : > { %5818 = vpow2.f32 %v3119_v17 }
0x1012   : > { %5820 = vpow2.f32 %v3121_v7  ;;  %v5054_v16 = vmul.f32 -1.702, %v7142_v20  ;;  %v5055_v21 = vmul.f32 -1.702, %v7146_v9  ;;  %v3092_v27 = vpop.f32.mrf.mxu0  ;;  %v3105_v22 = vpop.f32.mrf.mxu1 }
0x1014   : > { %v3115_v28 = vmul.f32 1.442695, %v5054_v16  ;;  %v3117_v2 = vmul.f32 1.442695, %v5055_v21 }
0x1016   : > { %5822 = vpow2.f32 %v3115_v28 }
0x1017   : > { %v5819_v30 = vpop.eup %5818  ;;  %5824 = vpow2.f32 %v3117_v2  ;;  %v3066_v38 = vpop.f32.mrf.mxu2 }
0x1018   : > { %v3079_v37 = vpop.f32.mrf.mxu3  ;;  %v5821_v54 = vpop.eup %5820  ;;  %v3125_v29 = vadd.f32 1.0, %v5819_v30 }
0x1019   : > { %v3126_v59 = vadd.f32 1.0, %v5821_v54 }
0x101a   : > { %5826 = vrcp.f32 %v3125_v29  ;;  %v3166_v19 = vand.u32 2147483647, %v3125_v29  ;;  %v3168_v51 = vand.u32 2147483648, %v3125_v29  ;;  %vm3162_vm2 = vweird.f32 %v3125_v29 }
0x101b   : > { %5828 = vrcp.f32 %v3126_v59  ;;  %v3181_v33 = vand.u32 2147483647, %v3126_v59  ;;  %v3183_v39 = vand.u32 2147483648, %v3126_v59  ;;  %vm3177_vm5 = vweird.f32 %v3126_v59 }
0x101c   : > { %v5823_v57 = vpop.eup %5822  ;;  %vm7152_vm4 = vcmp.eq.f32.partialorder %v3166_v19, 8.507059e+37  ;;  %v3169_v42 = vor.u32 1.1754944e-38, %v3168_v51 }
0x101d   : > { %v5825_v31 = vpop.eup %5824  ;;  %v3123_v32 = vadd.f32 1.0, %v5823_v57  ;;  %vm7156_vm10 = vcmp.eq.f32.partialorder %v3181_v33, 8.507059e+37  ;;  %v3184_v63 = vor.u32 1.1754944e-38, %v3183_v39 }
0x101e   : > { %v3124_v60 = vadd.f32 1.0, %v5825_v31 }
0x101f   : > { %5830 = vrcp.f32 %v3123_v32  ;;  %v3136_v48 = vand.u32 2147483647, %v3123_v32  ;;  %v3138_v25 = vand.u32 2147483648, %v3123_v32  ;;  %vm3132_vm0 = vweird.f32 %v3123_v32 }
0x1020   : > { %v5827_v61 = vpop.eup %5826  ;;  %5832 = vrcp.f32 %v3124_v60  ;;  %v3151_v52 = vand.u32 2147483647, %v3124_v60  ;;  %v3153_v46 = vand.u32 2147483648, %v3124_v60  ;;  %vm3147_vm7 = vweird.f32 %v3124_v60 }
0x1021   : > { %v5829_v0 = vpop.eup %5828  ;;  %v3158_v26 = vmul.f32 %v5827_v61, %v3125_v29  ;;  %vm3163_vm3 = vweird.f32 %v5827_v61  ;;  %v3139_v18 = vor.u32 1.1754944e-38, %v3138_v25  ;;  %vm3137_vm9 = vcmp.eq.f32.partialorder %v3136_v48, 8.507059e+37 }
0x1022   : > { %v3173_v23 = vmul.f32 %v5829_v0, %v3126_v59  ;;  %vm3178_vm8 = vweird.f32 %v5829_v0  ;;  %vm3164_vm11 = vmor %vm3162_vm2, %vm3163_vm3  ;;  %v3154_v27 = vor.u32 1.1754944e-38, %v3153_v46  ;;  %vm3152_vm1 = vcmp.eq.f32.partialorder %v3151_v52, 8.507059e+37 }
0x1023   : > { %v3159_v4 = vsub.f32 1.0, %v3158_v26  ;;  %vm3179_vm12 = vmor %vm3177_vm5, %vm3178_vm8 }
0x1024   : > { %v3174_v40 = vsub.f32 1.0, %v3173_v23 }
0x1025   : > { %v5831_v13 = vpop.eup %5830  ;;  %v3160_v12 = vmul.f32 %v5827_v61, %v3159_v4 }
0x1026   : > { %v5833_v34 = vpop.eup %5832  ;;  %v3175_v43 = vmul.f32 %v5829_v0, %v3174_v40  ;;  %v3128_v44 = vmul.f32 %v5831_v13, %v3123_v32  ;;  %vm3133_vm13 = vweird.f32 %v5831_v13 }
0x1027   : > { %v3161_v45 = vadd.f32 %v5827_v61, %v3160_v12  ;;  %v3143_v24 = vmul.f32 %v5833_v34, %v3124_v60  ;;  %vm3148_vm15 = vweird.f32 %v5833_v34  ;;  %vm3134_vm6 = vmor %vm3132_vm0, %vm3133_vm13 }
0x1028   : > { %v3176_v47 = vadd.f32 %v5829_v0, %v3175_v43  ;;  %v3129_v11 = vsub.f32 1.0, %v3128_v44  ;;  %vm3149_vm14 = vmor %vm3147_vm7, %vm3148_vm15 }
0x1029   : > { %v3165_v49 = vsel %vm3164_vm11, %v5827_v61, %v3161_v45  ;;  %v3144_v50 = vsub.f32 1.0, %v3143_v24 }
0x102a   : > { %v3170_v58 = vsel %vm7152_vm4, %v3169_v42, %v3165_v49  ;;  %v3180_v62 = vsel %vm3179_vm12, %v5829_v0, %v3176_v47  ;;  %v3130_v5 = vmul.f32 %v5831_v13, %v3129_v11 }
0x102b   : > { %v3189_v53 = vmul.f32 %v3170_v58, %v7128_v1  ;;  %v3185_v6 = vsel %vm7156_vm10, %v3184_v63, %v3180_v62  ;;  %v3145_v17 = vmul.f32 %v5833_v34, %v3144_v50 }
0x102c   : > { %v3190_v7 = vmul.f32 %v3185_v6, %v7132_v55  ;;  %v3131_v56 = vadd.f32 %v5831_v13, %v3130_v5 }
0x102d   : > { %v3193_v8 = vpack.c.bf16 %v3189_v53, %v3189_v53  ;;  %v3146_v14 = vadd.f32 %v5833_v34, %v3145_v17 }
0x102e   : > { %v3194_v16 = vpack.c.bf16 %v3190_v7, %v3190_v7  ;;  %v3135_v21 = vsel %vm3134_vm6, %v5831_v13, %v3131_v56 }
0x102f   : > { %v3140_v1 = vsel %vm3137_vm9, %v3139_v18, %v3135_v21  ;;  %v3150_v22 = vsel %vm3149_vm14, %v5833_v34, %v3146_v14  ;;  %3485 = vmatmul.bf16.vlgmr.msrb.gmra.mxu0 %v3193_v8 }
0x1030   : > { %v3187_v28 = vmul.f32 %v3140_v1, %v7142_v20  ;;  %v3155_v2 = vsel %vm3152_vm1, %v3154_v27, %v3150_v22  ;;  %3498 = vmatmul.bf16.vlgmr.msra.gmra.mxu1 %v3194_v16 }
0x1031   : > { %v3188_v55 = vmul.f32 %v3155_v2, %v7146_v9 }
0x1032   : > { %v3191_v30 = vpack.c.bf16 %v3187_v28, %v3187_v28 }
0x1033   : > { %v3192_v38 = vpack.c.bf16 %v3188_v55, %v3188_v55 }
0x1034   : > { %3459 = vmatmul.bf16.vlgmr.msrb.gmra.mxu2 %v3191_v30 }
0x1035   : > { %3472 = vmatmul.bf16.vlgmr.msra.gmra.mxu3 %v3192_v38 }
0x10ac   : > { %v3486_v37 = vpop.f32.mrf.mxu0 }
0x10ad   : > { %v3499_v54 = vpop.f32.mrf.mxu1 }
0x10b4   : > { %v3488_v29 = vpop.f32.mrf.mxu0 }
0x10b5   : > { %v3501_v59 = vpop.f32.mrf.mxu1 }
0x10b7   : > { %v3460_v57 = vpop.f32.mrf.mxu2 }
0x10b8   : > { %v3461_v31 = vadd.f32 %v3460_v57, %v2047_v3  ;;  %v3473_v32 = vpop.f32.mrf.mxu3 }
0x10ba   : > { %v3474_v60 = vadd.f32 %v3473_v32, %v3461_v31 }
0x10bc   : > { %v3487_v61 = vadd.f32 %v3486_v37, %v3474_v60 }
0x10be   : > { %v3500_v20 = vadd.f32 %v3499_v54, %v3487_v61  ;;  %3508 = sbr.rel (%p5186_p1) target bundleno = 4299 (0x10cb), region = 128 }
0x10bf   : > { %v3462_v0 = vpop.f32.mrf.mxu2 }
0x10c0   : > { %v3503_v26 = vadd.f32 %v3500_v20, %v7019_v10  ;;  %v3475_v9 = vpop.f32.mrf.mxu3 }
0x10c2   : > { %3504 = vst [vmem:[#allocation2 + $0x8] sm:$0x1f] %v3503_v26 }
0x10c3   : > { %v3509_v19 = vld [vmem:[#allocation2] sm:$0x1f] }
0x10c4   : > { %3511 = vst [vmem:[%s7327_s25] sm:$0x1f] %v3509_v19 }
0x10c9   : > { %v3510_v51 = vld [vmem:[#allocation2 + $0x8] sm:$0x1f] }
0x10ca   : > { %3512 = vst [vmem:[%s7328_s17 + $0x8] sm:$0x1f] %v3510_v51 }
0x10cb PF: > { %p5187_p4 = scmp.ne.s32.totalorder %s6292_s28, 2 }
0x10cc   : > { %s7329_s27 = sld [smem:[#allocation33_spill]] (!%p5187_p4) }
0x10cd   : > { %3516 = sbr.rel (%p5187_p4) target bundleno = 5656 (0x1618), region = 132  ;;  %s7331_s11 = sld [smem:[#allocation34_spill]] (!%p5187_p4) }
0x10ce   : > { %s7332_s23 = sld [smem:[#allocation35_spill]] (!%p5187_p4) }
0x10cf   : > { %s7333_s21 = sld [smem:[#allocation37_spill]] (!%p5187_p4) }
0x10d2   : > { %v3519_v15 = vld [vmem:[#allocation2] sm:$0x1f]  ;;  %vm3521_vm2 = vcmask 1040384   ;;  %v3520_v10 = vld [vmem:[#allocation2 + $0x8] sm:$0x1f]  ;;  %v6182_v25 = vmov 2.0   ;;  %s7330_s3 = smov %s7329_s27 }
0x10d3   : > { %v3522_v3 = vsel %vm3521_vm2, %v3519_v15, 0.0  ;;  %v3525_v23 = vsel %vm3521_vm2, %v3520_v10, 0.0  ;;  %v3517_v14 = vld [vmem:[%s7329_s27] sm:$0x1]  ;;  %v3518_v22 = vld [vmem:[%s7330_s3 + $0x1] sm:$0x1] }
0x10d4   : > { %3523 = vadd.xlane.f32.xlu0 %v3522_v3  ;;  %v5596_v32 = vld [vmem:[#allocation12 + $0x38] sm:$0xff]  ;;  %v5595_v9 = vld [vmem:[#allocation12 + $0x30] sm:$0xff]  ;;  %v5594_v19 = vld [vmem:[#allocation12 + $0x28] sm:$0xff] }
0x10d5   : > { %3677 = vmatpush.bf16.msra.mxu0 %v5596_v32  ;;  %v5593_v51 = vld [vmem:[#allocation12 + $0x20] sm:$0xff]  ;;  %v5591_v3 = vld [vmem:[#allocation12 + $0x10] sm:$0xff] }
0x10d6   : > { %v5615_v32 = vld [vmem:[#allocation12 + $0xd0] sm:$0xff] }
0x10d9   : > { %3678 = vmatpush.bf16.msra.mxu0 %v5595_v9  ;;  %v5628_v9 = vld [vmem:[#allocation13 + $0x38] sm:$0xff] }
0x10dc   : > { %3526 = vadd.xlane.f32.xlu0 %v3525_v23  ;;  %v5589_v23 = vld [vmem:[#allocation12] sm:$0xff] }
0x10dd   : > { %3679 = vmatpush.bf16.msra.mxu0 %v5594_v19 }
0x10e1   : > { %3680 = vmatpush.bf16.msra.mxu0 %v5593_v51 }
0x1147   : > { %v3524_v4 = vpop.xlane.xlu0 %3523 }
0x1148   : > { %v3528_v33 = vmul.f32 %v3524_v4, %v6541_v35  ;;  %v5604_v4 = vld [vmem:[#allocation12 + $0x78] sm:$0xff] }
0x1149   : > { %3758 = vmatpush.bf16.msra.mxu1 %v5604_v4  ;;  %v5626_v4 = vld [vmem:[#allocation13 + $0x28] sm:$0xff] }
0x114a   : > { %v3530_v39 = vsub.f32 %v3519_v15, %v3528_v33  ;;  %v5592_v15 = vld [vmem:[#allocation12 + $0x18] sm:$0xff] }
0x114b   : > { %3681 = vmatpush.bf16.msra.mxu0 %v5592_v15  ;;  %v5635_v15 = vld [vmem:[#allocation13 + $0x70] sm:$0xff] }
0x114c   : > { %v3532_v40 = vmul.f32 %v3530_v39, %v3530_v39 }
0x114e   : > { %v3534_v13 = vsel %vm3521_vm2, %v3532_v40, 0.0  ;;  %v5603_v40 = vld [vmem:[#allocation12 + $0x70] sm:$0xff] }
0x114f   : > { %3535 = vadd.xlane.f32.xlu1 %v3534_v13  ;;  %v3527_v12 = vpop.xlane.xlu0 %3526  ;;  %3682 = vmatpush.bf16.msra.mxu0 %v5591_v3  ;;  %v5627_v3 = vld [vmem:[#allocation13 + $0x30] sm:$0xff] }
0x1150   : > { %v3529_v41 = vmul.f32 %v3527_v12, %v6541_v35  ;;  %3759 = vmatpush.bf16.msra.mxu1 %v5603_v40  ;;  %v5602_v12 = vld [vmem:[#allocation12 + $0x68] sm:$0xff] }
0x1152   : > { %v3531_v34 = vsub.f32 %v3520_v10, %v3529_v41  ;;  %v5590_v10 = vld [vmem:[#allocation12 + $0x8] sm:$0xff]  ;;  %v5601_v41 = vld [vmem:[#allocation12 + $0x60] sm:$0xff] }
0x1153   : > { %3683 = vmatpush.bf16.msra.mxu0 %v5590_v10 }
0x1154   : > { %v3533_v42 = vmul.f32 %v3531_v34, %v3531_v34  ;;  %3760 = vmatpush.bf16.msra.mxu1 %v5602_v12  ;;  %v5632_v12 = vld [vmem:[#allocation13 + $0x58] sm:$0xff] }
0x1156   : > { %v3537_v43 = vsel %vm3521_vm2, %v3533_v42, 0.0 }
0x1157   : > { %3538 = vadd.xlane.f32.xlu1 %v3537_v43  ;;  %3684 = vmatpush.bf16.msra.mxu0 %v5589_v23  ;;  %v5600_v43 = vld [vmem:[#allocation12 + $0x58] sm:$0xff]  ;;  %v5634_v23 = vld [vmem:[#allocation13 + $0x68] sm:$0xff] }
0x1158   : > { %3761 = vmatpush.bf16.msra.mxu1 %v5601_v41 }
0x115c   : > { %3762 = vmatpush.bf16.msra.mxu1 %v5600_v43  ;;  %v5623_v43 = vld [vmem:[#allocation13 + $0x10] sm:$0xff] }
0x11c2   : > { %v3536_v44 = vpop.xlane.xlu1 %3535 }
0x11c3   : > { %v3540_v45 = vmul.f32 %v3536_v44, %v6541_v35 }
0x11c5   : > { %v3542_v36 = vadd.f32 1e-05, %v3540_v45 }
0x11c7   : > { %5836 = vrsqrt.f32 %v3542_v36  ;;  %vm3550_vm4 = vweird.f32 %v3542_v36 }
0x11c8   : > { %5838 = vrcp.f32 %v6182_v25 }
0x11ca   : > { %v3539_v63 = vpop.xlane.xlu1 %3538 }
0x11cb   : > { %v3541_v24 = vmul.f32 %v3539_v63, %v6541_v35 }
0x11cd   : > { %v5837_v47 = vpop.eup %5836  ;;  %v3543_v11 = vadd.f32 1e-05, %v3541_v24 }
0x11ce   : > { %v3545_v48 = vmul.f32 %v5837_v47, %v3542_v36  ;;  %v5839_v52 = vpop.eup %5838  ;;  %vm3551_vm3 = vweird.f32 %v5837_v47  ;;  %v5599_v36 = vld [vmem:[#allocation12 + $0x50] sm:$0xff] }
0x11cf   : > { %5840 = vrsqrt.f32 %v3543_v11  ;;  %vm3552_vm5 = vmor %vm3550_vm4, %vm3551_vm3  ;;  %v3574_v53 = vmul.f32 2.0, %v5839_v52  ;;  %vm3560_vm10 = vweird.f32 %v3543_v11  ;;  %vm3578_vm12 = vweird.f32 %v5839_v52  ;;  %3763 = vmatpush.bf16.msra.mxu1 %v5599_v36 }
0x11d0   : > { %v3546_v49 = vmul.f32 %v5837_v47, %v3545_v48 }
0x11d1   : > { %v3575_v8 = vsub.f32 1.0, %v3574_v53 }
0x11d2   : > { %v3547_v50 = vmul.f32 0.5, %v3546_v49 }
0x11d3   : > { %v3576_v27 = vmul.f32 %v5839_v52, %v3575_v8 }
0x11d4   : > { %v3548_v46 = vsub.f32 1.5, %v3547_v50 }
0x11d5   : > { %v5841_v58 = vpop.eup %5840  ;;  %v3577_v30 = vadd.f32 %v5839_v52, %v3576_v27 }
0x11d6   : > { %v3549_v62 = vmul.f32 %v5837_v47, %v3548_v46  ;;  %v3555_v5 = vmul.f32 %v5841_v58, %v3543_v11  ;;  %vm3561_vm8 = vweird.f32 %v5841_v58  ;;  %v5598_v11 = vld [vmem:[#allocation12 + $0x48] sm:$0xff] }
0x11d7   : > { %vm3562_vm11 = vmor %vm3560_vm10, %vm3561_vm8  ;;  %v3579_v29 = vsel %vm3578_vm12, %v5839_v52, %v3577_v30  ;;  %3764 = vmatpush.bf16.msra.mxu1 %v5598_v11  ;;  %v5619_v30 = vld [vmem:[#allocation12 + $0xf0] sm:$0xff]  ;;  %v5622_v11 = vld [vmem:[#allocation13 + $0x8] sm:$0xff] }
0x11d8   : > { %v3553_v6 = vsel %vm3552_vm5, %v5837_v47, %v3549_v62  ;;  %v3556_v17 = vmul.f32 %v5841_v58, %v3555_v5  ;;  %v7204_v47 = vld [vmem:[%s7331_s11] sm:$0xff] }
0x11d9   : > { %v3564_v56 = vmul.f32 %v3553_v6, %v3530_v39  ;;  %v3607_v49 = vrot.slane %v7204_v47, 1  ;;  %v3675_v62 = vrot.slane %v7204_v47, 2  ;;  %v3793_v36 = vrot.slane %v7204_v47, 4 }
0x11da   : > { %v3557_v7 = vmul.f32 0.5, %v3556_v17 }
0x11db   : > { %v3566_v21 = vmul.f32 %v3564_v56, %v3517_v14 }
0x11dc   : > { %v3558_v18 = vsub.f32 1.5, %v3557_v7  ;;  %v3756_v7 = vrot.slane %v7204_v47, 3 }
0x11dd   : > { %v3568_v55 = vadd.f32 %v3566_v21, %v3518_v22  ;;  %v5620_v21 = vld [vmem:[#allocation12 + $0xf8] sm:$0xff] }
0x11de   : > { %v3559_v16 = vmul.f32 %v5841_v58, %v3558_v18  ;;  %3953 = vmatpush.bf16.msra.mxu3 %v5620_v21 }
0x11df   : > { %v3570_v37 = vsel %vm3521_vm2, %v3568_v55, 0.0  ;;  %v5611_v55 = vld [vmem:[#allocation12 + $0xb0] sm:$0xff] }
0x11e0   : > { %v3563_v1 = vsel %vm3562_vm11, %v5841_v58, %v3559_v16  ;;  %v5597_v58 = vld [vmem:[#allocation12 + $0x40] sm:$0xff]  ;;  %v5612_v16 = vld [vmem:[#allocation12 + $0xb8] sm:$0xff] }
0x11e1   : > { %v3565_v28 = vmul.f32 %v3563_v1, %v3531_v34  ;;  %3765 = vmatpush.bf16.msra.mxu1 %v5597_v58  ;;  %3867 = vmatpush.bf16.msra.mxu2 %v5612_v16 }
0x11e2   : > { %3954 = vmatpush.bf16.msra.mxu3 %v5619_v30 }
0x11e3   : > { %v3567_v2 = vmul.f32 %v3565_v28, %v3517_v14 }
0x11e5   : > { %v3569_v38 = vadd.f32 %v3567_v2, %v3518_v22  ;;  %3868 = vmatpush.bf16.msra.mxu2 %v5611_v55  ;;  %4110 = vmatpush.bf16.msrb.mxu1 %v5628_v9  ;;  %v4123_v55 = vld [vmem:[%s7332_s23] sm:$0x1] }
0x11e7   : > { %v3571_v54 = vsel %vm3521_vm2, %v3569_v38, 0.0  ;;  %v5610_v38 = vld [vmem:[#allocation12 + $0xa8] sm:$0xff] }
0x11e8   : > { %v3572_v59 = vadd.f32 %v3571_v54, %v3570_v37  ;;  %v5618_v37 = vld [vmem:[#allocation12 + $0xe8] sm:$0xff]  ;;  %v5609_v54 = vld [vmem:[#allocation12 + $0xa0] sm:$0xff] }
0x11e9   : > { %3869 = vmatpush.bf16.msra.mxu2 %v5610_v38  ;;  %3955 = vmatpush.bf16.msra.mxu3 %v5618_v37 }
0x11ea   : > { %v3580_v57 = vmul.f32 %v3579_v29, %v3572_v59  ;;  %v5617_v29 = vld [vmem:[#allocation12 + $0xe0] sm:$0xff]  ;;  %v5608_v59 = vld [vmem:[#allocation12 + $0x98] sm:$0xff]  ;;  %4111 = vmatpush.bf16.msrb.mxu1 %v5627_v3 }
0x11ec   : > { %v3583_v31 = vsel %vm3521_vm2, %v3580_v57, 0.0 }
0x11ed   : > { %3584 = vadd.xlane.f32.xlu2 %v3583_v31  ;;  %3870 = vmatpush.bf16.msra.mxu2 %v5609_v54  ;;  %v5607_v31 = vld [vmem:[#allocation12 + $0x90] sm:$0xff] }
0x11ee   : > { %3956 = vmatpush.bf16.msra.mxu3 %v5617_v29  ;;  %4112 = vmatpush.bf16.msrb.mxu1 %v5626_v4 }
0x11f1   : > { %3871 = vmatpush.bf16.msra.mxu2 %v5608_v59 }
0x11f5   : > { %3872 = vmatpush.bf16.msra.mxu2 %v5607_v31 }
0x1260   : > { %v3585_v60 = vpop.xlane.xlu2 %3584 }
0x1261   : > { %v3586_v61 = vmul.f32 %v3585_v60, %v6541_v35  ;;  %v5606_v60 = vld [vmem:[#allocation12 + $0x88] sm:$0xff] }
0x1262   : > { %3873 = vmatpush.bf16.msra.mxu2 %v5606_v60 }
0x1263   : > { %v3587_v20 = vsub.f32 %v3580_v57, %v3586_v61  ;;  %v5616_v57 = vld [vmem:[#allocation12 + $0xd8] sm:$0xff]  ;;  %v5614_v61 = vld [vmem:[#allocation12 + $0xc8] sm:$0xff] }
0x1264   : > { %3957 = vmatpush.bf16.msra.mxu3 %v5616_v57 }
0x1265   : > { %v3588_v0 = vmul.f32 %v3587_v20, %v3587_v20 }
0x1267   : > { %v3589_v26 = vsel %vm3521_vm2, %v3588_v0, 0.0  ;;  %v5613_v0 = vld [vmem:[#allocation12 + $0xc0] sm:$0xff] }
0x1268   : > { %3590 = vadd.xlane.f32.xlu2 %v3589_v26  ;;  %3958 = vmatpush.bf16.msra.mxu3 %v5615_v32  ;;  %v5636_v26 = vld [vmem:[#allocation13 + $0x78] sm:$0xff] }
0x1269   : > { %4049 = vmatpush.bf16.msrb.mxu0 %v5636_v26 }
0x126c   : > { %3959 = vmatpush.bf16.msra.mxu3 %v5614_v61 }
0x126d   : > { %4050 = vmatpush.bf16.msrb.mxu0 %v5635_v15 }
0x1270   : > { %3960 = vmatpush.bf16.msra.mxu3 %v5613_v0 }
0x1271   : > { %4051 = vmatpush.bf16.msrb.mxu0 %v5634_v23 }
0x12db   : > { %v3591_v33 = vpop.xlane.xlu2 %3590 }
0x12dc   : > { %v3592_v39 = vmul.f32 %v3591_v33, %v6541_v35  ;;  %v5633_v33 = vld [vmem:[#allocation13 + $0x60] sm:$0xff] }
0x12dd   : > { %4052 = vmatpush.bf16.msrb.mxu0 %v5633_v33 }
0x12de   : > { %v3593_v13 = vadd.f32 1e-05, %v3592_v39  ;;  %v5625_v39 = vld [vmem:[#allocation13 + $0x20] sm:$0xff] }
0x12df   : > { %4113 = vmatpush.bf16.msrb.mxu1 %v5625_v39 }
0x12e0   : > { %5842 = vrsqrt.f32 %v3593_v13  ;;  %vm3600_vm15 = vweird.f32 %v3593_v13 }
0x12e1   : > { %4053 = vmatpush.bf16.msrb.mxu0 %v5632_v12 }
0x12e6   : > { %v5843_v34 = vpop.eup %5842 }
0x12e7   : > { %v3595_v42 = vmul.f32 %v5843_v34, %v3593_v13  ;;  %vm3601_vm13 = vweird.f32 %v5843_v34 }
0x12e8   : > { %vm3602_vm0 = vmor %vm3600_vm15, %vm3601_vm13 }
0x12e9   : > { %v3596_v44 = vmul.f32 %v5843_v34, %v3595_v42  ;;  %v5631_v42 = vld [vmem:[#allocation13 + $0x50] sm:$0xff] }
0x12ea   : > { %4054 = vmatpush.bf16.msrb.mxu0 %v5631_v42 }
0x12eb   : > { %v3597_v45 = vmul.f32 0.5, %v3596_v44 }
0x12ed   : > { %v3598_v63 = vsub.f32 1.5, %v3597_v45 }
0x12ef   : > { %v3599_v24 = vmul.f32 %v5843_v34, %v3598_v63  ;;  %v3880_v63 = vrot.slane %v7204_v47, 7 }
0x12f1   : > { %v3603_v48 = vsel %vm3602_vm0, %v5843_v34, %v3599_v24  ;;  %v5630_v24 = vld [vmem:[#allocation13 + $0x48] sm:$0xff] }
0x12f2   : > { %v3604_v25 = vmul.f32 %v3603_v48, %v3587_v20  ;;  %v5605_v20 = vld [vmem:[#allocation12 + $0x80] sm:$0xff]  ;;  %4055 = vmatpush.bf16.msrb.mxu0 %v5630_v24 }
0x12f3   : > { %3874 = vmatpush.bf16.msra.mxu2 %v5605_v20 }
0x12f4   : > { %v3605_v50 = vmul.f32 %v3604_v25, %v7204_v47 }
0x12f6   : > { %v3609_v52 = vadd.f32 %v3607_v49, %v3605_v50  ;;  %v3796_v49 = vrot.slane %v7204_v47, 5  ;;  %v3582_v50 = vld [vmem:[%s7331_s11 + $0x8] sm:$0x3] }
0x12f8   : > { %v3610_v46 = vpack.c.bf16 %v3609_v52, %v3609_v52 }
0x12fa   : > { %3685 = vmatmul.bf16.vlgmr.msra.gmra.mxu0 %v3610_v46 }
0x1377   : > { %v3686_v5 = vpop.f32.mrf.mxu0 }
0x1378   : > { %v3687_v53 = vadd.f32 %v3686_v5, %v3675_v62 }
0x137a   : > { %v3690_v6 = vpack.c.bf16 %v3687_v53, %v3687_v53 }
0x137c   : > { %3766 = vmatmul.bf16.vlgmr.msra.gmra.mxu1 %v3690_v6  ;;  %v5629_v6 = vld [vmem:[#allocation13 + $0x40] sm:$0xff] }
0x137d   : > { %4056 = vmatpush.bf16.msrb.mxu0 %v5629_v6 }
0x137f   : > { %v3688_v17 = vpop.f32.mrf.mxu0 }
0x1380   : > { %v5621_v17 = vld [vmem:[#allocation13] sm:$0xff] }
0x13f9   : > { %v3767_v56 = vpop.f32.mrf.mxu1 }
0x13fa   : > { %v3768_v8 = vadd.f32 %v3767_v56, %v3756_v7  ;;  %v3865_v7 = vrot.slane %v7204_v47, 6  ;;  %v3951_v56 = vrot.slane %v3582_v50, 1 }
0x13fc   : > { %v3771_v18 = vsel %vm3521_vm2, %v3768_v8, 0.0 }
0x13fd   : > { %3772 = vadd.xlane.f32.xlu0 %v3771_v18 }
0x1401   : > { %v3769_v14 = vpop.f32.mrf.mxu1 }
0x1470   : > { %v3773_v27 = vpop.xlane.xlu0 %3772 }
0x1471   : > { %v3774_v1 = vmul.f32 %v3773_v27, %v6541_v35 }
0x1473   : > { %v7212_v22 = vsub.f32 %v3768_v8, %v3774_v1 }
0x1475   : > { %v3776_v28 = vmul.f32 %v7212_v22, %v7212_v22 }
0x1477   : > { %v3777_v2 = vsel %vm3521_vm2, %v3776_v28, 0.0 }
0x1478   : > { %3778 = vadd.xlane.f32.xlu1 %v3777_v2 }
0x14eb   : > { %v3779_v19 = vpop.xlane.xlu1 %3778 }
0x14ec   : > { %v3780_v51 = vmul.f32 %v3779_v19, %v6541_v35  ;;  %v5624_v35 = vld [vmem:[#allocation13 + $0x18] sm:$0xff] }
0x14ed   : > { %4114 = vmatpush.bf16.msrb.mxu1 %v5624_v35 }
0x14ee   : > { %v3781_v10 = vadd.f32 1e-05, %v3780_v51 }
0x14f0   : > { %5844 = vrsqrt.f32 %v3781_v10  ;;  %vm3788_vm7 = vweird.f32 %v3781_v10 }
0x14f1   : > { %4115 = vmatpush.bf16.msrb.mxu1 %v5623_v43 }
0x14f5   : > { %4116 = vmatpush.bf16.msrb.mxu1 %v5622_v11 }
0x14f6   : > { %v5845_v40 = vpop.eup %5844 }
0x14f7   : > { %v3783_v13 = vmul.f32 %v5845_v40, %v3781_v10  ;;  %vm3789_vm6 = vweird.f32 %v5845_v40 }
0x14f8   : > { %vm3790_vm9 = vmor %vm3788_vm7, %vm3789_vm6 }
0x14f9   : > { %v3784_v41 = vmul.f32 %v5845_v40, %v3783_v13  ;;  %4117 = vmatpush.bf16.msrb.mxu1 %v5621_v17 }
0x14fb   : > { %v3785_v34 = vmul.f32 0.5, %v3784_v41 }
0x14fd   : > { %v3786_v44 = vsub.f32 1.5, %v3785_v34 }
0x14ff   : > { %v3787_v45 = vmul.f32 %v5845_v40, %v3786_v44 }
0x1501   : > { %v3791_v48 = vsel %vm3790_vm9, %v5845_v40, %v3787_v45 }
0x1502   : > { %v3792_v25 = vmul.f32 %v3791_v48, %v7212_v22 }
0x1504   : > { %v3795_v52 = vmul.f32 %v3793_v36, %v3792_v25  ;;  %v3882_v46 = vmul.f32 %v3880_v63, %v3792_v25 }
0x1506   : > { %v3798_v58 = vadd.f32 %v3796_v49, %v3795_v52  ;;  %v3883_v62 = vadd.f32 %v3882_v46, %v3582_v50 }
0x1508   : > { %v3799_v5 = vpack.c.bf16 %v3798_v58, %v3798_v58  ;;  %v3884_v53 = vpack.c.bf16 %v3883_v62, %v3883_v62 }
0x150a   : > { %3875 = vmatmul.bf16.vlgmr.msra.gmra.mxu2 %v3799_v5  ;;  %3961 = vmatmul.bf16.vlgmr.msra.gmra.mxu3 %v3884_v53 }
0x158d   : > { %v3876_v8 = vpop.f32.mrf.mxu2  ;;  %v3962_v18 = vpop.f32.mrf.mxu3 }
0x158e   : > { %v3877_v14 = vadd.f32 %v3876_v8, %v3865_v7  ;;  %v3963_v16 = vadd.f32 %v3962_v18, %v3951_v56 }
0x1590   : > { %v3966_v21 = vpack.c.bf16 %v3877_v14, %v3877_v14  ;;  %v3983_v27 = vpack.c.bf16 %v3963_v16, %v3963_v16 }
0x1592   : > { %4057 = vmatmul.bf16.vlgmr.msrb.gmra.mxu0 %v3983_v27  ;;  %4118 = vmatmul.bf16.vlgmr.msrb.gmra.mxu1 %v3966_v21 }
0x1595   : > { %v3878_v1 = vpop.f32.mrf.mxu2  ;;  %v3964_v22 = vpop.f32.mrf.mxu3 }
0x160f   : > { %v4058_v28 = vpop.f32.mrf.mxu0  ;;  %v4119_v2 = vpop.f32.mrf.mxu1 }
0x1610   : > { %v4120_v30 = vadd.f32 %v4119_v2, %v4058_v28 }
0x1612   : > { %v4124_v38 = vadd.f32 %v4123_v55, %v4120_v30 }
0x1614   : > { %4125 = vst [vmem:[%s7333_s21] sm:$0x1] %v4124_v38 }
0x1617   : > { %v4060_v47 = vpop.f32.mrf.mxu0  ;;  %v4121_v37 = vpop.f32.mrf.mxu1 }
0x1618 PF: > { %s7334_s27 = sld [smem:[#allocation23_spill]] }
0x1619   : > { %s7335_s24 = sld [smem:[#allocation20_spill]] }
0x161a   : > { %s7336_s25 = sld [smem:[#allocation21_spill]] }
0x161b   : > { %s7337_s26 = sld [smem:[#allocation24_spill]] }
0x161e   : > { %p28_p6 = scmp.ge.s32.totalorder %s7334_s27, 5  }
0x1620   :  { %30 = sbr.rel (!%p28_p6) target bundleno = 18 (0x12), region = 212 }
0x1625   :  { %4143 = vsyncpa [#allocation4], 1 }
0x1626   :  { %4145 = vsyncpa [#allocation4 + $0x1], 1 }
0x1627   :  { %4146 = vsyncpa [#allocation6], 1 }
0x1628   :  { %4147 = vsyncpa [#allocation14], 1 }

</bundles_post_ra>
